<compile_context>
chip_gen: v7x
topology: tpu7x:2x2x1
jax: 0.10.0
libtpu: 0.0.40
codegen_flags: <defaults>
</compile_context>

<pallas_src>
import jax
import jax.numpy as jnp
from jax.experimental import pallas as pl
from jax.experimental.pallas import tpu as pltpu


# ----------------------------------------------------------------------------
# Model configuration (Linear(64*5*5, 128) in the PyTorch module implies 5x5)
# ----------------------------------------------------------------------------
KERNEL_SIZE = 3
FC_DIRECTION = 8
ACTION_DIM = 4
NUM_DIRECTIONS = 4
IMG_H = IMG_W = 5
IMG_C = 3
CNN_CH = 64
FC_HIDDEN = 128

PAD_HW = IMG_H + 2                     # 7 : spatially padded grid side
TAPS = KERNEL_SIZE * KERNEL_SIZE       # 9
K1 = 32                                # conv1 im2col depth (27 padded to 32)
K2 = TAPS * CNN_CH                     # 576 : conv2 im2col depth
KFC = IMG_H * IMG_W * CNN_CH           # 1600 : FC input depth
FC_KCHUNK = IMG_W * CNN_CH             # 320 : FC K-chunk (one image row)
HEAD_N = ACTION_DIM + 1                # 5 : [logits(4) | value(1)]
HEAD_PAD = 128                         # lane-dense padded head output width

BT = 8                                 # batch tile (rows per grid step), mult of 8
N_POS = IMG_H * IMG_W                  # 25 interior positions
N_ROWS2 = IMG_H * PAD_HW               # 35 padded rows computed for conv2 (ip=1..5)
SHIFT_MAX = PAD_HW + 1                 # 8 : max |flat row shift| of a 3x3 tap
N_PADPOS = N_ROWS2 + 2 * SHIFT_MAX     # 51 padded positions held in h1p


# ----------------------------------------------------------------------------
# Fused forward kernel (one batch tile of BT rows per grid step)
# ----------------------------------------------------------------------------
def _fused_forward_kernel(x_ref, dir_ref,
                          w1_ref, b1_ref, w2_ref, b2_ref,
                          w3_ref, b3_ref, whc_ref, whd_ref,
                          out_ref, h1p_ref, h1im_ref, h2s_ref, h2g_ref):
    """x_ref   : (25*BT, 32)  bf16  conv1 im2col, row = (i*5+j)*BT + b
       dir_ref : (BT, 1)      i32   direction ids
       w1_ref  : (32, 64)     bf16  conv1 im2col weights   b1_ref: (1, 64) f32
       w2_ref  : (576, 64)    bf16  conv2 im2col weights   b2_ref: (1, 64) f32
       w3_ref  : (1600, 128)  bf16  FC weights ((i,j,c) rows) b3_ref: (1,128) f32
       whc_ref : (128, 128)   bf16  [actor|critic|0] head weights (feature part)
       whd_ref : (4, 128)     f32   folded dir-embedding head rows (+ head bias)
       out_ref : (BT, 128)    f32   [logits(4) | value(1) | zeros]
       h1p_ref : (51*BT, 64)  bf16  zero-padded spatial-major conv1 activations
       h1im_ref: (35*BT, 576) bf16  conv2 im2col staging
       h2s_ref : (35*BT, 64)  bf16  conv2 activations (padded rows 1..5)
       h2g_ref : (BT, 1600)   bf16  batch-major FC input
    """
    f32, bf16 = jnp.float32, jnp.bfloat16

    # ---------------- conv1: one im2col matmul --------------------------------
    h1 = jnp.dot(x_ref[...], w1_ref[...], preferred_element_type=f32)
    h1 = jnp.maximum(h1 + b1_ref[...], 0.0).astype(bf16)          # (25*BT, 64)

    # ---------------- stage h1 into the zero-padded spatial-major buffer ------
    # h1p row = (pp + 1)*BT + b for padded flat position pp in [-1, 50); only the
    # 25 interior positions carry data, the rest is conv2's zero padding.
    h1p_ref[0:9 * BT, :] = jnp.zeros((9 * BT, CNN_CH), bf16)       # pp = -1 .. 7
    for i in range(IMG_H - 1):                                     # row-to-row gaps
        g = (14 + 7 * i) * BT
        h1p_ref[g:g + 2 * BT, :] = jnp.zeros((2 * BT, CNN_CH), bf16)
    h1p_ref[42 * BT:51 * BT, :] = jnp.zeros((9 * BT, CNN_CH), bf16)  # pp = 41 .. 49
    for i in range(IMG_H):                                         # interior writes
        dst = (9 + 7 * i) * BT
        h1p_ref[dst:dst + IMG_W * BT, :] = h1[i * IMG_W * BT:(i + 1) * IMG_W * BT, :]

    # ---------------- conv2 im2col: 9 shifted slices -> lane groups -----------
    # h1im row r = (p - 7)*BT + b for padded position p in [7, 42)  (rows ip=1..5)
    for t in range(TAPS):
        kh, kw = divmod(t, KERNEL_SIZE)
        d = (kh - 1) * PAD_HW + (kw - 1)                           # in [-8, 8]
        src = (SHIFT_MAX + d) * BT
        h1im_ref[:, t * CNN_CH:(t + 1) * CNN_CH] = h1p_ref[src:src + N_ROWS2 * BT, :]

    # ---------------- conv2: K=576-deep matmuls, 5 row chunks -----------------
    for c in range(IMG_H):
        r0 = PAD_HW * c * BT
        acc = jnp.dot(h1im_ref[r0:r0 + PAD_HW * BT, :], w2_ref[...],
                      preferred_element_type=f32)
        h2s_ref[r0:r0 + PAD_HW * BT, :] = jnp.maximum(acc + b2_ref[...],
                                                      0.0).astype(bf16)

    # ---------------- gather interior h2 into batch-major (BT, 1600) ----------
    for i in range(IMG_H):
        for j in range(IMG_W):
            p = PAD_HW * i + j + 1                                 # h2s row block
            k = (i * IMG_W + j) * CNN_CH
            h2g_ref[:, k:k + CNN_CH] = h2s_ref[p * BT:(p + 1) * BT, :]

    # ---------------- Linear(1600 -> 128): 5 K=320-deep matmuls ---------------
    cacc = None
    for c in range(IMG_H):
        contrib = jnp.dot(h2g_ref[:, c * FC_KCHUNK:(c + 1) * FC_KCHUNK],
                          w3_ref[c * FC_KCHUNK:(c + 1) * FC_KCHUNK, :],
                          preferred_element_type=f32)
        cacc = contrib if cacc is None else cacc + contrib
    cfeat = jnp.maximum(cacc + b3_ref[...], 0.0)                   # (BT, 128) f32

    # ---------------- fused actor/critic head ---------------------------------
    head = jnp.dot(cfeat.astype(bf16), whc_ref[...], preferred_element_type=f32)
    dvals = dir_ref[...]                                           # (BT, 1) i32
    dsel = None                                                    # 4-way select of
    for d in range(NUM_DIRECTIONS):                                # folded dir rows
        contrib = jnp.where(dvals == d, whd_ref[d:d + 1, :], 0.0)
        dsel = contrib if dsel is None else dsel + contrib
    out_ref[...] = head + dsel


# ----------------------------------------------------------------------------
# One-time parameter preparation (all layout work + bf16 casts happen here)
# ----------------------------------------------------------------------------
def prepare_params(p):
    f32, bf16 = jnp.float32, jnp.bfloat16
    # conv1 im2col weights: row = (kh*3 + kw)*3 + cin (padded to 32), col = cout
    w1 = jnp.transpose(p["W1"], (2, 3, 1, 0)).reshape(TAPS * IMG_C, CNN_CH)
    w1 = jnp.pad(w1, ((0, K1 - TAPS * IMG_C), (0, 0))).astype(bf16)
    # conv2 im2col weights: row = (kh*3 + kw)*64 + cin, col = cout
    w2 = jnp.transpose(p["W2"], (2, 3, 1, 0)).reshape(K2, CNN_CH).astype(bf16)
    # FC weights permuted so rows follow the (i, j, c) gather order (no NCHW
    # transpose needed at runtime)
    w3 = jnp.transpose(p["W3"].reshape(FC_HIDDEN, CNN_CH, IMG_H, IMG_W),
                       (2, 3, 1, 0)).reshape(KFC, FC_HIDDEN).astype(bf16)
    # head: concat actor/critic, fold direction embedding AND biases, pad lanes
    wa, wc, emb = p["Wa"], p["Wc"], p["emb"]
    whc = jnp.concatenate([wa[:, :FC_HIDDEN].T, wc[:, :FC_HIDDEN].T], axis=1)
    whd = jnp.concatenate([emb @ wa[:, FC_HIDDEN:].T, emb @ wc[:, FC_HIDDEN:].T],
                          axis=1)
    bh = jnp.concatenate([p["ba"], p["bc"]])                       # (5,)
    whd = whd + bh[None, :]                                        # fold head bias
    whc = jnp.pad(whc, ((0, 0), (0, HEAD_PAD - HEAD_N))).astype(bf16)
    whd = jnp.pad(whd, ((0, 0), (0, HEAD_PAD - HEAD_N))).astype(f32)
    return {
        "w1": w1, "b1": p["b1"].reshape(1, CNN_CH).astype(f32),
        "w2": w2, "b2": p["b2"].reshape(1, CNN_CH).astype(f32),
        "w3": w3, "b3": p["b3"].reshape(1, FC_HIDDEN).astype(f32),
        "whc": whc, "whd": whd,
    }


# ----------------------------------------------------------------------------
# Forward pass (== Agent_Complex.forward)
# ----------------------------------------------------------------------------
@jax.jit
def agent_complex_forward(prepped, image, direction):
    B = image.shape[0]
    B_pad = ((B + BT - 1) // BT) * BT
    n_tiles = B_pad // BT

    # --- tiny input glue: batch pad, spatial pad, interior-only conv1 im2col ---
    img = image.astype(jnp.float32)
    if B_pad != B:
        img = jnp.pad(img, ((0, B_pad - B), (0, 0), (0, 0), (0, 0)))
    xpad = jnp.pad(img, ((0, 0), (1, 1), (1, 1), (0, 0)))          # (B_pad,7,7,3)
    cols = [xpad[:, i:i + KERNEL_SIZE, j:j + KERNEL_SIZE, :].reshape(B_pad,
                                                                     TAPS * IMG_C)
            for i in range(IMG_H) for j in range(IMG_W)]
    x_im = jnp.stack(cols, axis=0)                                 # (25,B_pad,27)
    x_im = x_im.reshape(N_POS, n_tiles, BT, TAPS * IMG_C)
    x_im = jnp.transpose(x_im, (1, 0, 2, 3)).reshape(n_tiles, N_POS * BT,
                                                     TAPS * IMG_C)
    x_im = jnp.pad(x_im, ((0, 0), (0, 0), (0, K1 - TAPS * IMG_C)))
    x_im = x_im.astype(jnp.bfloat16)

    if direction.ndim > 1:
        direction = direction.squeeze(-1)
    dir_i = direction.astype(jnp.int32)
    if B_pad != B:
        dir_i = jnp.pad(dir_i, (0, B_pad - B))
    dir_i = dir_i.reshape(B_pad, 1)

    def _rep_spec(a):   # whole-array block, identical for every grid step
        return pl.BlockSpec(a.shape, lambda t: (0, 0))

    out = pl.pallas_call(
        _fused_forward_kernel,
        out_shape=jax.ShapeDtypeStruct((B_pad, HEAD_PAD), jnp.float32),
        grid=(n_tiles,),
        in_specs=[
            pl.BlockSpec((None, N_POS * BT, K1), lambda t: (t, 0, 0)),   # x_im
            pl.BlockSpec((BT, 1), lambda t: (t, 0)),                     # dir
            _rep_spec(prepped["w1"]), _rep_spec(prepped["b1"]),
            _rep_spec(prepped["w2"]), _rep_spec(prepped["b2"]),
            _rep_spec(prepped["w3"]), _rep_spec(prepped["b3"]),
            _rep_spec(prepped["whc"]), _rep_spec(prepped["whd"]),
        ],
        out_specs=pl.BlockSpec((BT, HEAD_PAD), lambda t: (t, 0)),
        scratch_shapes=[
            pltpu.VMEM((N_PADPOS * BT, CNN_CH), jnp.bfloat16),   # h1p
            pltpu.VMEM((N_ROWS2 * BT, K2), jnp.bfloat16),        # h1im
            pltpu.VMEM((N_ROWS2 * BT, CNN_CH), jnp.bfloat16),    # h2s
            pltpu.VMEM((BT, KFC), jnp.bfloat16),                 # h2g
        ],
        compiler_params=pltpu.CompilerParams(
            dimension_semantics=("parallel",)),
    )(x_im, dir_i,
      prepped["w1"], prepped["b1"], prepped["w2"], prepped["b2"],
      prepped["w3"], prepped["b3"], prepped["whc"], prepped["whd"])

    logits = out[:B, :ACTION_DIM]
    value = out[:B, ACTION_DIM:ACTION_DIM + 1]
    return logits, value


# ----------------------------------------------------------------------------
# Deterministic synthetic parameters (torch layouts) + pure-JAX f32 reference
# ----------------------------------------------------------------------------
def init_params(key):
    ks = jax.random.split(key, 10)
    s = 0.05
    return {
        "W1": jax.random.normal(ks[0], (CNN_CH, IMG_C, KERNEL_SIZE, KERNEL_SIZE), jnp.float32) * s,
        "b1": jax.random.normal(ks[1], (CNN_CH,), jnp.float32) * s,
        "W2": jax.random.normal(ks[2], (CNN_CH, CNN_CH, KERNEL_SIZE, KERNEL_SIZE), jnp.float32) * s,
        "b2": jax.random.normal(ks[3], (CNN_CH,), jnp.float32) * s,
        "W3": jax.random.normal(ks[4], (FC_HIDDEN, CNN_CH * IMG_H * IMG_W), jnp.float32) * s,
        "b3": jax.random.normal(ks[5], (FC_HIDDEN,), jnp.float32) * s,
        "emb": jax.random.normal(ks[6], (NUM_DIRECTIONS, FC_DIRECTION), jnp.float32) * s,
        "Wa": jax.random.normal(ks[7], (ACTION_DIM, FC_HIDDEN + FC_DIRECTION), jnp.float32) * s,
        "ba": jax.random.normal(ks[8], (ACTION_DIM,), jnp.float32) * s,
        "Wc": jax.random.normal(ks[9], (1, FC_HIDDEN + FC_DIRECTION), jnp.float32) * s,
        "bc": jnp.zeros((1,), jnp.float32),
    }


def _reference_forward(params, image, direction):
    img = image.astype(jnp.float32)
    w1 = jnp.transpose(params["W1"], (2, 3, 1, 0))        # HWIO
    h1 = jax.lax.conv_general_dilated(img, w1, (1, 1), "SAME",
                                      dimension_numbers=("NHWC", "HWIO", "NHWC"))
    h1 = jax.nn.relu(h1 + params["b1"])
    w2 = jnp.transpose(params["W2"], (2, 3, 1, 0))
    h2 = jax.lax.conv_general_dilated(h1, w2, (1, 1), "SAME",
                                      dimension_numbers=("NHWC", "HWIO", "NHWC"))
    h2 = jax.nn.relu(h2 + params["b2"])
    flat = jnp.transpose(h2, (0, 3, 1, 2)).reshape(image.shape[0], -1)   # NCHW flatten
    c = jax.nn.relu(flat @ params["W3"].T + params["b3"])
    d = direction.squeeze(-1) if direction.ndim > 1 else direction
    demb = params["emb"][d.astype(jnp.int32)]
    x = jnp.concatenate([c, demb], axis=-1)
    logits = x @ params["Wa"].T + params["ba"]
    value = x @ params["Wc"].T + params["bc"]
    return logits, value


if __name__ == "__main__":
    key = jax.random.PRNGKey(0)
    k_param, k_img, k_dir = jax.random.split(key, 3)

    params = init_params(k_param)
    prepped = prepare_params(params)          # one-time weight layout work

    B = 2
    image = jax.random.uniform(k_img, (B, IMG_H, IMG_W, IMG_C), jnp.float32)
    direction = jax.random.randint(k_dir, (B, 1), 0, NUM_DIRECTIONS)

    logits, value = agent_complex_forward(prepped, image, direction)
    jax.block_until_ready((logits, value))

    ref_logits, ref_value = _reference_forward(params, image, direction)
    assert logits.shape == (B, ACTION_DIM) and value.shape == (B, 1)
    # bf16 MXU inputs (f32 accumulate) -> compare against the f32 reference with
    # bf16-appropriate tolerances.
    assert jnp.allclose(logits, ref_logits, rtol=5e-2, atol=1e-2), (
        float(jnp.max(jnp.abs(logits - ref_logits))))
    assert jnp.allclose(value, ref_value, rtol=5e-2, atol=1e-2), (
        float(jnp.max(jnp.abs(value - ref_value))))
    print("KERNEL_OK")
</pallas_src>

<mosaic_0001>
module attributes {stable_mosaic.version = 11 : i64} {
  func.func @_fused_forward_kernel(%arg0: i32, %arg1: memref<1x200x32xbf16, #tpu.memory_space<vmem>>, %arg2: memref<8x1xi32, #tpu.memory_space<vmem>>, %arg3: memref<32x64xbf16, #tpu.memory_space<vmem>>, %arg4: memref<1x64xf32, #tpu.memory_space<vmem>>, %arg5: memref<576x64xbf16, #tpu.memory_space<vmem>>, %arg6: memref<1x64xf32, #tpu.memory_space<vmem>>, %arg7: memref<1600x128xbf16, #tpu.memory_space<vmem>>, %arg8: memref<1x128xf32, #tpu.memory_space<vmem>>, %arg9: memref<128x128xbf16, #tpu.memory_space<vmem>>, %arg10: memref<4x128xf32, #tpu.memory_space<vmem>>, %arg11: memref<8x128xf32, #tpu.memory_space<vmem>>, %arg12: memref<408x64xbf16, #tpu.memory_space<vmem>>, %arg13: memref<280x576xbf16, #tpu.memory_space<vmem>>, %arg14: memref<280x64xbf16, #tpu.memory_space<vmem>>, %arg15: memref<8x1600xbf16, #tpu.memory_space<vmem>>) attributes {dimension_semantics = [#tpu.dimension_semantics<parallel>], iteration_bounds = array<i64: 1>, scalar_prefetch = 0 : i64, scratch_operands = 4 : i64, tpu.core_type = #tpu.core_type<tc>, window_params = [{transform_indices = @transform_0, window_bounds = array<i64: 1, 200, 32>}, {transform_indices = @transform_1, window_bounds = array<i64: 8, 1>}, {pipeline_mode = #tpu.pipeline_mode<synchronous>, transform_indices = @transform_2, window_bounds = array<i64: 32, 64>}, {pipeline_mode = #tpu.pipeline_mode<synchronous>, transform_indices = @transform_3, window_bounds = array<i64: 1, 64>}, {pipeline_mode = #tpu.pipeline_mode<synchronous>, transform_indices = @transform_4, window_bounds = array<i64: 576, 64>}, {pipeline_mode = #tpu.pipeline_mode<synchronous>, transform_indices = @transform_5, window_bounds = array<i64: 1, 64>}, {pipeline_mode = #tpu.pipeline_mode<synchronous>, transform_indices = @transform_6, window_bounds = array<i64: 1600, 128>}, {pipeline_mode = #tpu.pipeline_mode<synchronous>, transform_indices = @transform_7, window_bounds = array<i64: 1, 128>}, {pipeline_mode = #tpu.pipeline_mode<synchronous>, transform_indices = @transform_8, window_bounds = array<i64: 128, 128>}, {pipeline_mode = #tpu.pipeline_mode<synchronous>, transform_indices = @transform_9, window_bounds = array<i64: 4, 128>}, {transform_indices = @transform_10, window_bounds = array<i64: 8, 128>}]} {
    %c0 = arith.constant 0 : index
    %c0_0 = arith.constant 0 : index
    %c0_1 = arith.constant 0 : index
    %0 = vector.load %arg1[%c0, %c0_0, %c0_1] : memref<1x200x32xbf16, #tpu.memory_space<vmem>>, vector<1x200x32xbf16>
    %1 = vector.shape_cast %0 : vector<1x200x32xbf16> to vector<200x32xbf16>
    %c0_2 = arith.constant 0 : index
    %c0_3 = arith.constant 0 : index
    %2 = vector.load %arg3[%c0_2, %c0_3] : memref<32x64xbf16, #tpu.memory_space<vmem>>, vector<32x64xbf16>
    %cst = arith.constant dense<0.000000e+00> : vector<200x64xf32>
    %3 = tpu.matmul %1, %2, %cst {dimension_numbers = #tpu.dot_dimension_numbers<[1], [0], [0], [1], [0, 0, 1, 1], [], []>} : vector<200x32xbf16>, vector<32x64xbf16>, vector<200x64xf32> -> vector<200x64xf32>
    %c0_4 = arith.constant 0 : index
    %c0_5 = arith.constant 0 : index
    %4 = vector.load %arg4[%c0_4, %c0_5] : memref<1x64xf32, #tpu.memory_space<vmem>>, vector<1x64xf32>
    %5 = vector.broadcast %4 : vector<1x64xf32> to vector<200x64xf32>
    %6 = arith.addf %3, %5 : vector<200x64xf32>
    %cst_6 = arith.constant 0.000000e+00 : f32
    %7 = vector.broadcast %cst_6 : f32 to vector<200x64xf32>
    %8 = arith.maximumf %6, %7 : vector<200x64xf32>
    %9 = arith.truncf %8 : vector<200x64xf32> to vector<200x64xbf16>
    %cst_7 = arith.constant 0.000000e+00 : bf16
    %10 = vector.broadcast %cst_7 : bf16 to vector<72x64xbf16>
    %c0_8 = arith.constant 0 : index
    %c0_9 = arith.constant 0 : index
    %11 = vector.load %arg12[%c0_8, %c0_9] : memref<408x64xbf16, #tpu.memory_space<vmem>>, vector<72x64xbf16>
    tpu.vector_store %arg12[%c0_8, %c0_9], %10 {strides = array<i32>} : memref<408x64xbf16, #tpu.memory_space<vmem>>, vector<72x64xbf16>,
    %cst_10 = arith.constant 0.000000e+00 : bf16
    %12 = vector.broadcast %cst_10 : bf16 to vector<16x64xbf16>
    %c112 = arith.constant 112 : index
    %c0_11 = arith.constant 0 : index
    %13 = vector.load %arg12[%c112, %c0_11] : memref<408x64xbf16, #tpu.memory_space<vmem>>, vector<16x64xbf16>
    tpu.vector_store %arg12[%c112, %c0_11], %12 {strides = array<i32>} : memref<408x64xbf16, #tpu.memory_space<vmem>>, vector<16x64xbf16>,
    %cst_12 = arith.constant 0.000000e+00 : bf16
    %14 = vector.broadcast %cst_12 : bf16 to vector<16x64xbf16>
    %c168 = arith.constant 168 : index
    %c0_13 = arith.constant 0 : index
    %15 = vector.load %arg12[%c168, %c0_13] : memref<408x64xbf16, #tpu.memory_space<vmem>>, vector<16x64xbf16>
    tpu.vector_store %arg12[%c168, %c0_13], %14 {strides = array<i32>} : memref<408x64xbf16, #tpu.memory_space<vmem>>, vector<16x64xbf16>,
    %cst_14 = arith.constant 0.000000e+00 : bf16
    %16 = vector.broadcast %cst_14 : bf16 to vector<16x64xbf16>
    %c224 = arith.constant 224 : index
    %c0_15 = arith.constant 0 : index
    %17 = vector.load %arg12[%c224, %c0_15] : memref<408x64xbf16, #tpu.memory_space<vmem>>, vector<16x64xbf16>
    tpu.vector_store %arg12[%c224, %c0_15], %16 {strides = array<i32>} : memref<408x64xbf16, #tpu.memory_space<vmem>>, vector<16x64xbf16>,
    %cst_16 = arith.constant 0.000000e+00 : bf16
    %18 = vector.broadcast %cst_16 : bf16 to vector<16x64xbf16>
    %c280 = arith.constant 280 : index
    %c0_17 = arith.constant 0 : index
    %19 = vector.load %arg12[%c280, %c0_17] : memref<408x64xbf16, #tpu.memory_space<vmem>>, vector<16x64xbf16>
    tpu.vector_store %arg12[%c280, %c0_17], %18 {strides = array<i32>} : memref<408x64xbf16, #tpu.memory_space<vmem>>, vector<16x64xbf16>,
    %cst_18 = arith.constant 0.000000e+00 : bf16
    %20 = vector.broadcast %cst_18 : bf16 to vector<72x64xbf16>
    %c336 = arith.constant 336 : index
    %c0_19 = arith.constant 0 : index
    %21 = vector.load %arg12[%c336, %c0_19] : memref<408x64xbf16, #tpu.memory_space<vmem>>, vector<72x64xbf16>
    tpu.vector_store %arg12[%c336, %c0_19], %20 {strides = array<i32>} : memref<408x64xbf16, #tpu.memory_space<vmem>>, vector<72x64xbf16>,
    %22 = vector.extract_strided_slice %9 {offsets = [0, 0], sizes = [40, 64], strides = [1, 1]} : vector<200x64xbf16> to vector<40x64xbf16>
    %c72 = arith.constant 72 : index
    %c0_20 = arith.constant 0 : index
    %23 = vector.load %arg12[%c72, %c0_20] : memref<408x64xbf16, #tpu.memory_space<vmem>>, vector<40x64xbf16>
    tpu.vector_store %arg12[%c72, %c0_20], %22 {strides = array<i32>} : memref<408x64xbf16, #tpu.memory_space<vmem>>, vector<40x64xbf16>,
    %24 = vector.extract_strided_slice %9 {offsets = [40, 0], sizes = [40, 64], strides = [1, 1]} : vector<200x64xbf16> to vector<40x64xbf16>
    %c128 = arith.constant 128 : index
    %c0_21 = arith.constant 0 : index
    %25 = vector.load %arg12[%c128, %c0_21] : memref<408x64xbf16, #tpu.memory_space<vmem>>, vector<40x64xbf16>
    tpu.vector_store %arg12[%c128, %c0_21], %24 {strides = array<i32>} : memref<408x64xbf16, #tpu.memory_space<vmem>>, vector<40x64xbf16>,
    %26 = vector.extract_strided_slice %9 {offsets = [80, 0], sizes = [40, 64], strides = [1, 1]} : vector<200x64xbf16> to vector<40x64xbf16>
    %c184 = arith.constant 184 : index
    %c0_22 = arith.constant 0 : index
    %27 = vector.load %arg12[%c184, %c0_22] : memref<408x64xbf16, #tpu.memory_space<vmem>>, vector<40x64xbf16>
    tpu.vector_store %arg12[%c184, %c0_22], %26 {strides = array<i32>} : memref<408x64xbf16, #tpu.memory_space<vmem>>, vector<40x64xbf16>,
    %28 = vector.extract_strided_slice %9 {offsets = [120, 0], sizes = [40, 64], strides = [1, 1]} : vector<200x64xbf16> to vector<40x64xbf16>
    %c240 = arith.constant 240 : index
    %c0_23 = arith.constant 0 : index
    %29 = vector.load %arg12[%c240, %c0_23] : memref<408x64xbf16, #tpu.memory_space<vmem>>, vector<40x64xbf16>
    tpu.vector_store %arg12[%c240, %c0_23], %28 {strides = array<i32>} : memref<408x64xbf16, #tpu.memory_space<vmem>>, vector<40x64xbf16>,
    %30 = vector.extract_strided_slice %9 {offsets = [160, 0], sizes = [40, 64], strides = [1, 1]} : vector<200x64xbf16> to vector<40x64xbf16>
    %c296 = arith.constant 296 : index
    %c0_24 = arith.constant 0 : index
    %31 = vector.load %arg12[%c296, %c0_24] : memref<408x64xbf16, #tpu.memory_space<vmem>>, vector<40x64xbf16>
    tpu.vector_store %arg12[%c296, %c0_24], %30 {strides = array<i32>} : memref<408x64xbf16, #tpu.memory_space<vmem>>, vector<40x64xbf16>,
    %c0_25 = arith.constant 0 : index
    %c0_26 = arith.constant 0 : index
    %32 = vector.load %arg12[%c0_25, %c0_26] : memref<408x64xbf16, #tpu.memory_space<vmem>>, vector<280x64xbf16>
    %c0_27 = arith.constant 0 : index
    %c0_28 = arith.constant 0 : index
    %33 = vector.load %arg13[%c0_27, %c0_28] : memref<280x576xbf16, #tpu.memory_space<vmem>>, vector<280x64xbf16>
    tpu.vector_store %arg13[%c0_27, %c0_28], %32 {strides = array<i32>} : memref<280x576xbf16, #tpu.memory_space<vmem>>, vector<280x64xbf16>,
    %c8 = arith.constant 8 : index
    %c0_29 = arith.constant 0 : index
    %34 = vector.load %arg12[%c8, %c0_29] : memref<408x64xbf16, #tpu.memory_space<vmem>>, vector<280x64xbf16>
    %c0_30 = arith.constant 0 : index
    %c64 = arith.constant 64 : index
    %35 = vector.load %arg13[%c0_30, %c64] : memref<280x576xbf16, #tpu.memory_space<vmem>>, vector<280x64xbf16>
    tpu.vector_store %arg13[%c0_30, %c64], %34 {strides = array<i32>} : memref<280x576xbf16, #tpu.memory_space<vmem>>, vector<280x64xbf16>,
    %c16 = arith.constant 16 : index
    %c0_31 = arith.constant 0 : index
    %36 = vector.load %arg12[%c16, %c0_31] : memref<408x64xbf16, #tpu.memory_space<vmem>>, vector<280x64xbf16>
    %c0_32 = arith.constant 0 : index
    %c128_33 = arith.constant 128 : index
    %37 = vector.load %arg13[%c0_32, %c128_33] : memref<280x576xbf16, #tpu.memory_space<vmem>>, vector<280x64xbf16>
    tpu.vector_store %arg13[%c0_32, %c128_33], %36 {strides = array<i32>} : memref<280x576xbf16, #tpu.memory_space<vmem>>, vector<280x64xbf16>,
    %c56 = arith.constant 56 : index
    %c0_34 = arith.constant 0 : index
    %38 = vector.load %arg12[%c56, %c0_34] : memref<408x64xbf16, #tpu.memory_space<vmem>>, vector<280x64xbf16>
    %c0_35 = arith.constant 0 : index
    %c192 = arith.constant 192 : index
    %39 = vector.load %arg13[%c0_35, %c192] : memref<280x576xbf16, #tpu.memory_space<vmem>>, vector<280x64xbf16>
    tpu.vector_store %arg13[%c0_35, %c192], %38 {strides = array<i32>} : memref<280x576xbf16, #tpu.memory_space<vmem>>, vector<280x64xbf16>,
    %c64_36 = arith.constant 64 : index
    %c0_37 = arith.constant 0 : index
    %40 = vector.load %arg12[%c64_36, %c0_37] : memref<408x64xbf16, #tpu.memory_space<vmem>>, vector<280x64xbf16>
    %c0_38 = arith.constant 0 : index
    %c256 = arith.constant 256 : index
    %41 = vector.load %arg13[%c0_38, %c256] : memref<280x576xbf16, #tpu.memory_space<vmem>>, vector<280x64xbf16>
    tpu.vector_store %arg13[%c0_38, %c256], %40 {strides = array<i32>} : memref<280x576xbf16, #tpu.memory_space<vmem>>, vector<280x64xbf16>,
    %c72_39 = arith.constant 72 : index
    %c0_40 = arith.constant 0 : index
    %42 = vector.load %arg12[%c72_39, %c0_40] : memref<408x64xbf16, #tpu.memory_space<vmem>>, vector<280x64xbf16>
    %c0_41 = arith.constant 0 : index
    %c320 = arith.constant 320 : index
    %43 = vector.load %arg13[%c0_41, %c320] : memref<280x576xbf16, #tpu.memory_space<vmem>>, vector<280x64xbf16>
    tpu.vector_store %arg13[%c0_41, %c320], %42 {strides = array<i32>} : memref<280x576xbf16, #tpu.memory_space<vmem>>, vector<280x64xbf16>,
    %c112_42 = arith.constant 112 : index
    %c0_43 = arith.constant 0 : index
    %44 = vector.load %arg12[%c112_42, %c0_43] : memref<408x64xbf16, #tpu.memory_space<vmem>>, vector<280x64xbf16>
    %c0_44 = arith.constant 0 : index
    %c384 = arith.constant 384 : index
    %45 = vector.load %arg13[%c0_44, %c384] : memref<280x576xbf16, #tpu.memory_space<vmem>>, vector<280x64xbf16>
    tpu.vector_store %arg13[%c0_44, %c384], %44 {strides = array<i32>} : memref<280x576xbf16, #tpu.memory_space<vmem>>, vector<280x64xbf16>,
    %c120 = arith.constant 120 : index
    %c0_45 = arith.constant 0 : index
    %46 = vector.load %arg12[%c120, %c0_45] : memref<408x64xbf16, #tpu.memory_space<vmem>>, vector<280x64xbf16>
    %c0_46 = arith.constant 0 : index
    %c448 = arith.constant 448 : index
    %47 = vector.load %arg13[%c0_46, %c448] : memref<280x576xbf16, #tpu.memory_space<vmem>>, vector<280x64xbf16>
    tpu.vector_store %arg13[%c0_46, %c448], %46 {strides = array<i32>} : memref<280x576xbf16, #tpu.memory_space<vmem>>, vector<280x64xbf16>,
    %c128_47 = arith.constant 128 : index
    %c0_48 = arith.constant 0 : index
    %48 = vector.load %arg12[%c128_47, %c0_48] : memref<408x64xbf16, #tpu.memory_space<vmem>>, vector<280x64xbf16>
    %c0_49 = arith.constant 0 : index
    %c512 = arith.constant 512 : index
    %49 = vector.load %arg13[%c0_49, %c512] : memref<280x576xbf16, #tpu.memory_space<vmem>>, vector<280x64xbf16>
    tpu.vector_store %arg13[%c0_49, %c512], %48 {strides = array<i32>} : memref<280x576xbf16, #tpu.memory_space<vmem>>, vector<280x64xbf16>,
    %c0_50 = arith.constant 0 : index
    %c0_51 = arith.constant 0 : index
    %50 = vector.load %arg13[%c0_50, %c0_51] : memref<280x576xbf16, #tpu.memory_space<vmem>>, vector<56x576xbf16>
    %c0_52 = arith.constant 0 : index
    %c0_53 = arith.constant 0 : index
    %51 = vector.load %arg5[%c0_52, %c0_53] : memref<576x64xbf16, #tpu.memory_space<vmem>>, vector<576x64xbf16>
    %cst_54 = arith.constant dense<0.000000e+00> : vector<56x64xf32>
    %52 = tpu.matmul %50, %51, %cst_54 {dimension_numbers = #tpu.dot_dimension_numbers<[1], [0], [0], [1], [0, 0, 1, 1], [], []>} : vector<56x576xbf16>, vector<576x64xbf16>, vector<56x64xf32> -> vector<56x64xf32>
    %c0_55 = arith.constant 0 : index
    %c0_56 = arith.constant 0 : index
    %53 = vector.load %arg6[%c0_55, %c0_56] : memref<1x64xf32, #tpu.memory_space<vmem>>, vector<1x64xf32>
    %54 = vector.broadcast %53 : vector<1x64xf32> to vector<56x64xf32>
    %55 = arith.addf %52, %54 : vector<56x64xf32>
    %cst_57 = arith.constant 0.000000e+00 : f32
    %56 = vector.broadcast %cst_57 : f32 to vector<56x64xf32>
    %57 = arith.maximumf %55, %56 : vector<56x64xf32>
    %58 = arith.truncf %57 : vector<56x64xf32> to vector<56x64xbf16>
    %c0_58 = arith.constant 0 : index
    %c0_59 = arith.constant 0 : index
    %59 = vector.load %arg14[%c0_58, %c0_59] : memref<280x64xbf16, #tpu.memory_space<vmem>>, vector<56x64xbf16>
    tpu.vector_store %arg14[%c0_58, %c0_59], %58 {strides = array<i32>} : memref<280x64xbf16, #tpu.memory_space<vmem>>, vector<56x64xbf16>,
    %c56_60 = arith.constant 56 : index
    %c0_61 = arith.constant 0 : index
    %60 = vector.load %arg13[%c56_60, %c0_61] : memref<280x576xbf16, #tpu.memory_space<vmem>>, vector<56x576xbf16>
    %c0_62 = arith.constant 0 : index
    %c0_63 = arith.constant 0 : index
    %61 = vector.load %arg5[%c0_62, %c0_63] : memref<576x64xbf16, #tpu.memory_space<vmem>>, vector<576x64xbf16>
    %cst_64 = arith.constant dense<0.000000e+00> : vector<56x64xf32>
    %62 = tpu.matmul %60, %61, %cst_64 {dimension_numbers = #tpu.dot_dimension_numbers<[1], [0], [0], [1], [0, 0, 1, 1], [], []>} : vector<56x576xbf16>, vector<576x64xbf16>, vector<56x64xf32> -> vector<56x64xf32>
    %c0_65 = arith.constant 0 : index
    %c0_66 = arith.constant 0 : index
    %63 = vector.load %arg6[%c0_65, %c0_66] : memref<1x64xf32, #tpu.memory_space<vmem>>, vector<1x64xf32>
    %64 = vector.broadcast %63 : vector<1x64xf32> to vector<56x64xf32>
    %65 = arith.addf %62, %64 : vector<56x64xf32>
    %cst_67 = arith.constant 0.000000e+00 : f32
    %66 = vector.broadcast %cst_67 : f32 to vector<56x64xf32>
    %67 = arith.maximumf %65, %66 : vector<56x64xf32>
    %68 = arith.truncf %67 : vector<56x64xf32> to vector<56x64xbf16>
    %c56_68 = arith.constant 56 : index
    %c0_69 = arith.constant 0 : index
    %69 = vector.load %arg14[%c56_68, %c0_69] : memref<280x64xbf16, #tpu.memory_space<vmem>>, vector<56x64xbf16>
    tpu.vector_store %arg14[%c56_68, %c0_69], %68 {strides = array<i32>} : memref<280x64xbf16, #tpu.memory_space<vmem>>, vector<56x64xbf16>,
    %c112_70 = arith.constant 112 : index
    %c0_71 = arith.constant 0 : index
    %70 = vector.load %arg13[%c112_70, %c0_71] : memref<280x576xbf16, #tpu.memory_space<vmem>>, vector<56x576xbf16>
    %c0_72 = arith.constant 0 : index
    %c0_73 = arith.constant 0 : index
    %71 = vector.load %arg5[%c0_72, %c0_73] : memref<576x64xbf16, #tpu.memory_space<vmem>>, vector<576x64xbf16>
    %cst_74 = arith.constant dense<0.000000e+00> : vector<56x64xf32>
    %72 = tpu.matmul %70, %71, %cst_74 {dimension_numbers = #tpu.dot_dimension_numbers<[1], [0], [0], [1], [0, 0, 1, 1], [], []>} : vector<56x576xbf16>, vector<576x64xbf16>, vector<56x64xf32> -> vector<56x64xf32>
    %c0_75 = arith.constant 0 : index
    %c0_76 = arith.constant 0 : index
    %73 = vector.load %arg6[%c0_75, %c0_76] : memref<1x64xf32, #tpu.memory_space<vmem>>, vector<1x64xf32>
    %74 = vector.broadcast %73 : vector<1x64xf32> to vector<56x64xf32>
    %75 = arith.addf %72, %74 : vector<56x64xf32>
    %cst_77 = arith.constant 0.000000e+00 : f32
    %76 = vector.broadcast %cst_77 : f32 to vector<56x64xf32>
    %77 = arith.maximumf %75, %76 : vector<56x64xf32>
    %78 = arith.truncf %77 : vector<56x64xf32> to vector<56x64xbf16>
    %c112_78 = arith.constant 112 : index
    %c0_79 = arith.constant 0 : index
    %79 = vector.load %arg14[%c112_78, %c0_79] : memref<280x64xbf16, #tpu.memory_space<vmem>>, vector<56x64xbf16>
    tpu.vector_store %arg14[%c112_78, %c0_79], %78 {strides = array<i32>} : memref<280x64xbf16, #tpu.memory_space<vmem>>, vector<56x64xbf16>,
    %c168_80 = arith.constant 168 : index
    %c0_81 = arith.constant 0 : index
    %80 = vector.load %arg13[%c168_80, %c0_81] : memref<280x576xbf16, #tpu.memory_space<vmem>>, vector<56x576xbf16>
    %c0_82 = arith.constant 0 : index
    %c0_83 = arith.constant 0 : index
    %81 = vector.load %arg5[%c0_82, %c0_83] : memref<576x64xbf16, #tpu.memory_space<vmem>>, vector<576x64xbf16>
    %cst_84 = arith.constant dense<0.000000e+00> : vector<56x64xf32>
    %82 = tpu.matmul %80, %81, %cst_84 {dimension_numbers = #tpu.dot_dimension_numbers<[1], [0], [0], [1], [0, 0, 1, 1], [], []>} : vector<56x576xbf16>, vector<576x64xbf16>, vector<56x64xf32> -> vector<56x64xf32>
    %c0_85 = arith.constant 0 : index
    %c0_86 = arith.constant 0 : index
    %83 = vector.load %arg6[%c0_85, %c0_86] : memref<1x64xf32, #tpu.memory_space<vmem>>, vector<1x64xf32>
    %84 = vector.broadcast %83 : vector<1x64xf32> to vector<56x64xf32>
    %85 = arith.addf %82, %84 : vector<56x64xf32>
    %cst_87 = arith.constant 0.000000e+00 : f32
    %86 = vector.broadcast %cst_87 : f32 to vector<56x64xf32>
    %87 = arith.maximumf %85, %86 : vector<56x64xf32>
    %88 = arith.truncf %87 : vector<56x64xf32> to vector<56x64xbf16>
    %c168_88 = arith.constant 168 : index
    %c0_89 = arith.constant 0 : index
    %89 = vector.load %arg14[%c168_88, %c0_89] : memref<280x64xbf16, #tpu.memory_space<vmem>>, vector<56x64xbf16>
    tpu.vector_store %arg14[%c168_88, %c0_89], %88 {strides = array<i32>} : memref<280x64xbf16, #tpu.memory_space<vmem>>, vector<56x64xbf16>,
    %c224_90 = arith.constant 224 : index
    %c0_91 = arith.constant 0 : index
    %90 = vector.load %arg13[%c224_90, %c0_91] : memref<280x576xbf16, #tpu.memory_space<vmem>>, vector<56x576xbf16>
    %c0_92 = arith.constant 0 : index
    %c0_93 = arith.constant 0 : index
    %91 = vector.load %arg5[%c0_92, %c0_93] : memref<576x64xbf16, #tpu.memory_space<vmem>>, vector<576x64xbf16>
    %cst_94 = arith.constant dense<0.000000e+00> : vector<56x64xf32>
    %92 = tpu.matmul %90, %91, %cst_94 {dimension_numbers = #tpu.dot_dimension_numbers<[1], [0], [0], [1], [0, 0, 1, 1], [], []>} : vector<56x576xbf16>, vector<576x64xbf16>, vector<56x64xf32> -> vector<56x64xf32>
    %c0_95 = arith.constant 0 : index
    %c0_96 = arith.constant 0 : index
    %93 = vector.load %arg6[%c0_95, %c0_96] : memref<1x64xf32, #tpu.memory_space<vmem>>, vector<1x64xf32>
    %94 = vector.broadcast %93 : vector<1x64xf32> to vector<56x64xf32>
    %95 = arith.addf %92, %94 : vector<56x64xf32>
    %cst_97 = arith.constant 0.000000e+00 : f32
    %96 = vector.broadcast %cst_97 : f32 to vector<56x64xf32>
    %97 = arith.maximumf %95, %96 : vector<56x64xf32>
    %98 = arith.truncf %97 : vector<56x64xf32> to vector<56x64xbf16>
    %c224_98 = arith.constant 224 : index
    %c0_99 = arith.constant 0 : index
    %99 = vector.load %arg14[%c224_98, %c0_99] : memref<280x64xbf16, #tpu.memory_space<vmem>>, vector<56x64xbf16>
    tpu.vector_store %arg14[%c224_98, %c0_99], %98 {strides = array<i32>} : memref<280x64xbf16, #tpu.memory_space<vmem>>, vector<56x64xbf16>,
    %c8_100 = arith.constant 8 : index
    %c0_101 = arith.constant 0 : index
    %100 = vector.load %arg14[%c8_100, %c0_101] : memref<280x64xbf16, #tpu.memory_space<vmem>>, vector<8x64xbf16>
    %c0_102 = arith.constant 0 : index
    %c0_103 = arith.constant 0 : index
    %101 = vector.load %arg15[%c0_102, %c0_103] : memref<8x1600xbf16, #tpu.memory_space<vmem>>, vector<8x64xbf16>
    tpu.vector_store %arg15[%c0_102, %c0_103], %100 {strides = array<i32>} : memref<8x1600xbf16, #tpu.memory_space<vmem>>, vector<8x64xbf16>,
    %c16_104 = arith.constant 16 : index
    %c0_105 = arith.constant 0 : index
    %102 = vector.load %arg14[%c16_104, %c0_105] : memref<280x64xbf16, #tpu.memory_space<vmem>>, vector<8x64xbf16>
    %c0_106 = arith.constant 0 : index
    %c64_107 = arith.constant 64 : index
    %103 = vector.load %arg15[%c0_106, %c64_107] : memref<8x1600xbf16, #tpu.memory_space<vmem>>, vector<8x64xbf16>
    tpu.vector_store %arg15[%c0_106, %c64_107], %102 {strides = array<i32>} : memref<8x1600xbf16, #tpu.memory_space<vmem>>, vector<8x64xbf16>,
    %c24 = arith.constant 24 : index
    %c0_108 = arith.constant 0 : index
    %104 = vector.load %arg14[%c24, %c0_108] : memref<280x64xbf16, #tpu.memory_space<vmem>>, vector<8x64xbf16>
    %c0_109 = arith.constant 0 : index
    %c128_110 = arith.constant 128 : index
    %105 = vector.load %arg15[%c0_109, %c128_110] : memref<8x1600xbf16, #tpu.memory_space<vmem>>, vector<8x64xbf16>
    tpu.vector_store %arg15[%c0_109, %c128_110], %104 {strides = array<i32>} : memref<8x1600xbf16, #tpu.memory_space<vmem>>, vector<8x64xbf16>,
    %c32 = arith.constant 32 : index
    %c0_111 = arith.constant 0 : index
    %106 = vector.load %arg14[%c32, %c0_111] : memref<280x64xbf16, #tpu.memory_space<vmem>>, vector<8x64xbf16>
    %c0_112 = arith.constant 0 : index
    %c192_113 = arith.constant 192 : index
    %107 = vector.load %arg15[%c0_112, %c192_113] : memref<8x1600xbf16, #tpu.memory_space<vmem>>, vector<8x64xbf16>
    tpu.vector_store %arg15[%c0_112, %c192_113], %106 {strides = array<i32>} : memref<8x1600xbf16, #tpu.memory_space<vmem>>, vector<8x64xbf16>,
    %c40 = arith.constant 40 : index
    %c0_114 = arith.constant 0 : index
    %108 = vector.load %arg14[%c40, %c0_114] : memref<280x64xbf16, #tpu.memory_space<vmem>>, vector<8x64xbf16>
    %c0_115 = arith.constant 0 : index
    %c256_116 = arith.constant 256 : index
    %109 = vector.load %arg15[%c0_115, %c256_116] : memref<8x1600xbf16, #tpu.memory_space<vmem>>, vector<8x64xbf16>
    tpu.vector_store %arg15[%c0_115, %c256_116], %108 {strides = array<i32>} : memref<8x1600xbf16, #tpu.memory_space<vmem>>, vector<8x64xbf16>,
    %c64_117 = arith.constant 64 : index
    %c0_118 = arith.constant 0 : index
    %110 = vector.load %arg14[%c64_117, %c0_118] : memref<280x64xbf16, #tpu.memory_space<vmem>>, vector<8x64xbf16>
    %c0_119 = arith.constant 0 : index
    %c320_120 = arith.constant 320 : index
    %111 = vector.load %arg15[%c0_119, %c320_120] : memref<8x1600xbf16, #tpu.memory_space<vmem>>, vector<8x64xbf16>
    tpu.vector_store %arg15[%c0_119, %c320_120], %110 {strides = array<i32>} : memref<8x1600xbf16, #tpu.memory_space<vmem>>, vector<8x64xbf16>,
    %c72_121 = arith.constant 72 : index
    %c0_122 = arith.constant 0 : index
    %112 = vector.load %arg14[%c72_121, %c0_122] : memref<280x64xbf16, #tpu.memory_space<vmem>>, vector<8x64xbf16>
    %c0_123 = arith.constant 0 : index
    %c384_124 = arith.constant 384 : index
    %113 = vector.load %arg15[%c0_123, %c384_124] : memref<8x1600xbf16, #tpu.memory_space<vmem>>, vector<8x64xbf16>
    tpu.vector_store %arg15[%c0_123, %c384_124], %112 {strides = array<i32>} : memref<8x1600xbf16, #tpu.memory_space<vmem>>, vector<8x64xbf16>,
    %c80 = arith.constant 80 : index
    %c0_125 = arith.constant 0 : index
    %114 = vector.load %arg14[%c80, %c0_125] : memref<280x64xbf16, #tpu.memory_space<vmem>>, vector<8x64xbf16>
    %c0_126 = arith.constant 0 : index
    %c448_127 = arith.constant 448 : index
    %115 = vector.load %arg15[%c0_126, %c448_127] : memref<8x1600xbf16, #tpu.memory_space<vmem>>, vector<8x64xbf16>
    tpu.vector_store %arg15[%c0_126, %c448_127], %114 {strides = array<i32>} : memref<8x1600xbf16, #tpu.memory_space<vmem>>, vector<8x64xbf16>,
    %c88 = arith.constant 88 : index
    %c0_128 = arith.constant 0 : index
    %116 = vector.load %arg14[%c88, %c0_128] : memref<280x64xbf16, #tpu.memory_space<vmem>>, vector<8x64xbf16>
    %c0_129 = arith.constant 0 : index
    %c512_130 = arith.constant 512 : index
    %117 = vector.load %arg15[%c0_129, %c512_130] : memref<8x1600xbf16, #tpu.memory_space<vmem>>, vector<8x64xbf16>
    tpu.vector_store %arg15[%c0_129, %c512_130], %116 {strides = array<i32>} : memref<8x1600xbf16, #tpu.memory_space<vmem>>, vector<8x64xbf16>,
    %c96 = arith.constant 96 : index
    %c0_131 = arith.constant 0 : index
    %118 = vector.load %arg14[%c96, %c0_131] : memref<280x64xbf16, #tpu.memory_space<vmem>>, vector<8x64xbf16>
    %c0_132 = arith.constant 0 : index
    %c576 = arith.constant 576 : index
    %119 = vector.load %arg15[%c0_132, %c576] : memref<8x1600xbf16, #tpu.memory_space<vmem>>, vector<8x64xbf16>
    tpu.vector_store %arg15[%c0_132, %c576], %118 {strides = array<i32>} : memref<8x1600xbf16, #tpu.memory_space<vmem>>, vector<8x64xbf16>,
    %c120_133 = arith.constant 120 : index
    %c0_134 = arith.constant 0 : index
    %120 = vector.load %arg14[%c120_133, %c0_134] : memref<280x64xbf16, #tpu.memory_space<vmem>>, vector<8x64xbf16>
    %c0_135 = arith.constant 0 : index
    %c640 = arith.constant 640 : index
    %121 = vector.load %arg15[%c0_135, %c640] : memref<8x1600xbf16, #tpu.memory_space<vmem>>, vector<8x64xbf16>
    tpu.vector_store %arg15[%c0_135, %c640], %120 {strides = array<i32>} : memref<8x1600xbf16, #tpu.memory_space<vmem>>, vector<8x64xbf16>,
    %c128_136 = arith.constant 128 : index
    %c0_137 = arith.constant 0 : index
    %122 = vector.load %arg14[%c128_136, %c0_137] : memref<280x64xbf16, #tpu.memory_space<vmem>>, vector<8x64xbf16>
    %c0_138 = arith.constant 0 : index
    %c704 = arith.constant 704 : index
    %123 = vector.load %arg15[%c0_138, %c704] : memref<8x1600xbf16, #tpu.memory_space<vmem>>, vector<8x64xbf16>
    tpu.vector_store %arg15[%c0_138, %c704], %122 {strides = array<i32>} : memref<8x1600xbf16, #tpu.memory_space<vmem>>, vector<8x64xbf16>,
    %c136 = arith.constant 136 : index
    %c0_139 = arith.constant 0 : index
    %124 = vector.load %arg14[%c136, %c0_139] : memref<280x64xbf16, #tpu.memory_space<vmem>>, vector<8x64xbf16>
    %c0_140 = arith.constant 0 : index
    %c768 = arith.constant 768 : index
    %125 = vector.load %arg15[%c0_140, %c768] : memref<8x1600xbf16, #tpu.memory_space<vmem>>, vector<8x64xbf16>
    tpu.vector_store %arg15[%c0_140, %c768], %124 {strides = array<i32>} : memref<8x1600xbf16, #tpu.memory_space<vmem>>, vector<8x64xbf16>,
    %c144 = arith.constant 144 : index
    %c0_141 = arith.constant 0 : index
    %126 = vector.load %arg14[%c144, %c0_141] : memref<280x64xbf16, #tpu.memory_space<vmem>>, vector<8x64xbf16>
    %c0_142 = arith.constant 0 : index
    %c832 = arith.constant 832 : index
    %127 = vector.load %arg15[%c0_142, %c832] : memref<8x1600xbf16, #tpu.memory_space<vmem>>, vector<8x64xbf16>
    tpu.vector_store %arg15[%c0_142, %c832], %126 {strides = array<i32>} : memref<8x1600xbf16, #tpu.memory_space<vmem>>, vector<8x64xbf16>,
    %c152 = arith.constant 152 : index
    %c0_143 = arith.constant 0 : index
    %128 = vector.load %arg14[%c152, %c0_143] : memref<280x64xbf16, #tpu.memory_space<vmem>>, vector<8x64xbf16>
    %c0_144 = arith.constant 0 : index
    %c896 = arith.constant 896 : index
    %129 = vector.load %arg15[%c0_144, %c896] : memref<8x1600xbf16, #tpu.memory_space<vmem>>, vector<8x64xbf16>
    tpu.vector_store %arg15[%c0_144, %c896], %128 {strides = array<i32>} : memref<8x1600xbf16, #tpu.memory_space<vmem>>, vector<8x64xbf16>,
    %c176 = arith.constant 176 : index
    %c0_145 = arith.constant 0 : index
    %130 = vector.load %arg14[%c176, %c0_145] : memref<280x64xbf16, #tpu.memory_space<vmem>>, vector<8x64xbf16>
    %c0_146 = arith.constant 0 : index
    %c960 = arith.constant 960 : index
    %131 = vector.load %arg15[%c0_146, %c960] : memref<8x1600xbf16, #tpu.memory_space<vmem>>, vector<8x64xbf16>
    tpu.vector_store %arg15[%c0_146, %c960], %130 {strides = array<i32>} : memref<8x1600xbf16, #tpu.memory_space<vmem>>, vector<8x64xbf16>,
    %c184_147 = arith.constant 184 : index
    %c0_148 = arith.constant 0 : index
    %132 = vector.load %arg14[%c184_147, %c0_148] : memref<280x64xbf16, #tpu.memory_space<vmem>>, vector<8x64xbf16>
    %c0_149 = arith.constant 0 : index
    %c1024 = arith.constant 1024 : index
    %133 = vector.load %arg15[%c0_149, %c1024] : memref<8x1600xbf16, #tpu.memory_space<vmem>>, vector<8x64xbf16>
    tpu.vector_store %arg15[%c0_149, %c1024], %132 {strides = array<i32>} : memref<8x1600xbf16, #tpu.memory_space<vmem>>, vector<8x64xbf16>,
    %c192_150 = arith.constant 192 : index
    %c0_151 = arith.constant 0 : index
    %134 = vector.load %arg14[%c192_150, %c0_151] : memref<280x64xbf16, #tpu.memory_space<vmem>>, vector<8x64xbf16>
    %c0_152 = arith.constant 0 : index
    %c1088 = arith.constant 1088 : index
    %135 = vector.load %arg15[%c0_152, %c1088] : memref<8x1600xbf16, #tpu.memory_space<vmem>>, vector<8x64xbf16>
    tpu.vector_store %arg15[%c0_152, %c1088], %134 {strides = array<i32>} : memref<8x1600xbf16, #tpu.memory_space<vmem>>, vector<8x64xbf16>,
    %c200 = arith.constant 200 : index
    %c0_153 = arith.constant 0 : index
    %136 = vector.load %arg14[%c200, %c0_153] : memref<280x64xbf16, #tpu.memory_space<vmem>>, vector<8x64xbf16>
    %c0_154 = arith.constant 0 : index
    %c1152 = arith.constant 1152 : index
    %137 = vector.load %arg15[%c0_154, %c1152] : memref<8x1600xbf16, #tpu.memory_space<vmem>>, vector<8x64xbf16>
    tpu.vector_store %arg15[%c0_154, %c1152], %136 {strides = array<i32>} : memref<8x1600xbf16, #tpu.memory_space<vmem>>, vector<8x64xbf16>,
    %c208 = arith.constant 208 : index
    %c0_155 = arith.constant 0 : index
    %138 = vector.load %arg14[%c208, %c0_155] : memref<280x64xbf16, #tpu.memory_space<vmem>>, vector<8x64xbf16>
    %c0_156 = arith.constant 0 : index
    %c1216 = arith.constant 1216 : index
    %139 = vector.load %arg15[%c0_156, %c1216] : memref<8x1600xbf16, #tpu.memory_space<vmem>>, vector<8x64xbf16>
    tpu.vector_store %arg15[%c0_156, %c1216], %138 {strides = array<i32>} : memref<8x1600xbf16, #tpu.memory_space<vmem>>, vector<8x64xbf16>,
    %c232 = arith.constant 232 : index
    %c0_157 = arith.constant 0 : index
    %140 = vector.load %arg14[%c232, %c0_157] : memref<280x64xbf16, #tpu.memory_space<vmem>>, vector<8x64xbf16>
    %c0_158 = arith.constant 0 : index
    %c1280 = arith.constant 1280 : index
    %141 = vector.load %arg15[%c0_158, %c1280] : memref<8x1600xbf16, #tpu.memory_space<vmem>>, vector<8x64xbf16>
    tpu.vector_store %arg15[%c0_158, %c1280], %140 {strides = array<i32>} : memref<8x1600xbf16, #tpu.memory_space<vmem>>, vector<8x64xbf16>,
    %c240_159 = arith.constant 240 : index
    %c0_160 = arith.constant 0 : index
    %142 = vector.load %arg14[%c240_159, %c0_160] : memref<280x64xbf16, #tpu.memory_space<vmem>>, vector<8x64xbf16>
    %c0_161 = arith.constant 0 : index
    %c1344 = arith.constant 1344 : index
    %143 = vector.load %arg15[%c0_161, %c1344] : memref<8x1600xbf16, #tpu.memory_space<vmem>>, vector<8x64xbf16>
    tpu.vector_store %arg15[%c0_161, %c1344], %142 {strides = array<i32>} : memref<8x1600xbf16, #tpu.memory_space<vmem>>, vector<8x64xbf16>,
    %c248 = arith.constant 248 : index
    %c0_162 = arith.constant 0 : index
    %144 = vector.load %arg14[%c248, %c0_162] : memref<280x64xbf16, #tpu.memory_space<vmem>>, vector<8x64xbf16>
    %c0_163 = arith.constant 0 : index
    %c1408 = arith.constant 1408 : index
    %145 = vector.load %arg15[%c0_163, %c1408] : memref<8x1600xbf16, #tpu.memory_space<vmem>>, vector<8x64xbf16>
    tpu.vector_store %arg15[%c0_163, %c1408], %144 {strides = array<i32>} : memref<8x1600xbf16, #tpu.memory_space<vmem>>, vector<8x64xbf16>,
    %c256_164 = arith.constant 256 : index
    %c0_165 = arith.constant 0 : index
    %146 = vector.load %arg14[%c256_164, %c0_165] : memref<280x64xbf16, #tpu.memory_space<vmem>>, vector<8x64xbf16>
    %c0_166 = arith.constant 0 : index
    %c1472 = arith.constant 1472 : index
    %147 = vector.load %arg15[%c0_166, %c1472] : memref<8x1600xbf16, #tpu.memory_space<vmem>>, vector<8x64xbf16>
    tpu.vector_store %arg15[%c0_166, %c1472], %146 {strides = array<i32>} : memref<8x1600xbf16, #tpu.memory_space<vmem>>, vector<8x64xbf16>,
    %c264 = arith.constant 264 : index
    %c0_167 = arith.constant 0 : index
    %148 = vector.load %arg14[%c264, %c0_167] : memref<280x64xbf16, #tpu.memory_space<vmem>>, vector<8x64xbf16>
    %c0_168 = arith.constant 0 : index
    %c1536 = arith.constant 1536 : index
    %149 = vector.load %arg15[%c0_168, %c1536] : memref<8x1600xbf16, #tpu.memory_space<vmem>>, vector<8x64xbf16>
    tpu.vector_store %arg15[%c0_168, %c1536], %148 {strides = array<i32>} : memref<8x1600xbf16, #tpu.memory_space<vmem>>, vector<8x64xbf16>,
    %c0_169 = arith.constant 0 : index
    %c0_170 = arith.constant 0 : index
    %150 = vector.load %arg15[%c0_169, %c0_170] : memref<8x1600xbf16, #tpu.memory_space<vmem>>, vector<8x320xbf16>
    %c0_171 = arith.constant 0 : index
    %c0_172 = arith.constant 0 : index
    %151 = vector.load %arg7[%c0_171, %c0_172] : memref<1600x128xbf16, #tpu.memory_space<vmem>>, vector<320x128xbf16>
    %cst_173 = arith.constant dense<0.000000e+00> : vector<8x128xf32>
    %152 = tpu.matmul %150, %151, %cst_173 {dimension_numbers = #tpu.dot_dimension_numbers<[1], [0], [0], [1], [0, 0, 1, 1], [], []>} : vector<8x320xbf16>, vector<320x128xbf16>, vector<8x128xf32> -> vector<8x128xf32>
    %c0_174 = arith.constant 0 : index
    %c320_175 = arith.constant 320 : index
    %153 = vector.load %arg15[%c0_174, %c320_175] : memref<8x1600xbf16, #tpu.memory_space<vmem>>, vector<8x320xbf16>
    %c320_176 = arith.constant 320 : index
    %c0_177 = arith.constant 0 : index
    %154 = vector.load %arg7[%c320_176, %c0_177] : memref<1600x128xbf16, #tpu.memory_space<vmem>>, vector<320x128xbf16>
    %cst_178 = arith.constant dense<0.000000e+00> : vector<8x128xf32>
    %155 = tpu.matmul %153, %154, %cst_178 {dimension_numbers = #tpu.dot_dimension_numbers<[1], [0], [0], [1], [0, 0, 1, 1], [], []>} : vector<8x320xbf16>, vector<320x128xbf16>, vector<8x128xf32> -> vector<8x128xf32>
    %156 = arith.addf %152, %155 : vector<8x128xf32>
    %c0_179 = arith.constant 0 : index
    %c640_180 = arith.constant 640 : index
    %157 = vector.load %arg15[%c0_179, %c640_180] : memref<8x1600xbf16, #tpu.memory_space<vmem>>, vector<8x320xbf16>
    %c640_181 = arith.constant 640 : index
    %c0_182 = arith.constant 0 : index
    %158 = vector.load %arg7[%c640_181, %c0_182] : memref<1600x128xbf16, #tpu.memory_space<vmem>>, vector<320x128xbf16>
    %cst_183 = arith.constant dense<0.000000e+00> : vector<8x128xf32>
    %159 = tpu.matmul %157, %158, %cst_183 {dimension_numbers = #tpu.dot_dimension_numbers<[1], [0], [0], [1], [0, 0, 1, 1], [], []>} : vector<8x320xbf16>, vector<320x128xbf16>, vector<8x128xf32> -> vector<8x128xf32>
    %160 = arith.addf %156, %159 : vector<8x128xf32>
    %c0_184 = arith.constant 0 : index
    %c960_185 = arith.constant 960 : index
    %161 = vector.load %arg15[%c0_184, %c960_185] : memref<8x1600xbf16, #tpu.memory_space<vmem>>, vector<8x320xbf16>
    %c960_186 = arith.constant 960 : index
    %c0_187 = arith.constant 0 : index
    %162 = vector.load %arg7[%c960_186, %c0_187] : memref<1600x128xbf16, #tpu.memory_space<vmem>>, vector<320x128xbf16>
    %cst_188 = arith.constant dense<0.000000e+00> : vector<8x128xf32>
    %163 = tpu.matmul %161, %162, %cst_188 {dimension_numbers = #tpu.dot_dimension_numbers<[1], [0], [0], [1], [0, 0, 1, 1], [], []>} : vector<8x320xbf16>, vector<320x128xbf16>, vector<8x128xf32> -> vector<8x128xf32>
    %164 = arith.addf %160, %163 : vector<8x128xf32>
    %c0_189 = arith.constant 0 : index
    %c1280_190 = arith.constant 1280 : index
    %165 = vector.load %arg15[%c0_189, %c1280_190] : memref<8x1600xbf16, #tpu.memory_space<vmem>>, vector<8x320xbf16>
    %c1280_191 = arith.constant 1280 : index
    %c0_192 = arith.constant 0 : index
    %166 = vector.load %arg7[%c1280_191, %c0_192] : memref<1600x128xbf16, #tpu.memory_space<vmem>>, vector<320x128xbf16>
    %cst_193 = arith.constant dense<0.000000e+00> : vector<8x128xf32>
    %167 = tpu.matmul %165, %166, %cst_193 {dimension_numbers = #tpu.dot_dimension_numbers<[1], [0], [0], [1], [0, 0, 1, 1], [], []>} : vector<8x320xbf16>, vector<320x128xbf16>, vector<8x128xf32> -> vector<8x128xf32>
    %168 = arith.addf %164, %167 : vector<8x128xf32>
    %c0_194 = arith.constant 0 : index
    %c0_195 = arith.constant 0 : index
    %169 = vector.load %arg8[%c0_194, %c0_195] : memref<1x128xf32, #tpu.memory_space<vmem>>, vector<1x128xf32>
    %170 = vector.broadcast %169 : vector<1x128xf32> to vector<8x128xf32>
    %171 = arith.addf %168, %170 : vector<8x128xf32>
    %cst_196 = arith.constant 0.000000e+00 : f32
    %172 = vector.broadcast %cst_196 : f32 to vector<8x128xf32>
    %173 = arith.maximumf %171, %172 : vector<8x128xf32>
    %174 = arith.truncf %173 : vector<8x128xf32> to vector<8x128xbf16>
    %c0_197 = arith.constant 0 : index
    %c0_198 = arith.constant 0 : index
    %175 = vector.load %arg9[%c0_197, %c0_198] : memref<128x128xbf16, #tpu.memory_space<vmem>>, vector<128x128xbf16>
    %cst_199 = arith.constant dense<0.000000e+00> : vector<8x128xf32>
    %176 = tpu.matmul %174, %175, %cst_199 {dimension_numbers = #tpu.dot_dimension_numbers<[1], [0], [0], [1], [0, 0, 1, 1], [], []>} : vector<8x128xbf16>, vector<128x128xbf16>, vector<8x128xf32> -> vector<8x128xf32>
    %c0_200 = arith.constant 0 : index
    %c0_201 = arith.constant 0 : index
    %177 = vector.load %arg2[%c0_200, %c0_201] : memref<8x1xi32, #tpu.memory_space<vmem>>, vector<8x1xi32>
    %c0_i32 = arith.constant 0 : i32
    %178 = vector.broadcast %c0_i32 : i32 to vector<8x1xi32>
    %179 = arith.cmpi eq, %177, %178 : vector<8x1xi32>
    %c0_202 = arith.constant 0 : index
    %c0_203 = arith.constant 0 : index
    %180 = vector.load %arg10[%c0_202, %c0_203] : memref<4x128xf32, #tpu.memory_space<vmem>>, vector<1x128xf32>
    %cst_204 = arith.constant 0.000000e+00 : f32
    %181 = vector.shape_cast %179 : vector<8x1xi1> to vector<8x1xi1>
    %182 = vector.broadcast %181 : vector<8x1xi1> to vector<8x128xi1>
    %183 = vector.shape_cast %180 : vector<1x128xf32> to vector<1x128xf32>
    %184 = vector.broadcast %183 : vector<1x128xf32> to vector<8x128xf32>
    %185 = vector.broadcast %cst_204 : f32 to vector<8x128xf32>
    %186 = arith.select %182, %184, %185 : vector<8x128xi1>, vector<8x128xf32>
    %c1_i32 = arith.constant 1 : i32
    %187 = vector.broadcast %c1_i32 : i32 to vector<8x1xi32>
    %188 = arith.cmpi eq, %177, %187 : vector<8x1xi32>
    %c1 = arith.constant 1 : index
    %c0_205 = arith.constant 0 : index
    %189 = vector.load %arg10[%c1, %c0_205] : memref<4x128xf32, #tpu.memory_space<vmem>>, vector<1x128xf32>
    %cst_206 = arith.constant 0.000000e+00 : f32
    %190 = vector.shape_cast %188 : vector<8x1xi1> to vector<8x1xi1>
    %191 = vector.broadcast %190 : vector<8x1xi1> to vector<8x128xi1>
    %192 = vector.shape_cast %189 : vector<1x128xf32> to vector<1x128xf32>
    %193 = vector.broadcast %192 : vector<1x128xf32> to vector<8x128xf32>
    %194 = vector.broadcast %cst_206 : f32 to vector<8x128xf32>
    %195 = arith.select %191, %193, %194 : vector<8x128xi1>, vector<8x128xf32>
    %196 = arith.addf %186, %195 : vector<8x128xf32>
    %c2_i32 = arith.constant 2 : i32
    %197 = vector.broadcast %c2_i32 : i32 to vector<8x1xi32>
    %198 = arith.cmpi eq, %177, %197 : vector<8x1xi32>
    %c2 = arith.constant 2 : index
    %c0_207 = arith.constant 0 : index
    %199 = vector.load %arg10[%c2, %c0_207] : memref<4x128xf32, #tpu.memory_space<vmem>>, vector<1x128xf32>
    %cst_208 = arith.constant 0.000000e+00 : f32
    %200 = vector.shape_cast %198 : vector<8x1xi1> to vector<8x1xi1>
    %201 = vector.broadcast %200 : vector<8x1xi1> to vector<8x128xi1>
    %202 = vector.shape_cast %199 : vector<1x128xf32> to vector<1x128xf32>
    %203 = vector.broadcast %202 : vector<1x128xf32> to vector<8x128xf32>
    %204 = vector.broadcast %cst_208 : f32 to vector<8x128xf32>
    %205 = arith.select %201, %203, %204 : vector<8x128xi1>, vector<8x128xf32>
    %206 = arith.addf %196, %205 : vector<8x128xf32>
    %c3_i32 = arith.constant 3 : i32
    %207 = vector.broadcast %c3_i32 : i32 to vector<8x1xi32>
    %208 = arith.cmpi eq, %177, %207 : vector<8x1xi32>
    %c3 = arith.constant 3 : index
    %c0_209 = arith.constant 0 : index
    %209 = vector.load %arg10[%c3, %c0_209] : memref<4x128xf32, #tpu.memory_space<vmem>>, vector<1x128xf32>
    %cst_210 = arith.constant 0.000000e+00 : f32
    %210 = vector.shape_cast %208 : vector<8x1xi1> to vector<8x1xi1>
    %211 = vector.broadcast %210 : vector<8x1xi1> to vector<8x128xi1>
    %212 = vector.shape_cast %209 : vector<1x128xf32> to vector<1x128xf32>
    %213 = vector.broadcast %212 : vector<1x128xf32> to vector<8x128xf32>
    %214 = vector.broadcast %cst_210 : f32 to vector<8x128xf32>
    %215 = arith.select %211, %213, %214 : vector<8x128xi1>, vector<8x128xf32>
    %216 = arith.addf %206, %215 : vector<8x128xf32>
    %217 = arith.addf %176, %216 : vector<8x128xf32>
    %c0_211 = arith.constant 0 : index
    %c0_212 = arith.constant 0 : index
    %218 = vector.load %arg11[%c0_211, %c0_212] : memref<8x128xf32, #tpu.memory_space<vmem>>, vector<8x128xf32>
    tpu.vector_store %arg11[%c0_211, %c0_212], %217 {strides = array<i32>} : memref<8x128xf32, #tpu.memory_space<vmem>>, vector<8x128xf32>,
    return
  }
  func.func @transform_0(%arg0: i32) -> (i32, i32, i32) {
    %c0_i32 = arith.constant 0 : i32
    %c0_i32_0 = arith.constant 0 : i32
    %c0_i32_1 = arith.constant 0 : i32
    return %arg0, %c0_i32, %c0_i32_0 : i32, i32, i32
  }
  func.func @transform_1(%arg0: i32) -> (i32, i32) {
    %c0_i32 = arith.constant 0 : i32
    %c0_i32_0 = arith.constant 0 : i32
    return %arg0, %c0_i32 : i32, i32
  }
  func.func @transform_2(%arg0: i32) -> (i32, i32) {
    %c0_i32 = arith.constant 0 : i32
    %c0_i32_0 = arith.constant 0 : i32
    %c0_i32_1 = arith.constant 0 : i32
    return %c0_i32, %c0_i32_0 : i32, i32
  }
  func.func @transform_3(%arg0: i32) -> (i32, i32) {
    %c0_i32 = arith.constant 0 : i32
    %c0_i32_0 = arith.constant 0 : i32
    %c0_i32_1 = arith.constant 0 : i32
    return %c0_i32, %c0_i32_0 : i32, i32
  }
  func.func @transform_4(%arg0: i32) -> (i32, i32) {
    %c0_i32 = arith.constant 0 : i32
    %c0_i32_0 = arith.constant 0 : i32
    %c0_i32_1 = arith.constant 0 : i32
    return %c0_i32, %c0_i32_0 : i32, i32
  }
  func.func @transform_5(%arg0: i32) -> (i32, i32) {
    %c0_i32 = arith.constant 0 : i32
    %c0_i32_0 = arith.constant 0 : i32
    %c0_i32_1 = arith.constant 0 : i32
    return %c0_i32, %c0_i32_0 : i32, i32
  }
  func.func @transform_6(%arg0: i32) -> (i32, i32) {
    %c0_i32 = arith.constant 0 : i32
    %c0_i32_0 = arith.constant 0 : i32
    %c0_i32_1 = arith.constant 0 : i32
    return %c0_i32, %c0_i32_0 : i32, i32
  }
  func.func @transform_7(%arg0: i32) -> (i32, i32) {
    %c0_i32 = arith.constant 0 : i32
    %c0_i32_0 = arith.constant 0 : i32
    %c0_i32_1 = arith.constant 0 : i32
    return %c0_i32, %c0_i32_0 : i32, i32
  }
  func.func @transform_8(%arg0: i32) -> (i32, i32) {
    %c0_i32 = arith.constant 0 : i32
    %c0_i32_0 = arith.constant 0 : i32
    %c0_i32_1 = arith.constant 0 : i32
    return %c0_i32, %c0_i32_0 : i32, i32
  }
  func.func @transform_9(%arg0: i32) -> (i32, i32) {
    %c0_i32 = arith.constant 0 : i32
    %c0_i32_0 = arith.constant 0 : i32
    %c0_i32_1 = arith.constant 0 : i32
    return %c0_i32, %c0_i32_0 : i32, i32
  }
  func.func @transform_10(%arg0: i32) -> (i32, i32) {
    %c0_i32 = arith.constant 0 : i32
    %c0_i32_0 = arith.constant 0 : i32
    return %arg0, %c0_i32 : i32, i32
  }
}

</mosaic_0001>

<bundles_post_ra>
// kernel: agent_complex_forward.1
= control target key start
LH: loop header
LB: loop body
LE: loop exit
PB: predicated region body
PF: predicated region fallthrough
CT: control target
= control target key end

     0   :  { %vm361_vm0 = vcmask 519168   ;;  %v8377_v0 = vmov 0.0   ;;  %vm8378_vm1 = vmmov 0   ;;  %v8379_v2 = vmov 0   ;;  %s8380_s21 = smov 64   ;;  %s10199_s2 = inlined_call_operand.vmem [shape: bf16[32,64], index: 2, kind: input, shape index: {}]   ;;  %s10200_s0 = inlined_call_operand.vmem [shape: bf16[1,200,32], index: 0, kind: input, shape index: {}]   ;;  %s10201_s4 = inlined_call_operand.vmem [shape: bf16[576,64], index: 4, kind: input, shape index: {}]   ;;  %s10202_s3 = inlined_call_operand.vmem [shape: f32[1,64], index: 3, kind: input, shape index: {}]   ;;  %s10203_s5 = inlined_call_operand.vmem [shape: f32[1,64], index: 5, kind: input, shape index: {}]   ;;  %s10204_s6 = inlined_call_operand.vmem [shape: bf16[1600,128], index: 6, kind: input, shape index: {}]   ;;  %s10205_s8 = inlined_call_operand.vmem [shape: bf16[128,128], index: 8, kind: input, shape index: {}]   ;;  %s10206_s1 = inlined_call_operand.vmem [shape: s32[8,1], index: 1, kind: input, shape index: {}]   ;;  %s10207_s7 = inlined_call_operand.vmem [shape: f32[1,128], index: 7, kind: input, shape index: {}]   ;;  %s10208_s9 = inlined_call_operand.vmem [shape: f32[4,128], index: 9, kind: input, shape index: {}]   ;;  %s10209_s10 = inlined_call_operand.vmem [shape: f32[8,128], index: 10, kind: output, shape index: {}]  }
   0x1   :  { %7718 = vmatprep.subr.bf16.mxu0 %v8377_v0  ;;  %v7940_v1 = vld [vmem:[%s10199_s2] sm:$0xff]   ;;  %7722 = vmatprep.mubr.msk.bf16.mxu0 %vm8378_vm1, %v8377_v0  ;;  %369 = vst.msk [vmem:[#allocation2 + $0x1c] sm:$0xf] %vm361_vm0, %v8379_v2  ;;  %362 = vst.msk [vmem:[#allocation2] sm:$0xf] %vm361_vm0, %v8379_v2  ;;  %v7941_v3 = vld [vmem:[%s10199_s2 + $0x8] sm:$0xff]  }
   0x2   :  { %363 = vst.msk [vmem:[#allocation2 + $0x4] sm:$0xf] %vm361_vm0, %v8379_v2  ;;  %364 = vst.msk [vmem:[#allocation2 + $0x8] sm:$0xf] %vm361_vm0, %v8379_v2  ;;  %7939 = vset.pattern.permute.xlu1 %v8379_v2  ;;  %7938 = vset.pattern.permute.xlu0 %v8379_v2  ;;  %v7942_v4 = vld [vmem:[%s10200_s0] sm:$0xff]   ;;  %vm147_vm2 = vcmask 261120  }
   0x3   :  { %365 = vst.msk [vmem:[#allocation2 + $0xc] sm:$0xf] %vm361_vm0, %v8379_v2  ;;  %366 = vst.msk [vmem:[#allocation2 + $0x10] sm:$0xf] %vm361_vm0, %v8379_v2  ;;  %7719 = vmatpush3.bf16.msra.mxu0 %v7940_v1  ;;  %v7943_v5 = vld [vmem:[%s10200_s0 + $0x8] sm:$0xff]   ;;  %v7944_v10 = vld [vmem:[%s10200_s0 + $0x10] sm:$0xff]  }
   0x4   :  { %367 = vst.msk [vmem:[#allocation2 + $0x14] sm:$0xf] %vm361_vm0, %v8379_v2  ;;  %368 = vst.msk [vmem:[#allocation2 + $0x18] sm:$0xf] %vm361_vm0, %v8379_v2  ;;  %7720 = vmatprep.subr.bf16.mxu0 %v8377_v0  ;;  %v7945_v11 = vld [vmem:[%s10200_s0 + $0x18] sm:$0xff]   ;;  %v7946_v12 = vld [vmem:[%s10200_s0 + $0x20] sm:$0xff]  }
   0x5   :  { %370 = vst.msk [vmem:[#allocation2 + $0x20] sm:$0xf] %vm361_vm0, %v8379_v2  ;;  %371 = vst.msk [vmem:[#allocation2 + $0x38] sm:$0xf] %vm361_vm0, %v8379_v2  ;;  %v7947_v13 = vld [vmem:[%s10200_s0 + $0x28] sm:$0xff]   ;;  %v7948_v14 = vld [vmem:[%s10200_s0 + $0x30] sm:$0xff]  }
   0x6   :  { %372 = vst.msk [vmem:[#allocation2 + $0x3c] sm:$0xf] %vm361_vm0, %v8379_v2  ;;  %373 = vst.msk [vmem:[#allocation2 + $0x54] sm:$0xf] %vm361_vm0, %v8379_v2  ;;  %v7949_v15 = vld [vmem:[%s10200_s0 + $0x38] sm:$0xff]   ;;  %v7950_v16 = vld [vmem:[%s10200_s0 + $0x40] sm:$0xff]  }
   0x7   :  { %374 = vst.msk [vmem:[#allocation2 + $0x58] sm:$0xf] %vm361_vm0, %v8379_v2  ;;  %375 = vst.msk [vmem:[#allocation2 + $0x70] sm:$0xf] %vm361_vm0, %v8379_v2  ;;  %7721 = vmatpush3.bf16.msra.mxu0 %v7941_v3  ;;  %v7951_v17 = vld [vmem:[%s10200_s0 + $0x48] sm:$0xff]   ;;  %v7952_v18 = vld [vmem:[%s10200_s0 + $0x50] sm:$0xff]  }
   0x8   :  { %376 = vst.msk [vmem:[#allocation2 + $0x74] sm:$0xf] %vm361_vm0, %v8379_v2  ;;  %377 = vst.msk [vmem:[#allocation2 + $0x8c] sm:$0xf] %vm361_vm0, %v8379_v2  ;;  %v852_v6 = vld [vmem:[#allocation2 + $0x1c] sm:$0xf] }
   0x9   :  { %378 = vst.msk [vmem:[#allocation2 + $0x90] sm:$0xf] %vm361_vm0, %v8379_v2  ;;  %379 = vst.msk [vmem:[#allocation2 + $0xa8] sm:$0xf] %vm361_vm0, %v8379_v2  ;;  %922 = vrot.lane.b32.xlu1 %v852_v6, %s8380_s21  ;;  %v571_v7 = vld [vmem:[#allocation2 + $0x4] sm:$0xf] }
   0xa   :  { %380 = vst.msk [vmem:[#allocation2 + $0xac] sm:$0xf] %vm361_vm0, %v8379_v2  ;;  %381 = vst.msk [vmem:[#allocation2 + $0xb0] sm:$0xf] %vm361_vm0, %v8379_v2  ;;  %7723 = vmatmul.mubr.msk.bf16.vlgmr.msra.gmra.mrb[0].mxu0 %vm147_vm2, %v7942_v4  ;;  %641 = vrot.lane.b32.xlu0 %v571_v7, %s8380_s21  ;;  %v572_v9 = vld [vmem:[#allocation2 + $0x8] sm:$0xf] }
   0xb   :  { %382 = vst.msk [vmem:[#allocation2 + $0xb4] sm:$0xf] %vm361_vm0, %v8379_v2  ;;  %383 = vst.msk [vmem:[#allocation2 + $0xb8] sm:$0xf] %vm361_vm0, %v8379_v2  ;;  %7726 = vmatprep.mubr.msk.bf16.mxu0 %vm8378_vm1, %v8377_v0  ;;  %v7953_v19 = vld [vmem:[%s10200_s0 + $0x58] sm:$0xff]   ;;  %v7955_v26 = vld [vmem:[%s10201_s4 + $0x40] sm:$0xff]  }
   0xc   :  { %384 = vst.msk [vmem:[#allocation2 + $0xbc] sm:$0xf] %vm361_vm0, %v8379_v2  ;;  %385 = vst.msk [vmem:[#allocation2 + $0xc0] sm:$0xf] %vm361_vm0, %v8379_v2  ;;  %v853_v8 = vld [vmem:[#allocation2 + $0x20] sm:$0xf]  ;;  %7134 = vmatprep.subr.bf16.mxu1 %v7955_v26 }
   0xd   :  { %386 = vst.msk [vmem:[#allocation2 + $0xc4] sm:$0xf] %vm361_vm0, %v8379_v2  ;;  %387 = vst.msk [vmem:[#allocation2 + $0xc8] sm:$0xf] %vm361_vm0, %v8379_v2  ;;  %924 = vrot.lane.b32.xlu1 %v853_v8, %s8380_s21  ;;  %v573_v20 = vld [vmem:[#allocation2 + $0xc] sm:$0xf] }
   0xe   :  { %643 = vrot.lane.b32.xlu0 %v572_v9, %s8380_s21  ;;  %v574_v21 = vld [vmem:[#allocation2 + $0x10] sm:$0xf]  ;;  %v7954_v22 = vld [vmem:[%s10200_s0 + $0x60] ss:$0 sps:$4 sm:$0xff]   ;;  %v575_v23 = vld [vmem:[#allocation2 + $0x14] sm:$0xf] }
   0xf   :  { %v576_v24 = vld [vmem:[#allocation2 + $0x18] sm:$0xf]  ;;  %v1627_v25 = vld [vmem:[#allocation2 + $0x54] sm:$0xf]  ;;  %v7956_v27 = vld [vmem:[%s10201_s4] sm:$0xff]   ;;  %vm746_vm3 = vcmask 1043968  }
  0x10   :  { %1662 = vst.msk [vmem:[#allocation3 + $0x74] sm:$0xf] %vm361_vm0, %v1627_v25  ;;  %7135 = vmatpush3.bf16.msra.mxu1 %v7956_v27  ;;  %v7957_v28 = vld [vmem:[%s10201_s4 + $0x48] sm:$0xff]   ;;  %v7959_v30 = vld [vmem:[%s10201_s4 + $0x50] sm:$0xff]   ;;  %v7961_v32 = vld [vmem:[%s10201_s4 + $0x58] sm:$0xff]   ;;  %vm2100_vm4 = vcmask 523264  }
  0x11   :  { %647 = vrot.lane.b32.xlu1 %v574_v21, %s8380_s21  ;;  %v7958_v29 = vld [vmem:[%s10201_s4 + $0x8] sm:$0xff]   ;;  %7136 = vmatprep.subr.bf16.mxu1 %v7957_v28  ;;  %v7960_v31 = vld [vmem:[%s10201_s4 + $0x10] sm:$0xff]   ;;  %v7962_v33 = vld [vmem:[%s10201_s4 + $0x18] sm:$0xff]  }
  0x12   :  { %7727 = vmatmul.mubr.msk.bf16.gmra.mrb[4].mxu0 %vm147_vm2, %v7943_v5  ;;  %645 = vrot.lane.b32.xlu0 %v573_v20, %s8380_s21  ;;  %v7963_v34 = vld [vmem:[%s10201_s4 + $0x40] sm:$0xff]   ;;  %v782_v36 = vld [vmem:[#allocation2 + $0x8] sm:$0xf]  ;;  %v783_v43 = vld [vmem:[#allocation2 + $0xc] sm:$0xf] }
  0x13   :  { %7730 = vmatprep.mubr.msk.bf16.mxu0 %vm8378_vm1, %v8377_v0  ;;  %v501_v38 = vld [vmem:[#allocation2] sm:$0xf]  ;;  %817 = vst.msk [vmem:[#allocation3 + $0x4] sm:$0xf] %vm361_vm0, %v782_v36  ;;  %7222 = vmatprep.subr.bf16.mxu0 %v7963_v34  ;;  %v502_v45 = vld [vmem:[#allocation2 + $0x4] sm:$0xf] }
  0x14   :  { %7137 = vmatpush3.bf16.msra.mxu1 %v7958_v29  ;;  %536 = vst.msk [vmem:[#allocation3] sm:$0xf] %vm361_vm0, %v501_v38  ;;  %v7964_v39 = vld [vmem:[%s10201_s4 + $0x60] sm:$0xff]   ;;  %v7967_v46 = vld [vmem:[%s10201_s4 + $0x68] sm:$0xff]   ;;  %818 = vst.msk [vmem:[#allocation3 + $0x18] sm:$0xf] %vm361_vm0, %v783_v43 }
  0x15   :  { %651 = vrot.lane.b32.xlu1 %v576_v24, %s8380_s21  ;;  %7138 = vmatprep.subr.bf16.mxu1 %v7959_v30  ;;  %v7965_v40 = vld [vmem:[%s10201_s4] sm:$0xff]   ;;  %537 = vst.msk [vmem:[#allocation3 + $0x14] sm:$0xf] %vm361_vm0, %v502_v45  ;;  %v7968_v47 = vld [vmem:[%s10201_s4 + $0x28] sm:$0xff]   ;;  %v7969_v48 = vld [vmem:[%s10201_s4 + $0x70] sm:$0xff]  }
  0x16   :  { %649 = vrot.lane.b32.xlu0 %v575_v23, %s8380_s21  ;;  %v7966_v41 = vld [vmem:[%s10201_s4 + $0x20] sm:$0xff]   ;;  %7223 = vmatpush3.bf16.msra.mxu0 %v7965_v40  ;;  %v7970_v49 = vld [vmem:[%s10201_s4 + $0x30] sm:$0xff]   ;;  %v7971_v50 = vld [vmem:[%s10201_s4 + $0x78] sm:$0xff]  }
  0x17   :  { %v7972_v51 = vld [vmem:[%s10201_s4 + $0x48] sm:$0xff]   ;;  %v7973_v52 = vld [vmem:[%s10201_s4 + $0x38] sm:$0xff]   ;;  %v505_v60 = vld [vmem:[#allocation2 + $0x10] sm:$0xf] }
  0x18   :  { %7139 = vmatpush3.bf16.msra.mxu1 %v7960_v31  ;;  %7224 = vmatprep.subr.bf16.mxu0 %v7972_v51  ;;  %v7974_v53 = vld [vmem:[%s10201_s4 + $0x8] sm:$0xff]   ;;  %v8659_v61 = vld [vmem:[%s10202_s3] ss:$0 sm:$0xff]  ;;  %540 = vst.msk [vmem:[#allocation3 + $0x50] sm:$0xf] %vm361_vm0, %v505_v60  ;;  %v7989_v45 = vld [vmem:[%s10201_s4 + $0x58] sm:$0xff]  }
  0x19   :  { %7140 = vmatprep.subr.bf16.mxu1 %v7961_v32  ;;  %v503_v54 = vld [vmem:[#allocation2 + $0x8] sm:$0xf]  ;;  %v504_v58 = vld [vmem:[#allocation2 + $0xc] sm:$0xf]  ;;  %v506_v63 = vld [vmem:[#allocation2 + $0x14] sm:$0xf] }
  0x1a   :  { %7731 = vmatmul.mubr.msk.bf16.gmra.mrb[8].mxu0 %vm147_vm2, %v7944_v10  ;;  %538 = vst.msk [vmem:[#allocation3 + $0x28] sm:$0xf] %vm361_vm0, %v503_v54  ;;  %539 = vst.msk [vmem:[#allocation3 + $0x3c] sm:$0xf] %vm361_vm0, %v504_v58  ;;  %v784_v3 = vld [vmem:[#allocation2 + $0x10] sm:$0xf] }
  0x1b   :  { %7734 = vmatprep.mubr.msk.bf16.mxu0 %vm8378_vm1, %v8377_v0  ;;  %7225 = vmatpush3.bf16.msra.mxu0 %v7974_v53  ;;  %541 = vst.msk [vmem:[#allocation3 + $0x64] sm:$0xf] %vm361_vm0, %v506_v63  ;;  %819 = vst.msk [vmem:[#allocation3 + $0x2c] sm:$0xf] %vm361_vm0, %v784_v3  ;;  %v785_v8 = vld [vmem:[#allocation2 + $0x14] sm:$0xf] }
  0x1c   :  { %7141 = vmatpush3.bf16.msra.mxu1 %v7962_v33  ;;  %820 = vst.msk [vmem:[#allocation3 + $0x40] sm:$0xf] %vm361_vm0, %v785_v8  ;;  %v7981_v20 = vld [vmem:[%s10201_s4 + $0x80] sm:$0xff]   ;;  %v786_v21 = vld [vmem:[#allocation2 + $0x18] sm:$0xf]  ;;  %v7982_v25 = vld [vmem:[%s10201_s4 + $0xc8] sm:$0xff]  }
  0x1d   :  { %7142 = vmatprep.subr.bf16.mxu1 %v7964_v39  ;;  %821 = vst.msk [vmem:[#allocation3 + $0x54] sm:$0xf] %vm361_vm0, %v786_v21  ;;  %v787_v26 = vld [vmem:[#allocation2 + $0x1c] sm:$0xf]  ;;  %v7983_v30 = vld [vmem:[%s10201_s4 + $0x88] sm:$0xff]   ;;  %v7997_v8 = vld [vmem:[%s10201_s4 + $0xa0] sm:$0xff]  }
  0x1e   :  { %822 = vst.msk [vmem:[#allocation3 + $0x68] sm:$0xf] %vm361_vm0, %v787_v26  ;;  %v1062_v31 = vld [vmem:[#allocation2 + $0x20] sm:$0xf] }
  0x1f   :  { %1097 = vst.msk [vmem:[#allocation3 + $0x8] sm:$0xf] %vm361_vm0, %v1062_v31  ;;  %v8001_v31 = vld [vmem:[%s10201_s4 + $0x60] sm:$0xff]  }
  0x20   :  { %7143 = vmatpush3.bf16.msra.mxu1 %v7966_v41  ;;  %v577_v41 = vld [vmem:[#allocation2 + $0x1c] sm:$0xf] }
  0x21   :  { %7144 = vmatprep.subr.bf16.mxu1 %v7967_v46  ;;  %v1342_v46 = vld [vmem:[#allocation2 + $0x38] sm:$0xf] }
  0x22   :  { %7735 = vmatmul.mubr.msk.bf16.gmra.mrb[12].mxu0 %vm147_vm2, %v7945_v11  ;;  %1377 = vst.msk [vmem:[#allocation3 + $0xc] sm:$0xf] %vm361_vm0, %v1342_v46 }
  0x23   :  { %7738 = vmatprep.mubr.msk.bf16.mxu0 %vm8378_vm1, %v8377_v0 }
  0x24   :  { %7145 = vmatpush3.bf16.msra.mxu1 %v7968_v47 }
  0x25   :  { %7146 = vmatprep.subr.bf16.mxu1 %v7969_v48  ;;  %v7990_v48 = vld [vmem:[%s10201_s4 + $0x18] sm:$0xff]  }
  0x28   :  { %7147 = vmatpush3.bf16.msra.mxu1 %v7970_v49  ;;  %v7991_v49 = vld [vmem:[%s10201_s4 + $0xd8] sm:$0xff]  }
  0x29   :  { %7148 = vmatprep.subr.bf16.mxu1 %v7971_v50  ;;  %v788_v50 = vld [vmem:[#allocation2 + $0x20] sm:$0xf] }
  0x2a   :  { %7739 = vmatmul.mubr.msk.bf16.gmra.mrb[16].mxu0 %vm147_vm2, %v7946_v12  ;;  %v7978_v12 = vld [vmem:[%s10201_s4 + $0x50] sm:$0xff]   ;;  %823 = vst.msk [vmem:[#allocation3 + $0x7c] sm:$0xf] %vm361_vm0, %v788_v50 }
  0x2b   :  { %7742 = vmatprep.mubr.msk.bf16.mxu0 %vm8378_vm1, %v8377_v0  ;;  %7226 = vmatprep.subr.bf16.mxu0 %v7978_v12  ;;  %v1068_v12 = vld [vmem:[#allocation2 + $0x38] sm:$0xf] }
  0x2c   :  { %7149 = vmatpush3.bf16.msra.mxu1 %v7973_v52  ;;  %1103 = vst.msk [vmem:[#allocation3 + $0x80] sm:$0xf] %vm361_vm0, %v1068_v12  ;;  %v8013_v12 = vld [vmem:[%s10201_s4 + $0x28] sm:$0xff]  }
  0x32   :  { %7743 = vmatmul.mubr.msk.bf16.gmra.mrb[20].mxu0 %vm147_vm2, %v7947_v13  ;;  %v7979_v13 = vld [vmem:[%s10201_s4 + $0x10] sm:$0xff]  }
  0x33   :  { %7746 = vmatprep.mubr.msk.bf16.mxu0 %vm8378_vm1, %v8377_v0  ;;  %7227 = vmatpush3.bf16.msra.mxu0 %v7979_v13 }
  0x34   :  { %7228 = vmatprep.subr.bf16.mxu0 %v7989_v45 }
  0x37   :  { %7229 = vmatpush3.bf16.msra.mxu0 %v7990_v48  ;;  %v8007_v48 = vld [vmem:[%s10201_s4 + $0xb8] sm:$0xff]  }
  0x38   :  { %7230 = vmatprep.subr.bf16.mxu0 %v8001_v31 }
  0x3a   :  { %7747 = vmatmul.mubr.msk.bf16.gmra.mrb[24].mxu0 %vm147_vm2, %v7948_v14 }
  0x3b   :  { %7750 = vmatprep.mubr.msk.bf16.mxu0 %vm8378_vm1, %v8377_v0 }
  0x42   :  { %7751 = vmatmul.mubr.msk.bf16.gmra.mrb[28].mxu0 %vm147_vm2, %v7949_v15 }
  0x43   :  { %7754 = vmatprep.mubr.msk.bf16.mxu0 %vm8378_vm1, %v8377_v0 }
  0x4a   :  { %7755 = vmatmul.mubr.msk.bf16.gmra.mrb[32].mxu0 %vm147_vm2, %v7950_v16  ;;  %v507_v16 = vld [vmem:[#allocation2 + $0x18] sm:$0xf] }
  0x4b   :  { %7758 = vmatprep.mubr.msk.bf16.mxu0 %vm8378_vm1, %v8377_v0  ;;  %542 = vst.msk [vmem:[#allocation3 + $0x78] sm:$0xf] %vm361_vm0, %v507_v16  ;;  %v7998_v16 = vld [vmem:[%s10201_s4 + $0xe8] sm:$0xff]  }
  0x52   :  { %7759 = vmatmul.mubr.msk.bf16.gmra.mrb[36].mxu0 %vm147_vm2, %v7951_v17  ;;  %v7980_v17 = vld [vmem:[%s10201_s4 + $0xc0] sm:$0xff]  }
  0x53   :  { %7762 = vmatprep.mubr.msk.bf16.mxu0 %vm8378_vm1, %v8377_v0  ;;  %7174 = vmatprep.subr.bf16.mxu1 %v7980_v17  ;;  %v1343_v17 = vld [vmem:[#allocation2 + $0x3c] sm:$0xf] }
  0x54   :  { %1378 = vst.msk [vmem:[#allocation3 + $0x20] sm:$0xf] %vm361_vm0, %v1343_v17 }
  0x5a   :  { %7763 = vmatmul.mubr.msk.bf16.gmra.mrb[40].mxu0 %vm147_vm2, %v7952_v18 }
  0x5b   :  { %7766 = vmatprep.mubr.msk.bf16.mxu0 %vm8378_vm1, %v8377_v0 }
  0x62   :  { %7767 = vmatmul.mubr.msk.bf16.gmra.mrb[44].mxu0 %vm147_vm2, %v7953_v19 }
  0x63   :  { %7770 = vmatprep.mubr.msk.bf16.mxu0 %vm8378_vm1, %v8377_v0 }
  0x6a   :  { %7771 = vmatmul.mubr.msk.bf16.gmra.mrb[48].mxu0 %vm147_vm2, %v7954_v22 }
  0x7b   :  { %v923_v35 = vpop.permute.xlu1 %922 }
  0x7c   :  { %v642_v37 = vpop.permute.xlu0 %641  ;;  %1027 = vst.msk [vmem:[#allocation3 + $0x4] sm:$0xf] %vm746_vm3, %v923_v35 }
  0x7d   :  { %747 = vst.msk [vmem:[#allocation3] sm:$0xf] %vm746_vm3, %v642_v37  ;;  %v7987_v37 = vld [vmem:[%s10201_s4 + $0xd0] sm:$0xff]  }
  0x7f   :  { %v925_v42 = vpop.permute.xlu1 %924 }
  0x80   :  { %v644_v44 = vpop.permute.xlu0 %643  ;;  %1028 = vst.msk [vmem:[#allocation3 + $0x18] sm:$0xf] %vm746_vm3, %v925_v42  ;;  %v7988_v42 = vld [vmem:[%s10201_s4 + $0x90] sm:$0xff]  }
  0x81   :  { %748 = vst.msk [vmem:[#allocation3 + $0x14] sm:$0xf] %vm746_vm3, %v644_v44 }
  0x83   :  { %v648_v59 = vpop.permute.xlu1 %647 }
  0x84   :  { %v646_v55 = vpop.permute.xlu0 %645  ;;  %750 = vst.msk [vmem:[#allocation3 + $0x3c] sm:$0xf] %vm746_vm3, %v648_v59 }
  0x85   :  { %749 = vst.msk [vmem:[#allocation3 + $0x28] sm:$0xf] %vm746_vm3, %v646_v55 }
  0x87   :  { %v7977_v57 = vld [vmem:[#allocation3 + $0x4] ss:$20 sps:$4 sm:$0xff]   ;;  %v652_v1 = vpop.permute.xlu1 %651 }
  0x88   :  { %v7975_v56 = vld [vmem:[#allocation3] ss:$20 sps:$4 sm:$0xff]   ;;  %2145 = vmatprep.mubr.bf16.mxu1 %v7977_v57  ;;  %v650_v62 = vpop.permute.xlu0 %649  ;;  %752 = vst.msk [vmem:[#allocation3 + $0x64] sm:$0xf] %vm746_vm3, %v652_v1  ;;  %v7992_v57 = vld [vmem:[%s10201_s4 + $0x98] sm:$0xff]  }
  0x89   :  { %2146 = vmatmul.mubr.bf16.vlgmr.msra.gmra.mrb[0].mxu1 %v7975_v56  ;;  %751 = vst.msk [vmem:[#allocation3 + $0x50] sm:$0xf] %vm746_vm3, %v650_v62 }
  0x8a   :  { %7175 = vmatpush3.bf16.msra.mxu1 %v7981_v20 }
  0x8b   :  { %7176 = vmatprep.subr.bf16.mxu1 %v7982_v25 }
  0x8e   :  { %7177 = vmatpush3.bf16.msra.mxu1 %v7983_v30 }
  0x8f   :  { %7178 = vmatprep.subr.bf16.mxu1 %v7987_v37 }
  0x92   :  { %7179 = vmatpush3.bf16.msra.mxu1 %v7988_v42  ;;  %v8006_v42 = vld [vmem:[%s10201_s4 + $0xf8] sm:$0xff]  }
  0x93   :  { %7180 = vmatprep.subr.bf16.mxu1 %v7991_v49  ;;  %v508_v49 = vld [vmem:[#allocation2 + $0x1c] sm:$0xf] }
  0x94   :  { %543 = vst.msk [vmem:[#allocation3 + $0x8c] sm:$0xf] %vm361_vm0, %v508_v49 }
  0x96   :  { %7181 = vmatpush3.bf16.msra.mxu1 %v7992_v57 }
  0xdd   :  { %v221_v4 = vpop.f32.mrb[0].mxu0 }
  0xde   :  { %v222_v5 = vadd.f32 %v8659_v61, %v221_v4  ;;  %v7724_v6 = vpop.f32.mrb[1].mxu0  ;;  %v7996_v4 = vld [vmem:[%s10201_s4 + $0xe0] sm:$0xff]  }
  0xdf   :  { %v224_v7 = vpop.f32.mrb[2].mxu0  ;;  %7182 = vmatprep.subr.bf16.mxu1 %v7996_v4  ;;  %v509_v4 = vld [vmem:[#allocation2 + $0x20] sm:$0xf] }
  0xe0   :  { %v323_v9 = vmax.f32 %v222_v5, 0.0  ;;  %v225_v10 = vadd.f32 %v8659_v61, %v224_v7  ;;  %v7725_v11 = vpop.f32.mrb[3].mxu0  ;;  %7183 = vmatpush3.bf16.msra.mxu1 %v7997_v8  ;;  %544 = vst.msk [vmem:[#allocation3 + $0xa0] sm:$0xf] %vm361_vm0, %v509_v4  ;;  %v794_v4 = vld [vmem:[#allocation2 + $0x38] sm:$0xf] }
  0xe1   :  { %7184 = vmatprep.subr.bf16.mxu1 %v7998_v16  ;;  %v578_v16 = vld [vmem:[#allocation2 + $0x20] sm:$0xf]  ;;  %829 = vst.msk [vmem:[#allocation3 + $0xf4] sm:$0xf] %vm361_vm0, %v794_v4 }
  0xe2   :  { %v7059_v14 = vpack.c.bf16 %v323_v9, %v323_v9  ;;  %v324_v15 = vmax.f32 %v225_v10, 0.0 }
  0xe4   :  { %406 = vst.msk [vmem:[#allocation2 + $0x24] sm:$0xf] %vm361_vm0, %v7059_v14  ;;  %v7060_v18 = vpack.c.bf16 %v324_v15, %v324_v15  ;;  %v1412_v15 = vld [vmem:[#allocation2 + $0x3c] sm:$0xf] }
  0xe5   :  { %v229_v19 = vpop.f32.mrb[4].mxu0 }
  0xe6   :  { %407 = vst.msk [vmem:[#allocation2 + $0x28] sm:$0xf] %vm361_vm0, %v7060_v18  ;;  %v230_v22 = vadd.f32 %v8659_v61, %v229_v19  ;;  %v7728_v23 = vpop.f32.mrb[5].mxu0 }
  0xe7   :  { %v232_v24 = vpop.f32.mrb[6].mxu0  ;;  %v7999_v23 = vld [vmem:[%s10201_s4 + $0xa8] sm:$0xff]  }
  0xe8   :  { %v325_v27 = vmax.f32 %v230_v22, 0.0  ;;  %v233_v28 = vadd.f32 %v8659_v61, %v232_v24  ;;  %v7729_v29 = vpop.f32.mrb[7].mxu0  ;;  %7185 = vmatpush3.bf16.msra.mxu1 %v7999_v23 }
  0xea   :  { %v7061_v32 = vpack.c.bf16 %v325_v27, %v325_v27  ;;  %v326_v33 = vmax.f32 %v233_v28, 0.0 }
  0xeb   :  { %v854_v34 = vld [vmem:[#allocation2 + $0x24] sm:$0xf] }
  0xec   :  { %408 = vst.msk [vmem:[#allocation2 + $0x2c] sm:$0xf] %vm361_vm0, %v7061_v32  ;;  %v7062_v35 = vpack.c.bf16 %v326_v33, %v326_v33  ;;  %926 = vrot.lane.b32.xlu0 %v854_v34, %s8380_s21  ;;  %v1063_v36 = vld [vmem:[#allocation2 + $0x24] sm:$0xf]  ;;  %v8003_v32 = vld [vmem:[%s10201_s4 + $0xf0] sm:$0xff]  }
  0xed   :  { %v789_v38 = vld [vmem:[#allocation2 + $0x24] sm:$0xf]  ;;  %v237_v39 = vpop.f32.mrb[8].mxu0  ;;  %v855_v40 = vld [vmem:[#allocation2 + $0x28] sm:$0xf]  ;;  %7186 = vmatprep.subr.bf16.mxu1 %v8003_v32 }
  0xee   :  { %1098 = vst.msk [vmem:[#allocation3 + $0x1c] sm:$0xf] %vm361_vm0, %v1063_v36  ;;  %824 = vst.msk [vmem:[#allocation3 + $0x90] sm:$0xf] %vm361_vm0, %v789_v38  ;;  %v238_v43 = vadd.f32 %v8659_v61, %v237_v39  ;;  %928 = vrot.lane.b32.xlu1 %v855_v40, %s8380_s21  ;;  %v7732_v44 = vpop.f32.mrb[9].mxu0  ;;  %v8005_v38 = vld [vmem:[%s10201_s4 + $0xb0] sm:$0xff]  }
  0xef   :  { %409 = vst.msk [vmem:[#allocation2 + $0x30] sm:$0xf] %vm361_vm0, %v7062_v35  ;;  %v240_v47 = vpop.f32.mrb[10].mxu0  ;;  %v1064_v54 = vld [vmem:[#allocation2 + $0x28] sm:$0xf]  ;;  %v8004_v35 = vld [vmem:[%s10201_s4 + $0x20] sm:$0xff]   ;;  %7187 = vmatpush3.bf16.msra.mxu1 %v8005_v38 }
  0xf0   :  { %v327_v51 = vmax.f32 %v238_v43, 0.0  ;;  %v241_v52 = vadd.f32 %v8659_v61, %v240_v47  ;;  %653 = vrot.lane.b32.xlu0 %v577_v41, %s8380_s21  ;;  %v7733_v53 = vpop.f32.mrb[11].mxu0  ;;  %v790_v55 = vld [vmem:[#allocation2 + $0x28] sm:$0xf]  ;;  %1099 = vst.msk [vmem:[#allocation3 + $0x30] sm:$0xf] %vm361_vm0, %v1064_v54  ;;  %7231 = vmatpush3.bf16.msra.mxu0 %v8004_v35 }
  0xf1   :  { %v1133_v56 = vld [vmem:[#allocation2 + $0x28] sm:$0xf]  ;;  %825 = vst.msk [vmem:[#allocation3 + $0xa4] sm:$0xf] %vm361_vm0, %v790_v55  ;;  %v510_v58 = vld [vmem:[#allocation2 + $0x24] sm:$0xf]  ;;  %7188 = vmatprep.subr.bf16.mxu1 %v8006_v42 }
  0xf2   :  { %v7063_v59 = vpack.c.bf16 %v327_v51, %v327_v51  ;;  %v328_v60 = vmax.f32 %v241_v52, 0.0  ;;  %1204 = vrot.lane.b32.xlu1 %v1133_v56, %s8380_s21  ;;  %545 = vst.msk [vmem:[#allocation3 + $0xb4] sm:$0xf] %vm361_vm0, %v510_v58  ;;  %v511_v62 = vld [vmem:[#allocation2 + $0x28] sm:$0xf] }
  0xf3   :  { %v856_v63 = vld [vmem:[#allocation2 + $0x2c] sm:$0xf]  ;;  %546 = vst.msk [vmem:[#allocation3 + $0xc8] sm:$0xf] %vm361_vm0, %v511_v62  ;;  %v1132_v10 = vld [vmem:[#allocation2 + $0x24] sm:$0xf]  ;;  %7189 = vmatpush3.bf16.msra.mxu1 %v8007_v48 }
  0xf4   :  { %410 = vst.msk [vmem:[#allocation2 + $0x34] sm:$0xf] %vm361_vm0, %v7063_v59  ;;  %v7064_v1 = vpack.c.bf16 %v328_v60, %v328_v60  ;;  %930 = vrot.lane.b32.xlu0 %v856_v63, %s8380_s21  ;;  %v1065_v3 = vld [vmem:[#allocation2 + $0x2c] sm:$0xf]  ;;  %v1137_v40 = vld [vmem:[#allocation2 + $0x38] sm:$0xf] }
  0xf5   :  { %v791_v5 = vld [vmem:[#allocation2 + $0x2c] sm:$0xf]  ;;  %v245_v6 = vpop.f32.mrb[12].mxu0  ;;  %1100 = vst.msk [vmem:[#allocation3 + $0x44] sm:$0xf] %vm361_vm0, %v1065_v3  ;;  %v8011_v62 = vld [vmem:[%s10201_s4 + $0x100] sm:$0xff]  }
  0xf6   :  { %v857_v7 = vld [vmem:[#allocation2 + $0x30] sm:$0xf]  ;;  %826 = vst.msk [vmem:[#allocation3 + $0xb8] sm:$0xf] %vm361_vm0, %v791_v5  ;;  %428 = vst.msk [vmem:[#allocation2 + $0x40] sm:$0xf] %vm361_vm0, %v7064_v1  ;;  %v246_v9 = vadd.f32 %v8659_v61, %v245_v6  ;;  %7774 = vmatprep.subr.bf16.mxu1 %v8011_v62 }
  0xf7   :  { %932 = vrot.lane.b32.xlu1 %v857_v7, %s8380_s21  ;;  %v7736_v11 = vpop.f32.mrb[13].mxu0  ;;  %v1135_v13 = vld [vmem:[#allocation2 + $0x30] sm:$0xf]  ;;  %v512_v24 = vld [vmem:[#allocation2 + $0x2c] sm:$0xf] }
  0xf8   :  { %v248_v14 = vpop.f32.mrb[14].mxu0  ;;  %v329_v18 = vmax.f32 %v246_v9, 0.0  ;;  %1202 = vrot.lane.b32.xlu0 %v1132_v10, %s8380_s21  ;;  %v1066_v21 = vld [vmem:[#allocation2 + $0x30] sm:$0xf]  ;;  %547 = vst.msk [vmem:[#allocation3 + $0xdc] sm:$0xf] %vm361_vm0, %v512_v24 }
  0xf9   :  { %v249_v19 = vadd.f32 %v8659_v61, %v248_v14  ;;  %v7737_v20 = vpop.f32.mrb[15].mxu0  ;;  %v792_v22 = vld [vmem:[#allocation2 + $0x30] sm:$0xf]  ;;  %1101 = vst.msk [vmem:[#allocation3 + $0x58] sm:$0xf] %vm361_vm0, %v1066_v21  ;;  %v8012_v5 = vld [vmem:[%s10201_s4 + $0x68] sm:$0xff]  }
  0xfa   :  { %827 = vst.msk [vmem:[#allocation3 + $0xcc] sm:$0xf] %vm361_vm0, %v792_v22  ;;  %v513_v25 = vld [vmem:[#allocation2 + $0x30] sm:$0xf]  ;;  %v7065_v26 = vpack.c.bf16 %v329_v18, %v329_v18  ;;  %v1134_v39 = vld [vmem:[#allocation2 + $0x2c] sm:$0xf]  ;;  %7232 = vmatprep.subr.bf16.mxu0 %v8012_v5 }
  0xfb   :  { %1208 = vrot.lane.b32.xlu1 %v1135_v13, %s8380_s21  ;;  %v330_v27 = vmax.f32 %v249_v19, 0.0  ;;  %548 = vst.msk [vmem:[#allocation3 + $0xf0] sm:$0xf] %vm361_vm0, %v513_v25  ;;  %v858_v28 = vld [vmem:[#allocation2 + $0x34] sm:$0xf]  ;;  %7233 = vmatpush3.bf16.msra.mxu0 %v8013_v12 }
  0xfc   :  { %429 = vst.msk [vmem:[#allocation2 + $0x44] sm:$0xf] %vm361_vm0, %v7065_v26  ;;  %1482 = vrot.lane.b32.xlu0 %v1412_v15, %s8380_s21  ;;  %v1067_v30 = vld [vmem:[#allocation2 + $0x34] sm:$0xf]  ;;  %v1138_v44 = vld [vmem:[#allocation2 + $0x3c] sm:$0xf] }
  0xfd   :  { %v7066_v29 = vpack.c.bf16 %v330_v27, %v330_v27  ;;  %v1622_v33 = vld [vmem:[#allocation2 + $0x40] sm:$0xf]  ;;  %v253_v34 = vpop.f32.mrb[16].mxu0  ;;  %1102 = vst.msk [vmem:[#allocation3 + $0x6c] sm:$0xf] %vm361_vm0, %v1067_v30  ;;  %v8018_v26 = vld [vmem:[%s10201_s4 + $0x70] sm:$0xff]  }
  0xfe   :  { %1657 = vst.msk [vmem:[#allocation3 + $0x10] sm:$0xf] %vm361_vm0, %v1622_v33  ;;  %v254_v36 = vadd.f32 %v8659_v61, %v253_v34  ;;  %v7740_v37 = vpop.f32.mrb[17].mxu0  ;;  %v1344_v47 = vld [vmem:[#allocation2 + $0x40] sm:$0xf]  ;;  %7234 = vmatprep.subr.bf16.mxu0 %v8018_v26  ;;  %v8019_v33 = vld [vmem:[%s10201_s4 + $0x30] sm:$0xff]  }
  0xff   :  { %430 = vst.msk [vmem:[#allocation2 + $0x48] sm:$0xf] %vm361_vm0, %v7066_v29  ;;  %934 = vrot.lane.b32.xlu1 %v858_v28, %s8380_s21  ;;  %v256_v41 = vpop.f32.mrb[18].mxu0  ;;  %1379 = vst.msk [vmem:[#allocation3 + $0x34] sm:$0xf] %vm361_vm0, %v1344_v47  ;;  %7235 = vmatpush3.bf16.msra.mxu0 %v8019_v33 }
 0x100   :  { %v331_v43 = vmax.f32 %v254_v36, 0.0  ;;  %1206 = vrot.lane.b32.xlu0 %v1134_v39, %s8380_s21  ;;  %v257_v45 = vadd.f32 %v8659_v61, %v256_v41  ;;  %v7741_v46 = vpop.f32.mrb[19].mxu0  ;;  %v793_v50 = vld [vmem:[#allocation2 + $0x34] sm:$0xf]  ;;  %v1070_v53 = vld [vmem:[#allocation2 + $0x40] sm:$0xf] }
 0x101   :  { %828 = vst.msk [vmem:[#allocation3 + $0xe0] sm:$0xf] %vm361_vm0, %v793_v50  ;;  %1105 = vst.msk [vmem:[#allocation3 + $0xa8] sm:$0xf] %vm361_vm0, %v1070_v53  ;;  %v1413_v58 = vld [vmem:[#allocation2 + $0x40] sm:$0xf] }
 0x102   :  { %v7067_v51 = vpack.c.bf16 %v331_v43, %v331_v43  ;;  %v332_v52 = vmax.f32 %v257_v45, 0.0  ;;  %v1418_v59 = vld [vmem:[#allocation2 + $0x54] sm:$0xf]  ;;  %v579_v27 = vld [vmem:[#allocation2 + $0x24] sm:$0xf]  ;;  %v8026_v45 = vld [vmem:[%s10201_s4 + $0x38] sm:$0xff]  }
 0x103   :  { %1212 = vrot.lane.b32.xlu1 %v1137_v40, %s8380_s21  ;;  %v1623_v54 = vld [vmem:[#allocation2 + $0x44] sm:$0xf]  ;;  %v1136_v63 = vld [vmem:[#allocation2 + $0x34] sm:$0xf]  ;;  %v859_v40 = vld [vmem:[#allocation2 + $0x38] sm:$0xf] }
 0x104   :  { %1658 = vst.msk [vmem:[#allocation3 + $0x24] sm:$0xf] %vm361_vm0, %v1623_v54  ;;  %431 = vst.msk [vmem:[#allocation2 + $0x4c] sm:$0xf] %vm361_vm0, %v7067_v51  ;;  %1214 = vrot.lane.b32.xlu0 %v1138_v44, %s8380_s21  ;;  %v7068_v55 = vpack.c.bf16 %v332_v52, %v332_v52  ;;  %v1345_v56 = vld [vmem:[#allocation2 + $0x44] sm:$0xf] }
 0x105   :  { %1380 = vst.msk [vmem:[#allocation3 + $0x48] sm:$0xf] %vm361_vm0, %v1345_v56  ;;  %v261_v60 = vpop.f32.mrb[20].mxu0  ;;  %v1414_v8 = vld [vmem:[#allocation2 + $0x44] sm:$0xf]  ;;  %v8024_v44 = vld [vmem:[%s10201_s4 + $0x78] sm:$0xff]  }
 0x106   :  { %v1624_v57 = vld [vmem:[#allocation2 + $0x48] sm:$0xf]  ;;  %432 = vst.msk [vmem:[#allocation2 + $0x50] sm:$0xf] %vm361_vm0, %v7068_v55  ;;  %v262_v1 = vadd.f32 %v8659_v61, %v261_v60  ;;  %v7744_v3 = vpop.f32.mrb[21].mxu0  ;;  %7236 = vmatprep.subr.bf16.mxu0 %v8024_v44 }
 0x107   :  { %1659 = vst.msk [vmem:[#allocation3 + $0x38] sm:$0xf] %vm361_vm0, %v1624_v57  ;;  %1484 = vrot.lane.b32.xlu1 %v1413_v58, %s8380_s21  ;;  %v264_v6 = vpop.f32.mrb[22].mxu0  ;;  %v1346_v7 = vld [vmem:[#allocation2 + $0x48] sm:$0xf]  ;;  %7237 = vmatpush3.bf16.msra.mxu0 %v8026_v45 }
 0x108   :  { %1210 = vrot.lane.b32.xlu0 %v1136_v63, %s8380_s21  ;;  %v333_v9 = vmax.f32 %v262_v1, 0.0  ;;  %v265_v10 = vadd.f32 %v8659_v61, %v264_v6  ;;  %v7745_v11 = vpop.f32.mrb[23].mxu0  ;;  %1381 = vst.msk [vmem:[#allocation3 + $0x5c] sm:$0xf] %vm361_vm0, %v1346_v7  ;;  %v1072_v13 = vld [vmem:[#allocation2 + $0x48] sm:$0xf] }
 0x109   :  { %1107 = vst.msk [vmem:[#allocation3 + $0xd0] sm:$0xf] %vm361_vm0, %v1072_v13  ;;  %v1415_v19 = vld [vmem:[#allocation2 + $0x48] sm:$0xf]  ;;  %v514_v36 = vld [vmem:[#allocation2 + $0x34] sm:$0xf] }
 0x10a   :  { %v7069_v15 = vpack.c.bf16 %v333_v9, %v333_v9  ;;  %v334_v17 = vmax.f32 %v265_v10, 0.0  ;;  %549 = vst.msk [vmem:[#allocation3 + $0x104] sm:$0xf] %vm361_vm0, %v514_v36  ;;  %v860_v46 = vld [vmem:[#allocation2 + $0x3c] sm:$0xf] }
 0x10b   :  { %1494 = vrot.lane.b32.xlu1 %v1418_v59, %s8380_s21  ;;  %v1625_v14 = vld [vmem:[#allocation2 + $0x4c] sm:$0xf]  ;;  %v580_v55 = vld [vmem:[#allocation2 + $0x28] sm:$0xf]  ;;  %v861_v1 = vld [vmem:[#allocation2 + $0x40] sm:$0xf] }
 0x10c   :  { %1660 = vst.msk [vmem:[#allocation3 + $0x4c] sm:$0xf] %vm361_vm0, %v1625_v14  ;;  %1486 = vrot.lane.b32.xlu0 %v1414_v8, %s8380_s21  ;;  %451 = vst.msk [vmem:[#allocation2 + $0x5c] sm:$0xf] %vm361_vm0, %v7069_v15  ;;  %v7070_v21 = vpack.c.bf16 %v334_v17, %v334_v17  ;;  %v1347_v31 = vld [vmem:[#allocation2 + $0x4c] sm:$0xf] }
 0x10d   :  { %v1626_v18 = vld [vmem:[#allocation2 + $0x50] sm:$0xf]  ;;  %v269_v20 = vpop.f32.mrb[24].mxu0  ;;  %v1416_v32 = vld [vmem:[#allocation2 + $0x4c] sm:$0xf] }
 0x10e   :  { %1661 = vst.msk [vmem:[#allocation3 + $0x60] sm:$0xf] %vm361_vm0, %v1626_v18  ;;  %v270_v22 = vadd.f32 %v8659_v61, %v269_v20  ;;  %v7748_v23 = vpop.f32.mrb[25].mxu0  ;;  %v1348_v25 = vld [vmem:[#allocation2 + $0x50] sm:$0xf] }
 0x10f   :  { %1488 = vrot.lane.b32.xlu1 %v1415_v19, %s8380_s21  ;;  %v272_v24 = vpop.f32.mrb[26].mxu0  ;;  %452 = vst.msk [vmem:[#allocation2 + $0x60] sm:$0xf] %vm361_vm0, %v7070_v21  ;;  %1383 = vst.msk [vmem:[#allocation3 + $0x84] sm:$0xf] %vm361_vm0, %v1348_v25 }
 0x110   :  { %655 = vrot.lane.b32.xlu0 %v578_v16, %s8380_s21  ;;  %v335_v28 = vmax.f32 %v270_v22, 0.0  ;;  %v273_v29 = vadd.f32 %v8659_v61, %v272_v24  ;;  %v7749_v30 = vpop.f32.mrb[27].mxu0  ;;  %1382 = vst.msk [vmem:[#allocation3 + $0x70] sm:$0xf] %vm361_vm0, %v1347_v31  ;;  %v1417_v39 = vld [vmem:[#allocation2 + $0x50] sm:$0xf] }
 0x111   :  { %v1074_v52 = vld [vmem:[#allocation2 + $0x50] sm:$0xf]  ;;  %v581_v58 = vld [vmem:[#allocation2 + $0x2c] sm:$0xf]  ;;  %v1069_v8 = vld [vmem:[#allocation2 + $0x3c] sm:$0xf] }
 0x112   :  { %v7071_v34 = vpack.c.bf16 %v335_v28, %v335_v28  ;;  %v336_v35 = vmax.f32 %v273_v29, 0.0  ;;  %1109 = vst.msk [vmem:[#allocation3 + $0xf8] sm:$0xf] %vm361_vm0, %v1074_v52  ;;  %v862_v9 = vld [vmem:[#allocation2 + $0x44] sm:$0xf] }
 0x113   :  { %657 = vrot.lane.b32.xlu1 %v579_v27, %s8380_s21  ;;  %v1629_v37 = vld [vmem:[#allocation2 + $0x5c] sm:$0xf]  ;;  %1104 = vst.msk [vmem:[#allocation3 + $0x94] sm:$0xf] %vm361_vm0, %v1069_v8  ;;  %v1349_v10 = vld [vmem:[#allocation2 + $0x54] sm:$0xf] }
 0x114   :  { %1490 = vrot.lane.b32.xlu0 %v1416_v32, %s8380_s21  ;;  %453 = vst.msk [vmem:[#allocation2 + $0x64] sm:$0xf] %vm361_vm0, %v7071_v34  ;;  %v7072_v38 = vpack.c.bf16 %v336_v35, %v336_v35  ;;  %1664 = vst.msk [vmem:[#allocation3 + $0x9c] sm:$0xf] %vm361_vm0, %v1629_v37  ;;  %v1071_v13 = vld [vmem:[#allocation2 + $0x44] sm:$0xf] }
 0x115   :  { %v277_v41 = vpop.f32.mrb[28].mxu0  ;;  %1384 = vst.msk [vmem:[#allocation3 + $0x98] sm:$0xf] %vm361_vm0, %v1349_v10  ;;  %v582_v14 = vld [vmem:[#allocation2 + $0x30] sm:$0xf] }
 0x116   :  { %454 = vst.msk [vmem:[#allocation2 + $0x68] sm:$0xf] %vm361_vm0, %v7072_v38  ;;  %v278_v42 = vadd.f32 %v8659_v61, %v277_v41  ;;  %v7752_v43 = vpop.f32.mrb[29].mxu0  ;;  %v1630_v47 = vld [vmem:[#allocation2 + $0x60] sm:$0xf] }
 0x117   :  { %1492 = vrot.lane.b32.xlu1 %v1417_v39, %s8380_s21  ;;  %v280_v48 = vpop.f32.mrb[30].mxu0  ;;  %1665 = vst.msk [vmem:[#allocation3 + $0xb0] sm:$0xf] %vm361_vm0, %v1630_v47  ;;  %1106 = vst.msk [vmem:[#allocation3 + $0xbc] sm:$0xf] %vm361_vm0, %v1071_v13  ;;  %v8884_v43 = vld [vmem:[%s10201_s4 + $0x100] sm:$0xff]  }
 0x118   :  { %936 = vrot.lane.b32.xlu0 %v859_v40, %s8380_s21  ;;  %v337_v49 = vmax.f32 %v278_v42, 0.0  ;;  %v281_v50 = vadd.f32 %v8659_v61, %v280_v48  ;;  %v7753_v51 = vpop.f32.mrb[31].mxu0  ;;  %v583_v17 = vld [vmem:[#allocation2 + $0x34] sm:$0xf]  ;;  %v863_v22 = vld [vmem:[#allocation2 + $0x48] sm:$0xf]  ;;  %7790 = vmatprep.subr.bf16.mxu0 %v8884_v43 }
 0x119   :  { %v864_v28 = vld [vmem:[#allocation2 + $0x4c] sm:$0xf]  ;;  %v1139_v31 = vld [vmem:[#allocation2 + $0x40] sm:$0xf]  ;;  %v1419_v33 = vld [vmem:[#allocation2 + $0x58] sm:$0xf] }
 0x11a   :  { %v7073_v53 = vpack.c.bf16 %v337_v49, %v337_v49  ;;  %v338_v54 = vmax.f32 %v281_v50, 0.0  ;;  %v1140_v35 = vld [vmem:[#allocation2 + $0x44] sm:$0xf]  ;;  %v1628_v41 = vld [vmem:[#allocation2 + $0x58] sm:$0xf] }
 0x11b   :  { %938 = vrot.lane.b32.xlu1 %v860_v46, %s8380_s21  ;;  %v1631_v56 = vld [vmem:[#allocation2 + $0x64] sm:$0xf]  ;;  %v1075_v42 = vld [vmem:[#allocation2 + $0x54] sm:$0xf]  ;;  %1663 = vst.msk [vmem:[#allocation3 + $0x88] sm:$0xf] %vm361_vm0, %v1628_v41 }
 0x11c   :  { %659 = vrot.lane.b32.xlu0 %v580_v55, %s8380_s21  ;;  %1666 = vst.msk [vmem:[#allocation3 + $0xc4] sm:$0xf] %vm361_vm0, %v1631_v56  ;;  %455 = vst.msk [vmem:[#allocation2 + $0x6c] sm:$0xf] %vm361_vm0, %v7073_v53  ;;  %v7074_v57 = vpack.c.bf16 %v338_v54, %v338_v54  ;;  %v516_v47 = vld [vmem:[#allocation2 + $0x3c] sm:$0xf] }
 0x11d   :  { %v1632_v59 = vld [vmem:[#allocation2 + $0x68] sm:$0xf]  ;;  %v285_v60 = vpop.f32.mrb[32].mxu0  ;;  %1110 = vst.msk [vmem:[#allocation3 + $0x10c] sm:$0xf] %vm361_vm0, %v1075_v42 }
 0x11e   :  { %1667 = vst.msk [vmem:[#allocation3 + $0xd8] sm:$0xf] %vm361_vm0, %v1632_v59  ;;  %473 = vst.msk [vmem:[#allocation2 + $0x78] sm:$0xf] %vm361_vm0, %v7074_v57  ;;  %v286_v62 = vadd.f32 %v8659_v61, %v285_v60  ;;  %v7756_v63 = vpop.f32.mrb[33].mxu0 }
 0x11f   :  { %661 = vrot.lane.b32.xlu1 %v581_v58, %s8380_s21  ;;  %v288_v3 = vpop.f32.mrb[34].mxu0  ;;  %v1142_v48 = vld [vmem:[#allocation2 + $0x4c] sm:$0xf]  ;;  %v584_v49 = vld [vmem:[#allocation2 + $0x38] sm:$0xf] }
 0x120   :  { %940 = vrot.lane.b32.xlu0 %v861_v1, %s8380_s21  ;;  %v339_v5 = vmax.f32 %v286_v62, 0.0  ;;  %v289_v6 = vadd.f32 %v8659_v61, %v288_v3  ;;  %v7757_v7 = vpop.f32.mrb[35].mxu0  ;;  %551 = vst.msk [vmem:[#allocation3 + $0x12c] sm:$0xf] %vm361_vm0, %v516_v47  ;;  %v515_v52 = vld [vmem:[#allocation2 + $0x38] sm:$0xf] }
 0x121   :  { %v1144_v53 = vld [vmem:[#allocation2 + $0x54] sm:$0xf]  ;;  %550 = vst.msk [vmem:[#allocation3 + $0x118] sm:$0xf] %vm361_vm0, %v515_v52  ;;  %v1425_v58 = vld [vmem:[#allocation2 + $0x70] sm:$0xf] }
 0x122   :  { %v7075_v11 = vpack.c.bf16 %v339_v5, %v339_v5  ;;  %v340_v12 = vmax.f32 %v289_v6, 0.0  ;;  %v1141_v62 = vld [vmem:[#allocation2 + $0x48] sm:$0xf]  ;;  %v1145_v63 = vld [vmem:[#allocation2 + $0x58] sm:$0xf] }
 0x123   :  { %942 = vrot.lane.b32.xlu1 %v862_v9, %s8380_s21  ;;  %v1633_v15 = vld [vmem:[#allocation2 + $0x6c] sm:$0xf]  ;;  %v795_v6 = vld [vmem:[#allocation2 + $0x3c] sm:$0xf]  ;;  %v796_v7 = vld [vmem:[#allocation2 + $0x40] sm:$0xf] }
 0x124   :  { %663 = vrot.lane.b32.xlu0 %v582_v14, %s8380_s21  ;;  %1668 = vst.msk [vmem:[#allocation3 + $0xec] sm:$0xf] %vm361_vm0, %v1633_v15  ;;  %474 = vst.msk [vmem:[#allocation2 + $0x7c] sm:$0xf] %vm361_vm0, %v7075_v11  ;;  %v7076_v16 = vpack.c.bf16 %v340_v12, %v340_v12  ;;  %v1355_v24 = vld [vmem:[#allocation2 + $0x6c] sm:$0xf] }
 0x125   :  { %v1636_v18 = vld [vmem:[#allocation2 + $0x78] sm:$0xf]  ;;  %v293_v19 = vpop.f32.mrb[36].mxu0  ;;  %1390 = vst.msk [vmem:[#allocation3 + $0x110] sm:$0xf] %vm361_vm0, %v1355_v24 }
 0x126   :  { %1671 = vst.msk [vmem:[#allocation3 + $0x128] sm:$0xf] %vm361_vm0, %v1636_v18  ;;  %475 = vst.msk [vmem:[#allocation2 + $0x80] sm:$0xf] %vm361_vm0, %v7076_v16  ;;  %v294_v20 = vadd.f32 %v8659_v61, %v293_v19  ;;  %v7760_v21 = vpop.f32.mrb[37].mxu0 }
 0x127   :  { %665 = vrot.lane.b32.xlu1 %v583_v17, %s8380_s21  ;;  %v296_v23 = vpop.f32.mrb[38].mxu0  ;;  %830 = vst.msk [vmem:[#allocation3 + $0x108] sm:$0xf] %vm361_vm0, %v795_v6  ;;  %831 = vst.msk [vmem:[#allocation3 + $0x11c] sm:$0xf] %vm361_vm0, %v796_v7 }
 0x128   :  { %944 = vrot.lane.b32.xlu0 %v863_v22, %s8380_s21  ;;  %v341_v25 = vmax.f32 %v294_v20, 0.0  ;;  %v297_v26 = vadd.f32 %v8659_v61, %v296_v23  ;;  %v7761_v27 = vpop.f32.mrb[39].mxu0  ;;  %v585_v11 = vld [vmem:[#allocation2 + $0x3c] sm:$0xf]  ;;  %v1350_v13 = vld [vmem:[#allocation2 + $0x58] sm:$0xf] }
 0x129   :  { %v586_v14 = vld [vmem:[#allocation2 + $0x40] sm:$0xf]  ;;  %1385 = vst.msk [vmem:[#allocation3 + $0xac] sm:$0xf] %vm361_vm0, %v1350_v13  ;;  %v1073_v18 = vld [vmem:[#allocation2 + $0x4c] sm:$0xf] }
 0x12a   :  { %v7077_v29 = vpack.c.bf16 %v341_v25, %v341_v25  ;;  %v342_v30 = vmax.f32 %v297_v26, 0.0  ;;  %v866_v19 = vld [vmem:[#allocation2 + $0x54] sm:$0xf]  ;;  %1108 = vst.msk [vmem:[#allocation3 + $0xe4] sm:$0xf] %vm361_vm0, %v1073_v18 }
 0x12b   :  { %946 = vrot.lane.b32.xlu1 %v864_v28, %s8380_s21  ;;  %v1637_v32 = vld [vmem:[#allocation2 + $0x7c] sm:$0xf]  ;;  %v865_v21 = vld [vmem:[#allocation2 + $0x50] sm:$0xf]  ;;  %v797_v24 = vld [vmem:[#allocation2 + $0x44] sm:$0xf] }
 0x12c   :  { %1216 = vrot.lane.b32.xlu0 %v1139_v31, %s8380_s21  ;;  %1672 = vst.msk [vmem:[#allocation3 + $0x13c] sm:$0xf] %vm361_vm0, %v1637_v32  ;;  %476 = vst.msk [vmem:[#allocation2 + $0x84] sm:$0xf] %vm361_vm0, %v7077_v29  ;;  %v7078_v34 = vpack.c.bf16 %v342_v30, %v342_v30  ;;  %v1351_v27 = vld [vmem:[#allocation2 + $0x5c] sm:$0xf] }
 0x12d   :  { %v1638_v36 = vld [vmem:[#allocation2 + $0x80] sm:$0xf]  ;;  %v301_v37 = vpop.f32.mrb[40].mxu0  ;;  %832 = vst.msk [vmem:[#allocation3 + $0x130] sm:$0xf] %vm361_vm0, %v797_v24 }
 0x12e   :  { %1673 = vst.msk [vmem:[#allocation3 + $0x150] sm:$0xf] %vm361_vm0, %v1638_v36  ;;  %477 = vst.msk [vmem:[#allocation2 + $0x88] sm:$0xf] %vm361_vm0, %v7078_v34  ;;  %v302_v38 = vadd.f32 %v8659_v61, %v301_v37  ;;  %v7764_v39 = vpop.f32.mrb[41].mxu0 }
 0x12f   :  { %1218 = vrot.lane.b32.xlu1 %v1140_v35, %s8380_s21  ;;  %v304_v40 = vpop.f32.mrb[42].mxu0  ;;  %v1420_v28 = vld [vmem:[#allocation2 + $0x5c] sm:$0xf]  ;;  %1386 = vst.msk [vmem:[#allocation3 + $0xc0] sm:$0xf] %vm361_vm0, %v1351_v27 }
 0x130   :  { %1496 = vrot.lane.b32.xlu0 %v1419_v33, %s8380_s21  ;;  %v343_v44 = vmax.f32 %v302_v38, 0.0  ;;  %v305_v45 = vadd.f32 %v8659_v61, %v304_v40  ;;  %v7765_v46 = vpop.f32.mrb[43].mxu0  ;;  %v867_v30 = vld [vmem:[#allocation2 + $0x58] sm:$0xf]  ;;  %v1352_v31 = vld [vmem:[#allocation2 + $0x60] sm:$0xf] }
 0x131   :  { %v1143_v32 = vld [vmem:[#allocation2 + $0x50] sm:$0xf]  ;;  %1387 = vst.msk [vmem:[#allocation3 + $0xd4] sm:$0xf] %vm361_vm0, %v1352_v31  ;;  %v517_v33 = vld [vmem:[#allocation2 + $0x40] sm:$0xf] }
 0x132   :  { %v7079_v50 = vpack.c.bf16 %v343_v44, %v343_v44  ;;  %v344_v51 = vmax.f32 %v305_v45, 0.0  ;;  %552 = vst.msk [vmem:[#allocation3 + $0x140] sm:$0xf] %vm361_vm0, %v517_v33  ;;  %v1421_v34 = vld [vmem:[#allocation2 + $0x60] sm:$0xf] }
 0x133   :  { %1222 = vrot.lane.b32.xlu1 %v1142_v48, %s8380_s21  ;;  %v1639_v54 = vld [vmem:[#allocation2 + $0x84] sm:$0xf]  ;;  %v588_v40 = vld [vmem:[#allocation2 + $0x48] sm:$0xf]  ;;  %v1634_v42 = vld [vmem:[#allocation2 + $0x70] sm:$0xf] }
 0x134   :  { %667 = vrot.lane.b32.xlu0 %v584_v49, %s8380_s21  ;;  %1674 = vst.msk [vmem:[#allocation3 + $0x164] sm:$0xf] %vm361_vm0, %v1639_v54  ;;  %496 = vst.msk [vmem:[#allocation2 + $0x94] sm:$0xf] %vm361_vm0, %v7079_v50  ;;  %v7080_v55 = vpack.c.bf16 %v344_v51, %v344_v51  ;;  %v1422_v35 = vld [vmem:[#allocation2 + $0x64] sm:$0xf] }
 0x135   :  { %v1640_v56 = vld [vmem:[#allocation2 + $0x88] sm:$0xf]  ;;  %v309_v57 = vpop.f32.mrb[44].mxu0  ;;  %v518_v37 = vld [vmem:[#allocation2 + $0x44] sm:$0xf] }
 0x136   :  { %1675 = vst.msk [vmem:[#allocation3 + $0x178] sm:$0xf] %vm361_vm0, %v1640_v56  ;;  %497 = vst.msk [vmem:[#allocation2 + $0x98] sm:$0xf] %vm361_vm0, %v7080_v55  ;;  %v310_v59 = vadd.f32 %v8659_v61, %v309_v57  ;;  %v7768_v60 = vpop.f32.mrb[45].mxu0 }
 0x137   :  { %1226 = vrot.lane.b32.xlu1 %v1144_v53, %s8380_s21  ;;  %v312_v1 = vpop.f32.mrb[46].mxu0  ;;  %553 = vst.msk [vmem:[#allocation3 + $0x154] sm:$0xf] %vm361_vm0, %v518_v37  ;;  %v1353_v38 = vld [vmem:[#allocation2 + $0x64] sm:$0xf] }
 0x138   :  { %1220 = vrot.lane.b32.xlu0 %v1141_v62, %s8380_s21  ;;  %v345_v3 = vmax.f32 %v310_v59, 0.0  ;;  %v313_v4 = vadd.f32 %v8659_v61, %v312_v1  ;;  %v7769_v5 = vpop.f32.mrb[47].mxu0  ;;  %1388 = vst.msk [vmem:[#allocation3 + $0xe8] sm:$0xf] %vm361_vm0, %v1353_v38  ;;  %v587_v39 = vld [vmem:[#allocation2 + $0x44] sm:$0xf] }
 0x139   :  { %v1354_v41 = vld [vmem:[#allocation2 + $0x68] sm:$0xf]  ;;  %1669 = vst.msk [vmem:[#allocation3 + $0x100] sm:$0xf] %vm361_vm0, %v1634_v42  ;;  %v1424_v46 = vld [vmem:[#allocation2 + $0x6c] sm:$0xf] }
 0x13a   :  { %v7081_v8 = vpack.c.bf16 %v345_v3, %v345_v3  ;;  %v346_v9 = vmax.f32 %v313_v4, 0.0  ;;  %1389 = vst.msk [vmem:[#allocation3 + $0xfc] sm:$0xf] %vm361_vm0, %v1354_v41  ;;  %v1423_v44 = vld [vmem:[#allocation2 + $0x68] sm:$0xf] }
 0x13b   :  { %1508 = vrot.lane.b32.xlu1 %v1425_v58, %s8380_s21  ;;  %v1643_v10 = vld [vmem:[#allocation2 + $0x94] sm:$0xf]  ;;  %v798_v45 = vld [vmem:[#allocation2 + $0x48] sm:$0xf]  ;;  %v799_v47 = vld [vmem:[#allocation2 + $0x4c] sm:$0xf] }
 0x13c   :  { %1228 = vrot.lane.b32.xlu0 %v1145_v63, %s8380_s21  ;;  %1678 = vst.msk [vmem:[#allocation3 + $0x1b4] sm:$0xf] %vm361_vm0, %v1643_v10  ;;  %498 = vst.msk [vmem:[#allocation2 + $0x9c] sm:$0xf] %vm361_vm0, %v7081_v8  ;;  %v7082_v12 = vpack.c.bf16 %v346_v9, %v346_v9  ;;  %v1076_v48 = vld [vmem:[#allocation2 + $0x58] sm:$0xf] }
 0x13d   :  { %v1644_v15 = vld [vmem:[#allocation2 + $0x98] sm:$0xf]  ;;  %v317_v16 = vpop.f32.mrb[48].mxu0  ;;  %833 = vst.msk [vmem:[#allocation3 + $0x144] sm:$0xf] %vm361_vm0, %v798_v45 }
 0x13e   :  { %1679 = vst.msk [vmem:[#allocation3 + $0x1c8] sm:$0xf] %vm361_vm0, %v1644_v15  ;;  %499 = vst.msk [vmem:[#allocation2 + $0xa0] sm:$0xf] %vm361_vm0, %v7082_v12  ;;  %v318_v17 = vadd.f32 %v8659_v61, %v317_v16  ;;  %v7772_v20 = vpop.f32.mrb[49].mxu0 }
 0x13f   :  { %671 = vrot.lane.b32.xlu1 %v586_v14, %s8380_s21  ;;  %v320_v23 = vpop.f32.mrb[50].mxu0  ;;  %834 = vst.msk [vmem:[#allocation3 + $0x158] sm:$0xf] %vm361_vm0, %v799_v47  ;;  %v868_v49 = vld [vmem:[#allocation2 + $0x5c] sm:$0xf] }
 0x140   :  { %669 = vrot.lane.b32.xlu0 %v585_v11, %s8380_s21  ;;  %v347_v22 = vmax.f32 %v318_v17, 0.0  ;;  %v7773_v25 = vpop.f32.mrb[51].mxu0  ;;  %1111 = vst.msk [vmem:[#allocation3 + $0x120] sm:$0xf] %vm361_vm0, %v1076_v48  ;;  %v1077_v50 = vld [vmem:[#allocation2 + $0x5c] sm:$0xf] }
 0x141   :  { %v869_v51 = vld [vmem:[#allocation2 + $0x60] sm:$0xf]  ;;  %1112 = vst.msk [vmem:[#allocation3 + $0x134] sm:$0xf] %vm361_vm0, %v1077_v50  ;;  %v1146_v52 = vld [vmem:[#allocation2 + $0x5c] sm:$0xf] }
 0x142   :  { %v7083_v26 = vpack.c.bf16 %v347_v22, %v347_v22  ;;  %v1426_v53 = vld [vmem:[#allocation2 + $0x74] sm:$0xf]  ;;  %v1356_v54 = vld [vmem:[#allocation2 + $0x70] sm:$0xf]  ;;  %v1147_v55 = vld [vmem:[#allocation2 + $0x60] sm:$0xf] }
 0x143   :  { %948 = vrot.lane.b32.xlu1 %v865_v21, %s8380_s21  ;;  %v1645_v61 = vld [vmem:[#allocation2 + $0x9c] sm:$0xf]  ;;  %1391 = vst.msk [vmem:[#allocation3 + $0x124] sm:$0xf] %vm361_vm0, %v1356_v54  ;;  %v520_v57 = vld [vmem:[#allocation2 + $0x4c] sm:$0xf] }
 0x144   :  { %950 = vrot.lane.b32.xlu0 %v866_v19, %s8380_s21  ;;  %1680 = vst.msk [vmem:[#allocation3 + $0x1dc] sm:$0xf] %vm361_vm0, %v1645_v61  ;;  %500 = vst.msk [vmem:[#allocation2 + $0xa4] sm:$0xf] %vm361_vm0, %v7083_v26  ;;  %v1635_v58 = vld [vmem:[#allocation2 + $0x74] sm:$0xf] }
 0x145   :  { %v1646_v29 = vld [vmem:[#allocation2 + $0xa0] sm:$0xf]  ;;  %555 = vst.msk [vmem:[#allocation3 + $0x17c] sm:$0xf] %vm361_vm0, %v520_v57  ;;  %1670 = vst.msk [vmem:[#allocation3 + $0x114] sm:$0xf] %vm361_vm0, %v1635_v58 }
 0x146   :  { %1681 = vst.msk [vmem:[#allocation3 + $0x1f0] sm:$0xf] %vm361_vm0, %v1646_v29  ;;  %v590_v60 = vld [vmem:[#allocation2 + $0x50] sm:$0xf]  ;;  %v519_v62 = vld [vmem:[#allocation2 + $0x48] sm:$0xf] }
 0x147   :  { %1498 = vrot.lane.b32.xlu1 %v1420_v28, %s8380_s21  ;;  %554 = vst.msk [vmem:[#allocation3 + $0x168] sm:$0xf] %vm361_vm0, %v519_v62  ;;  %v589_v1 = vld [vmem:[#allocation2 + $0x4c] sm:$0xf]  ;;  %v801_v4 = vld [vmem:[#allocation2 + $0x54] sm:$0xf] }
 0x148   :  { %1224 = vrot.lane.b32.xlu0 %v1143_v32, %s8380_s21  ;;  %v871_v5 = vld [vmem:[#allocation2 + $0x68] sm:$0xf]  ;;  %836 = vst.msk [vmem:[#allocation3 + $0x180] sm:$0xf] %vm361_vm0, %v801_v4  ;;  %v870_v7 = vld [vmem:[#allocation2 + $0x64] sm:$0xf] }
 0x149   :  { %v7986_v10 = vld [vmem:[#allocation3 + $0x28] ss:$20 sps:$4 sm:$0xff]   ;;  %v800_v12 = vld [vmem:[#allocation2 + $0x50] sm:$0xf]  ;;  %v1148_v14 = vld [vmem:[#allocation2 + $0x64] sm:$0xf] }
 0x14a   :  { %v1149_v11 = vld [vmem:[#allocation2 + $0x68] sm:$0xf]  ;;  %835 = vst.msk [vmem:[#allocation3 + $0x16c] sm:$0xf] %vm361_vm0, %v800_v12  ;;  %v1079_v15 = vld [vmem:[#allocation2 + $0x64] sm:$0xf] }
 0x14b   :  { %952 = vrot.lane.b32.xlu1 %v867_v30, %s8380_s21  ;;  %v1647_v36 = vld [vmem:[#allocation2 + $0xa4] sm:$0xf]  ;;  %v591_v17 = vld [vmem:[#allocation2 + $0x54] sm:$0xf]  ;;  %1114 = vst.msk [vmem:[#allocation3 + $0x15c] sm:$0xf] %vm361_vm0, %v1079_v15 }
 0x14c   :  { %1500 = vrot.lane.b32.xlu0 %v1421_v34, %s8380_s21  ;;  %1682 = vst.msk [vmem:[#allocation3 + $0x204] sm:$0xf] %vm361_vm0, %v1647_v36  ;;  %v872_v18 = vld [vmem:[#allocation2 + $0x6c] sm:$0xf]  ;;  %v1078_v20 = vld [vmem:[#allocation2 + $0x60] sm:$0xf] }
 0x14d   :  { %1113 = vst.msk [vmem:[#allocation3 + $0x148] sm:$0xf] %vm361_vm0, %v1078_v20  ;;  %v7995_v23 = vld [vmem:[#allocation3 + $0x50] ss:$20 sps:$4 sm:$0xff]   ;;  %v1427_v24 = vld [vmem:[#allocation2 + $0x78] sm:$0xf] }
 0x14e   :  { %v1151_v26 = vld [vmem:[#allocation2 + $0x70] sm:$0xf]  ;;  %v802_v27 = vld [vmem:[#allocation2 + $0x58] sm:$0xf]  ;;  %v1150_v28 = vld [vmem:[#allocation2 + $0x6c] sm:$0xf] }
 0x14f   :  { %1502 = vrot.lane.b32.xlu1 %v1422_v35, %s8380_s21  ;;  %837 = vst.msk [vmem:[#allocation3 + $0x194] sm:$0xf] %vm361_vm0, %v802_v27  ;;  %v1428_v29 = vld [vmem:[#allocation2 + $0x7c] sm:$0xf]  ;;  %v521_v30 = vld [vmem:[#allocation2 + $0x50] sm:$0xf] }
 0x150   :  { %673 = vrot.lane.b32.xlu0 %v587_v39, %s8380_s21  ;;  %556 = vst.msk [vmem:[#allocation3 + $0x190] sm:$0xf] %vm361_vm0, %v521_v30  ;;  %v1429_v32 = vld [vmem:[#allocation2 + $0x80] sm:$0xf]  ;;  %v1357_v33 = vld [vmem:[#allocation2 + $0x74] sm:$0xf] }
 0x151   :  { %1392 = vst.msk [vmem:[#allocation3 + $0x138] sm:$0xf] %vm361_vm0, %v1357_v33  ;;  %v1152_v38 = vld [vmem:[#allocation2 + $0x74] sm:$0xf]  ;;  %v1080_v39 = vld [vmem:[#allocation2 + $0x68] sm:$0xf] }
 0x152   :  { %1115 = vst.msk [vmem:[#allocation3 + $0x170] sm:$0xf] %vm361_vm0, %v1080_v39  ;;  %v1081_v41 = vld [vmem:[#allocation2 + $0x6c] sm:$0xf]  ;;  %v1358_v45 = vld [vmem:[#allocation2 + $0x78] sm:$0xf] }
 0x153   :  { %675 = vrot.lane.b32.xlu1 %v588_v40, %s8380_s21  ;;  %v1432_v42 = vld [vmem:[#allocation2 + $0x8c] sm:$0xf]  ;;  %1116 = vst.msk [vmem:[#allocation3 + $0x184] sm:$0xf] %vm361_vm0, %v1081_v41  ;;  %1393 = vst.msk [vmem:[#allocation3 + $0x14c] sm:$0xf] %vm361_vm0, %v1358_v45 }
 0x154   :  { %1504 = vrot.lane.b32.xlu0 %v1423_v44, %s8380_s21  ;;  %v1359_v48 = vld [vmem:[#allocation2 + $0x7c] sm:$0xf]  ;;  %v1082_v50 = vld [vmem:[#allocation2 + $0x70] sm:$0xf]  ;;  %v8017_v54 = vld [vmem:[%s10201_s4 + $0x108] sm:$0xff]  }
 0x155   :  { %1394 = vst.msk [vmem:[#allocation3 + $0x160] sm:$0xf] %vm361_vm0, %v1359_v48  ;;  %1117 = vst.msk [vmem:[#allocation3 + $0x198] sm:$0xf] %vm361_vm0, %v1082_v50  ;;  %v1362_v57 = vld [vmem:[#allocation2 + $0x88] sm:$0xf] }
 0x156   :  { %1397 = vst.msk [vmem:[#allocation3 + $0x19c] sm:$0xf] %vm361_vm0, %v1362_v57  ;;  %v1360_v58 = vld [vmem:[#allocation2 + $0x80] sm:$0xf]  ;;  %v1361_v4 = vld [vmem:[#allocation2 + $0x84] sm:$0xf] }
 0x157   :  { %1506 = vrot.lane.b32.xlu1 %v1424_v46, %s8380_s21  ;;  %v1430_v46 = vld [vmem:[#allocation2 + $0x84] sm:$0xf]  ;;  %1395 = vst.msk [vmem:[#allocation3 + $0x174] sm:$0xf] %vm361_vm0, %v1360_v58  ;;  %1396 = vst.msk [vmem:[#allocation3 + $0x188] sm:$0xf] %vm361_vm0, %v1361_v4 }
 0x158   :  { %954 = vrot.lane.b32.xlu0 %v868_v49, %s8380_s21  ;;  %v1431_v49 = vld [vmem:[#allocation2 + $0x88] sm:$0xf]  ;;  %v8375_v62 = vld [vmem:[%s10201_s4 + $0x100] sm:$0xff]   ;;  %v8031_v41 = vld [vmem:[#allocation3 + $0x10] ss:$20 sps:$4 sm:$0xff]  }
 0x159   :  { %v594_v12 = vld [vmem:[#allocation2 + $0x60] sm:$0xf]  ;;  %v595_v15 = vld [vmem:[#allocation2 + $0x64] sm:$0xf]  ;;  %v8052_v33 = vld [vmem:[%s10201_s4 + $0x108] sm:$0xff]  }
 0x15a   :  { %v804_v20 = vld [vmem:[#allocation2 + $0x60] sm:$0xf]  ;;  %v878_v39 = vld [vmem:[#allocation2 + $0x84] sm:$0xf]  ;;  %v1154_v45 = vld [vmem:[#allocation2 + $0x7c] sm:$0xf] }
 0x15b   :  { %956 = vrot.lane.b32.xlu1 %v869_v51, %s8380_s21  ;;  %839 = vst.msk [vmem:[#allocation3 + $0x1bc] sm:$0xf] %vm361_vm0, %v804_v20  ;;  %v1641_v48 = vld [vmem:[#allocation2 + $0x8c] sm:$0xf]  ;;  %v8036_v57 = vld [vmem:[#allocation3 + $0x38] ss:$20 sps:$4 sm:$0xff]  }
 0x15c   :  { %1230 = vrot.lane.b32.xlu0 %v1146_v52, %s8380_s21  ;;  %1676 = vst.msk [vmem:[#allocation3 + $0x18c] sm:$0xf] %vm361_vm0, %v1641_v48  ;;  %v598_v58 = vld [vmem:[#allocation2 + $0x70] sm:$0xf]  ;;  %v8043_v4 = vld [vmem:[%s10201_s4 + $0x88] sm:$0xff]  }
 0x15d   :  { %v1435_v20 = vld [vmem:[#allocation2 + $0x98] sm:$0xf]  ;;  %v8054_v48 = vld [vmem:[%s10201_s4 + $0xa8] sm:$0xff]  }
 0x15e   :  { %v927_v56 = vpop.permute.xlu0 %926 }
 0x15f   :  { %1232 = vrot.lane.b32.xlu1 %v1147_v55, %s8380_s21  ;;  %1029 = vst.msk [vmem:[#allocation3 + $0x2c] sm:$0xf] %vm746_vm3, %v927_v56 }
 0x160   :  { %v929_v59 = vpop.permute.xlu1 %928  ;;  %1510 = vrot.lane.b32.xlu0 %v1426_v53, %s8380_s21  ;;  %v592_v53 = vld [vmem:[#allocation2 + $0x58] sm:$0xf] }
 0x161   :  { %1030 = vst.msk [vmem:[#allocation3 + $0x40] sm:$0xf] %vm746_vm3, %v929_v59 }
 0x162   :  { %v654_v63 = vpop.permute.xlu0 %653 }
 0x163   :  { %679 = vrot.lane.b32.xlu1 %v590_v60, %s8380_s21  ;;  %753 = vst.msk [vmem:[#allocation3 + $0x78] sm:$0xf] %vm746_vm3, %v654_v63  ;;  %v873_v60 = vld [vmem:[#allocation2 + $0x70] sm:$0xf]  ;;  %v593_v63 = vld [vmem:[#allocation2 + $0x5c] sm:$0xf] }
 0x164   :  { %v1205_v3 = vpop.permute.xlu1 %1204  ;;  %677 = vrot.lane.b32.xlu0 %v589_v1, %s8380_s21 }
 0x165   :  { %1308 = vst.msk [vmem:[#allocation3 + $0x1c] sm:$0xf] %vm746_vm3, %v1205_v3  ;;  %v874_v3 = vld [vmem:[#allocation2 + $0x74] sm:$0xf] }
 0x166   :  { %v931_v6 = vpop.permute.xlu0 %930 }
 0x167   :  { %960 = vrot.lane.b32.xlu1 %v871_v5, %s8380_s21  ;;  %1031 = vst.msk [vmem:[#allocation3 + $0x54] sm:$0xf] %vm746_vm3, %v931_v6  ;;  %v8023_v5 = vld [vmem:[%s10201_s4 + $0x110] sm:$0xff]  }
 0x168   :  { %958 = vrot.lane.b32.xlu0 %v870_v7, %s8380_s21  ;;  %v7984_v9 = vld [vmem:[#allocation3 + $0x2c] ss:$20 sps:$4 sm:$0xff]  }
 0x169   :  { %v933_v8 = vpop.permute.xlu1 %932  ;;  %2153 = vmatprep.mubr.bf16.mxu1 %v7984_v9  ;;  %v522_v9 = vld [vmem:[#allocation2 + $0x54] sm:$0xf] }
 0x16a   :  { %1032 = vst.msk [vmem:[#allocation3 + $0x68] sm:$0xf] %vm746_vm3, %v933_v8  ;;  %v1203_v13 = vpop.permute.xlu0 %1202  ;;  %2154 = vmatmul.mubr.bf16.gmra.mrb[4].mxu1 %v7986_v10  ;;  %v8030_v8 = vld [vmem:[%s10201_s4 + $0x118] sm:$0xff]  }
 0x16b   :  { %1236 = vrot.lane.b32.xlu1 %v1149_v11, %s8380_s21  ;;  %1307 = vst.msk [vmem:[#allocation3 + $0x8] sm:$0xf] %vm746_vm3, %v1203_v13  ;;  %v523_v13 = vld [vmem:[#allocation2 + $0x58] sm:$0xf] }
 0x16c   :  { %1234 = vrot.lane.b32.xlu0 %v1148_v14, %s8380_s21  ;;  %557 = vst.msk [vmem:[#allocation3 + $0x1a4] sm:$0xf] %vm361_vm0, %v522_v9  ;;  %558 = vst.msk [vmem:[#allocation3 + $0x1b8] sm:$0xf] %vm361_vm0, %v523_v13  ;;  %v1155_v9 = vld [vmem:[#allocation2 + $0x80] sm:$0xf] }
 0x16d   :  { %v1209_v16 = vpop.permute.xlu1 %1208  ;;  %v1642_v13 = vld [vmem:[#allocation2 + $0x90] sm:$0xf] }
 0x16e   :  { %1310 = vst.msk [vmem:[#allocation3 + $0x44] sm:$0xf] %vm746_vm3, %v1209_v16  ;;  %v1483_v19 = vpop.permute.xlu0 %1482  ;;  %v803_v16 = vld [vmem:[#allocation2 + $0x5c] sm:$0xf] }
 0x16f   :  { %962 = vrot.lane.b32.xlu1 %v872_v18, %s8380_s21  ;;  %1587 = vst.msk [vmem:[#allocation3 + $0xc] sm:$0xf] %vm746_vm3, %v1483_v19  ;;  %v875_v19 = vld [vmem:[#allocation2 + $0x78] sm:$0xf] }
 0x170   :  { %681 = vrot.lane.b32.xlu0 %v591_v17, %s8380_s21  ;;  %v8035_v17 = vld [vmem:[%s10201_s4 + $0xc0] sm:$0xff]   ;;  %838 = vst.msk [vmem:[#allocation3 + $0x1a8] sm:$0xf] %vm361_vm0, %v803_v16  ;;  %1677 = vst.msk [vmem:[#allocation3 + $0x1a0] sm:$0xf] %vm361_vm0, %v1642_v13 }
 0x171   :  { %v935_v21 = vpop.permute.xlu1 %934  ;;  %v7993_v22 = vld [vmem:[#allocation3 + $0x54] ss:$20 sps:$4 sm:$0xff]  }
 0x172   :  { %1033 = vst.msk [vmem:[#allocation3 + $0x7c] sm:$0xf] %vm746_vm3, %v935_v21  ;;  %v1207_v25 = vpop.permute.xlu0 %1206  ;;  %2161 = vmatprep.mubr.bf16.mxu1 %v7993_v22  ;;  %v8008_v56 = vld [vmem:[#allocation3 + $0x8] ss:$20 sps:$4 sm:$0xff]  }
 0x173   :  { %1512 = vrot.lane.b32.xlu1 %v1427_v24, %s8380_s21  ;;  %1309 = vst.msk [vmem:[#allocation3 + $0x30] sm:$0xf] %vm746_vm3, %v1207_v25  ;;  %2162 = vmatmul.mubr.bf16.gmra.mrb[8].mxu1 %v7995_v23  ;;  %v876_v24 = vld [vmem:[#allocation2 + $0x7c] sm:$0xf]  ;;  %v596_v25 = vld [vmem:[#allocation2 + $0x68] sm:$0xf] }
 0x174   :  { %1238 = vrot.lane.b32.xlu0 %v1150_v28, %s8380_s21 }
 0x175   :  { %v1213_v61 = vpop.permute.xlu1 %1212 }
 0x176   :  { %1312 = vst.msk [vmem:[#allocation3 + $0x6c] sm:$0xf] %vm746_vm3, %v1213_v61  ;;  %v1215_v31 = vpop.permute.xlu0 %1214  ;;  %v597_v61 = vld [vmem:[#allocation2 + $0x6c] sm:$0xf] }
 0x177   :  { %1240 = vrot.lane.b32.xlu1 %v1151_v26, %s8380_s21  ;;  %1313 = vst.msk [vmem:[#allocation3 + $0x80] sm:$0xf] %vm746_vm3, %v1215_v31 }
 0x178   :  { %1514 = vrot.lane.b32.xlu0 %v1428_v29, %s8380_s21  ;;  %v524_v29 = vld [vmem:[#allocation2 + $0x5c] sm:$0xf] }
 0x179   :  { %v1485_v34 = vpop.permute.xlu1 %1484  ;;  %v1710_v35 = vld [vmem:[#allocation3 + $0x78] sm:$0xff]  ;;  %559 = vst.msk [vmem:[#allocation3 + $0x1cc] sm:$0xf] %vm361_vm0, %v524_v29 }
 0x17a   :  { %1588 = vst.msk [vmem:[#allocation3 + $0x20] sm:$0xf] %vm746_vm3, %v1485_v34  ;;  %v6603_v36 = vcombine.high %v1710_v35, %v1710_v35  ;;  %v6602_v37 = vcombine.low %v1710_v35, %v1710_v35  ;;  %v1211_v40 = vpop.permute.xlu0 %1210  ;;  %v8016_v11 = vld [vmem:[#allocation3 + $0x30] ss:$20 sps:$4 sm:$0xff]   ;;  %v525_v35 = vld [vmem:[#allocation2 + $0x60] sm:$0xf] }
 0x17b   :  { %1516 = vrot.lane.b32.xlu1 %v1429_v32, %s8380_s21  ;;  %1311 = vst.msk [vmem:[#allocation3 + $0x58] sm:$0xf] %vm746_vm3, %v1211_v40  ;;  %v1153_v40 = vld [vmem:[#allocation2 + $0x78] sm:$0xf] }
 0x17c   :  { %2169 = vmatprep.mubr.bf16.mxu1 %v6603_v36  ;;  %1242 = vrot.lane.b32.xlu0 %v1152_v38, %s8380_s21  ;;  %v877_v36 = vld [vmem:[#allocation2 + $0x80] sm:$0xf]  ;;  %560 = vst.msk [vmem:[#allocation3 + $0x1e0] sm:$0xf] %vm361_vm0, %v525_v35 }
 0x17d   :  { %2170 = vmatmul.mubr.bf16.gmra.mrb[12].mxu1 %v6602_v37  ;;  %v1495_v44 = vpop.permute.xlu1 %1494  ;;  %v805_v37 = vld [vmem:[#allocation2 + $0x64] sm:$0xf] }
 0x17e   :  { %1593 = vst.msk [vmem:[#allocation3 + $0x84] sm:$0xf] %vm746_vm3, %v1495_v44  ;;  %v1487_v47 = vpop.permute.xlu0 %1486 }
 0x17f   :  { %1522 = vrot.lane.b32.xlu1 %v1432_v42, %s8380_s21  ;;  %1589 = vst.msk [vmem:[#allocation3 + $0x34] sm:$0xf] %vm746_vm3, %v1487_v47  ;;  %v806_v47 = vld [vmem:[#allocation2 + $0x68] sm:$0xf] }
 0x180   :  { %1518 = vrot.lane.b32.xlu0 %v1430_v46, %s8380_s21  ;;  %840 = vst.msk [vmem:[#allocation3 + $0x1d0] sm:$0xf] %vm361_vm0, %v805_v37  ;;  %v1433_v46 = vld [vmem:[#allocation2 + $0x90] sm:$0xf]  ;;  %841 = vst.msk [vmem:[#allocation3 + $0x1e4] sm:$0xf] %vm361_vm0, %v806_v47 }
 0x181   :  { %v1489_v51 = vpop.permute.xlu1 %1488  ;;  %v8010_v52 = vld [vmem:[#allocation3 + $0xc] ss:$20 sps:$4 sm:$0xff]   ;;  %v8051_v37 = vld [vmem:[%s10201_s4 + $0xa0] sm:$0xff]   ;;  %v1085_v47 = vld [vmem:[#allocation2 + $0x7c] sm:$0xf] }
 0x182   :  { %1590 = vst.msk [vmem:[#allocation3 + $0x48] sm:$0xf] %vm746_vm3, %v1489_v51  ;;  %v656_v55 = vpop.permute.xlu0 %655  ;;  %2209 = vmatprep.mubr.bf16.mxu1 %v8010_v52  ;;  %v8022_v27 = vld [vmem:[#allocation3 + $0x58] ss:$20 sps:$4 sm:$0xff]  }
 0x183   :  { %1520 = vrot.lane.b32.xlu1 %v1431_v49, %s8380_s21  ;;  %754 = vst.msk [vmem:[#allocation3 + $0x8c] sm:$0xf] %vm746_vm3, %v656_v55  ;;  %v526_v55 = vld [vmem:[#allocation2 + $0x64] sm:$0xf] }
 0x184   :  { %683 = vrot.lane.b32.xlu0 %v592_v53, %s8380_s21  ;;  %v8066_v53 = vld [vmem:[%s10201_s4 + $0x118] sm:$0xff]   ;;  %561 = vst.msk [vmem:[#allocation3 + $0x1f4] sm:$0xf] %vm361_vm0, %v526_v55  ;;  %1120 = vst.msk [vmem:[#allocation3 + $0x1d4] sm:$0xf] %vm361_vm0, %v1085_v47 }
 0x185   :  { %2210 = vmatmul.mubr.bf16.vlgmr.msra.gmra.mrb[16].mxu1 %v8008_v56  ;;  %v658_v59 = vpop.permute.xlu1 %657  ;;  %v1711_v23 = vld [vmem:[#allocation3 + $0x80] sm:$0xff]  ;;  %v599_v55 = vld [vmem:[#allocation2 + $0x74] sm:$0xf]  ;;  %v8088_v47 = vld [vmem:[#allocation3 + $0x114] ss:$0 sps:$4 sm:$0xff]  }
 0x186   :  { %755 = vst.msk [vmem:[#allocation3 + $0xa0] sm:$0xf] %vm746_vm3, %v658_v59  ;;  %7775 = vmatpush3.bf16.msra.mxu1 %v8375_v62  ;;  %v1491_v1 = vpop.permute.xlu0 %1490  ;;  %v6605_v28 = vcombine.high %v1711_v23, %v1711_v23  ;;  %v6604_v44 = vcombine.low %v1711_v23, %v1711_v23  ;;  %v879_v59 = vld [vmem:[#allocation2 + $0x88] sm:$0xf]  ;;  %v1083_v23 = vld [vmem:[#allocation2 + $0x74] sm:$0xf] }
 0x187   :  { %685 = vrot.lane.b32.xlu1 %v593_v63, %s8380_s21  ;;  %7776 = vmatprep.subr.bf16.mxu1 %v8017_v54  ;;  %1591 = vst.msk [vmem:[#allocation3 + $0x5c] sm:$0xf] %vm746_vm3, %v1491_v1  ;;  %v8042_v62 = vld [vmem:[%s10201_s4 + $0xc8] sm:$0xff]  }
 0x188   :  { %964 = vrot.lane.b32.xlu0 %v873_v60, %s8380_s21  ;;  %v8037_v60 = vld [vmem:[#allocation3 + $0x60] ss:$20 sps:$4 sm:$0xff]   ;;  %v527_v63 = vld [vmem:[#allocation2 + $0x68] sm:$0xf]  ;;  %1118 = vst.msk [vmem:[#allocation3 + $0x1ac] sm:$0xf] %vm361_vm0, %v1083_v23 }
 0x189   :  { %v1493_v6 = vpop.permute.xlu1 %1492  ;;  %v8014_v7 = vld [vmem:[#allocation3 + $0x34] ss:$20 sps:$4 sm:$0xff]   ;;  %562 = vst.msk [vmem:[#allocation3 + $0x208] sm:$0xf] %vm361_vm0, %v527_v63  ;;  %v880_v63 = vld [vmem:[#allocation2 + $0x8c] sm:$0xf] }
 0x18a   :  { %1592 = vst.msk [vmem:[#allocation3 + $0x70] sm:$0xf] %vm746_vm3, %v1493_v6  ;;  %7777 = vmatpush3.bf16.msra.mxu1 %v8017_v54  ;;  %v937_v10 = vpop.permute.xlu0 %936  ;;  %2217 = vmatprep.mubr.bf16.mxu1 %v8014_v7  ;;  %v8038_v54 = vld [vmem:[%s10201_s4 + $0x80] sm:$0xff]  }
 0x18b   :  { %966 = vrot.lane.b32.xlu1 %v874_v3, %s8380_s21  ;;  %1034 = vst.msk [vmem:[#allocation3 + $0x90] sm:$0xf] %vm746_vm3, %v937_v10  ;;  %7778 = vmatprep.subr.bf16.mxu1 %v8023_v5  ;;  %v1434_v3 = vld [vmem:[#allocation2 + $0x94] sm:$0xf]  ;;  %v8079_v10 = vld [vmem:[%s10201_s4 + $0xc0] sm:$0xff]  }
 0x18c   :  { %687 = vrot.lane.b32.xlu0 %v594_v12, %s8380_s21  ;;  %v807_v12 = vld [vmem:[#allocation2 + $0x6c] sm:$0xf]  ;;  %v8069_v23 = vld [vmem:[#allocation3 + $0xc4] ss:$20 sps:$4 sm:$0xff]  }
 0x18d   :  { %2218 = vmatmul.mubr.bf16.gmra.mrb[20].mxu1 %v8016_v11  ;;  %v939_v14 = vpop.permute.xlu1 %938  ;;  %v8027_v31 = vld [vmem:[#allocation3 + $0x8c] ss:$20 sps:$4 sm:$0xff]   ;;  %842 = vst.msk [vmem:[#allocation3 + $0x1f8] sm:$0xf] %vm361_vm0, %v807_v12  ;;  %v1367_v12 = vld [vmem:[#allocation2 + $0x9c] sm:$0xf] }
 0x18e   :  { %1035 = vst.msk [vmem:[#allocation3 + $0xa4] sm:$0xf] %vm746_vm3, %v939_v14  ;;  %7779 = vmatpush3.bf16.msra.mxu1 %v8023_v5  ;;  %v660_v18 = vpop.permute.xlu0 %659  ;;  %v1156_v14 = vld [vmem:[#allocation2 + $0x84] sm:$0xf] }
 0x18f   :  { %689 = vrot.lane.b32.xlu1 %v595_v15, %s8380_s21  ;;  %7780 = vmatprep.subr.bf16.mxu1 %v8030_v8  ;;  %756 = vst.msk [vmem:[#allocation3 + $0xb4] sm:$0xf] %vm746_vm3, %v660_v18  ;;  %v8046_v15 = vld [vmem:[%s10201_s4 + $0x90] sm:$0xff]   ;;  %v8048_v18 = vld [vmem:[%s10201_s4 + $0xd8] sm:$0xff]  }
 0x190   :  { %968 = vrot.lane.b32.xlu0 %v875_v19, %s8380_s21  ;;  %v808_v19 = vld [vmem:[#allocation2 + $0x70] sm:$0xf]  ;;  %1402 = vst.msk [vmem:[#allocation3 + $0x200] sm:$0xf] %vm361_vm0, %v1367_v12  ;;  %v1649_v12 = vld [vmem:[#allocation2 + $0xac] sm:$0xf] }
 0x191   :  { %v662_v21 = vpop.permute.xlu1 %661  ;;  %v8020_v22 = vld [vmem:[#allocation3 + $0x5c] ss:$20 sps:$4 sm:$0xff]   ;;  %843 = vst.msk [vmem:[#allocation3 + $0x20c] sm:$0xf] %vm361_vm0, %v808_v19  ;;  %1684 = vst.msk [vmem:[#allocation3 + $0x22c] sm:$0xf] %vm361_vm0, %v1649_v12 }
 0x192   :  { %757 = vst.msk [vmem:[#allocation3 + $0xc8] sm:$0xf] %vm746_vm3, %v662_v21  ;;  %7781 = vmatpush3.bf16.msra.mxu1 %v8030_v8  ;;  %v941_v26 = vpop.permute.xlu0 %940  ;;  %2225 = vmatprep.mubr.bf16.mxu1 %v8020_v22  ;;  %v8045_v8 = vld [vmem:[%s10201_s4 + $0xd0] sm:$0xff]   ;;  %v1436_v22 = vld [vmem:[#allocation2 + $0x9c] sm:$0xf]  ;;  %v8070_v19 = vld [vmem:[%s10201_s4 + $0x48] sm:$0xff]  }
 0x193   :  { %970 = vrot.lane.b32.xlu1 %v876_v24, %s8380_s21  ;;  %1036 = vst.msk [vmem:[#allocation3 + $0xb8] sm:$0xf] %vm746_vm3, %v941_v26  ;;  %7262 = vmatprep.subr.bf16.mxu1 %v8035_v17  ;;  %v8044_v17 = vld [vmem:[#allocation3 + $0x88] ss:$0 sps:$4 sm:$0xff]   ;;  %v1084_v26 = vld [vmem:[#allocation2 + $0x78] sm:$0xf] }
 0x194   :  { %691 = vrot.lane.b32.xlu0 %v596_v25, %s8380_s21  ;;  %v8049_v25 = vld [vmem:[%s10201_s4 + $0x98] sm:$0xff]   ;;  %1119 = vst.msk [vmem:[#allocation3 + $0x1c0] sm:$0xf] %vm361_vm0, %v1084_v26  ;;  %v8076_v26 = vld [vmem:[%s10201_s4 + $0x50] sm:$0xff]  }
 0x195   :  { %2226 = vmatmul.mubr.bf16.gmra.mrb[24].mxu1 %v8022_v27  ;;  %v943_v30 = vpop.permute.xlu1 %942  ;;  %v8029_v32 = vld [vmem:[#allocation3 + $0x90] ss:$20 sps:$4 sm:$0xff]   ;;  %v7150_v27 = vpop.f32.mrb[0].mxu1 }
 0x196   :  { %1037 = vst.msk [vmem:[#allocation3 + $0xcc] sm:$0xf] %vm746_vm3, %v943_v30  ;;  %2233 = vmatprep.mubr.bf16.mxu1 %v6605_v28  ;;  %v664_v34 = vpop.permute.xlu0 %663  ;;  %2800 = vmatprep.mubr.bf16.mxu0 %v8029_v32  ;;  %v1158_v28 = vld [vmem:[#allocation2 + $0x8c] sm:$0xf]  ;;  %v7151_v29 = vpop.f32.mrb[1].mxu1 }
 0x197   :  { %693 = vrot.lane.b32.xlu1 %v597_v61, %s8380_s21  ;;  %758 = vst.msk [vmem:[#allocation3 + $0xdc] sm:$0xf] %vm746_vm3, %v664_v34  ;;  %2801 = vmatmul.mubr.bf16.vlgmr.msra.gmra.mrb[52].mxu0 %v8027_v31  ;;  %v8050_v61 = vld [vmem:[%s10201_s4 + $0xe0] sm:$0xff]   ;;  %v1157_v31 = vld [vmem:[#allocation2 + $0x88] sm:$0xf]  ;;  %v7153_v34 = vpop.f32.mrb[2].mxu1 }
 0x198   :  { %972 = vrot.lane.b32.xlu0 %v877_v36, %s8380_s21  ;;  %7791 = vmatpush3.bf16.msra.mxu0 %v8884_v43  ;;  %v8058_v43 = vld [vmem:[%s10201_s4 + $0x110] sm:$0xff]   ;;  %v1363_v32 = vld [vmem:[#allocation2 + $0x8c] sm:$0xf]  ;;  %v883_v29 = vld [vmem:[#allocation2 + $0x98] sm:$0xf] }
 0x199   :  { %v666_v38 = vpop.permute.xlu1 %665  ;;  %7792 = vmatprep.subr.bf16.mxu0 %v8052_v33  ;;  %v8034_v51 = vld [vmem:[#allocation3 + $0xb4] ss:$20 sps:$4 sm:$0xff]   ;;  %1398 = vst.msk [vmem:[#allocation3 + $0x1b0] sm:$0xf] %vm361_vm0, %v1363_v32  ;;  %v1089_v27 = vld [vmem:[#allocation2 + $0x8c] sm:$0xf] }
 0x19a   :  { %759 = vst.msk [vmem:[#allocation3 + $0xf0] sm:$0xf] %vm746_vm3, %v666_v38  ;;  %v945_v42 = vpop.permute.xlu0 %944  ;;  %v809_v36 = vld [vmem:[#allocation2 + $0x74] sm:$0xf]  ;;  %v528_v38 = vld [vmem:[#allocation2 + $0x6c] sm:$0xf] }
 0x19b   :  { %974 = vrot.lane.b32.xlu1 %v878_v39, %s8380_s21  ;;  %1038 = vst.msk [vmem:[#allocation3 + $0xe0] sm:$0xf] %vm746_vm3, %v945_v42  ;;  %v7154_v39 = vpop.f32.mrb[3].mxu1  ;;  %v1364_v42 = vld [vmem:[#allocation2 + $0x90] sm:$0xf] }
 0x19c   :  { %1244 = vrot.lane.b32.xlu0 %v1153_v40, %s8380_s21  ;;  %7793 = vmatpush3.bf16.msra.mxu0 %v8052_v33  ;;  %v1437_v33 = vld [vmem:[#allocation2 + $0xa0] sm:$0xf]  ;;  %844 = vst.msk [vmem:[#allocation3 + $0x220] sm:$0xf] %vm361_vm0, %v809_v36  ;;  %563 = vst.msk [vmem:[#allocation3 + $0x21c] sm:$0xf] %vm361_vm0, %v528_v38 }
 0x19d   :  { %v947_v49 = vpop.permute.xlu1 %946  ;;  %2234 = vmatmul.mubr.bf16.gmra.mrb[28].mxu1 %v6604_v44  ;;  %v8032_v50 = vld [vmem:[#allocation3 + $0xb8] ss:$20 sps:$4 sm:$0xff]   ;;  %7794 = vmatprep.subr.bf16.mxu0 %v8058_v43  ;;  %v9131_v44 = vadd.f32 %v7154_v39, %v7153_v34  ;;  %1399 = vst.msk [vmem:[#allocation3 + $0x1c4] sm:$0xf] %vm361_vm0, %v1364_v42  ;;  %1124 = vst.msk [vmem:[#allocation3 + $0x224] sm:$0xf] %vm361_vm0, %v1089_v27 }
 0x19e   :  { %1039 = vst.msk [vmem:[#allocation3 + $0xf4] sm:$0xf] %vm746_vm3, %v947_v49  ;;  %7782 = vmatprep.mubr.msk.bf16.mxu1 %vm2100_vm4, %v8031_v41  ;;  %v1217_v52 = vpop.permute.xlu0 %1216  ;;  %2808 = vmatprep.mubr.bf16.mxu0 %v8032_v50  ;;  %v8053_v41 = vld [vmem:[%s10201_s4 + $0xe8] sm:$0xff]   ;;  %v1086_v49 = vld [vmem:[#allocation2 + $0x80] sm:$0xf]  ;;  %v8080_v42 = vld [vmem:[%s10201_s4 + $0x18] sm:$0xff]  }
 0x19f   :  { %1246 = vrot.lane.b32.xlu1 %v1154_v45, %s8380_s21  ;;  %1314 = vst.msk [vmem:[#allocation3 + $0x94] sm:$0xf] %vm746_vm3, %v1217_v52  ;;  %2809 = vmatmul.mubr.bf16.gmra.mrb[56].mxu0 %v8034_v51  ;;  %v1438_v45 = vld [vmem:[#allocation2 + $0xa4] sm:$0xf]  ;;  %v1439_v51 = vld [vmem:[#allocation2 + $0xa8] sm:$0xf] }
 0x1a0   :  { %1524 = vrot.lane.b32.xlu0 %v1433_v46, %s8380_s21  ;;  %7795 = vmatpush3.bf16.msra.mxu0 %v8058_v43  ;;  %v1159_v46 = vld [vmem:[#allocation2 + $0x90] sm:$0xf]  ;;  %1121 = vst.msk [vmem:[#allocation3 + $0x1e8] sm:$0xf] %vm361_vm0, %v1086_v49  ;;  %v603_v36 = vld [vmem:[#allocation2 + $0x84] sm:$0xf] }
 0x1a1   :  { %v1219_v56 = vpop.permute.xlu1 %1218  ;;  %7796 = vmatprep.subr.bf16.mxu0 %v8066_v53  ;;  %v8041_v7 = vld [vmem:[#allocation3 + $0xdc] ss:$20 sps:$4 sm:$0xff]   ;;  %v8055_v52 = vld [vmem:[%s10201_s4 + $0xf0] sm:$0xff]   ;;  %v1369_v38 = vld [vmem:[#allocation2 + $0xa4] sm:$0xf] }
 0x1a2   :  { %1315 = vst.msk [vmem:[#allocation3 + $0xa8] sm:$0xf] %vm746_vm3, %v1219_v56  ;;  %v1497_v1 = vpop.permute.xlu0 %1496  ;;  %v8056_v56 = vld [vmem:[%s10201_s4 + $0xb0] sm:$0xff]   ;;  %v8085_v49 = vld [vmem:[%s10201_s4 + $0x60] sm:$0xff]  }
 0x1a3   :  { %976 = vrot.lane.b32.xlu1 %v879_v59, %s8380_s21  ;;  %1594 = vst.msk [vmem:[#allocation3 + $0x98] sm:$0xf] %vm746_vm3, %v1497_v1  ;;  %v8060_v59 = vld [vmem:[%s10201_s4 + $0xf8] sm:$0xff]   ;;  %v1163_v27 = vld [vmem:[#allocation2 + $0xa0] sm:$0xf] }
 0x1a4   :  { %695 = vrot.lane.b32.xlu0 %v598_v58, %s8380_s21  ;;  %7797 = vmatpush3.bf16.msra.mxu0 %v8066_v53  ;;  %v1365_v53 = vld [vmem:[#allocation2 + $0x94] sm:$0xf]  ;;  %v8061_v1 = vld [vmem:[%s10201_s4 + $0xb8] sm:$0xff]   ;;  %1404 = vst.msk [vmem:[#allocation3 + $0x228] sm:$0xf] %vm361_vm0, %v1369_v38 }
 0x1a5   :  { %v1223_v5 = vpop.permute.xlu1 %1222  ;;  %7783 = vmatmul.mubr.msk.bf16.vlgmr.msra.gmra.mrb[32].mxu1 %vm2100_vm4, %v8036_v57  ;;  %v8039_v6 = vld [vmem:[#allocation3 + $0xe0] ss:$20 sps:$4 sm:$0xff]   ;;  %7350 = vmatprep.subr.bf16.mxu0 %v8079_v10  ;;  %1400 = vst.msk [vmem:[#allocation3 + $0x1d8] sm:$0xf] %vm361_vm0, %v1365_v53  ;;  %v1366_v57 = vld [vmem:[#allocation2 + $0x98] sm:$0xf] }
 0x1a6   :  { %1317 = vst.msk [vmem:[#allocation3 + $0xd0] sm:$0xf] %vm746_vm3, %v1223_v5  ;;  %7786 = vmatprep.mubr.msk.bf16.mxu1 %vm2100_vm4, %v8037_v60  ;;  %7263 = vmatpush3.bf16.msra.mxu1 %v8038_v54  ;;  %v668_v11 = vpop.permute.xlu0 %667  ;;  %v1087_v60 = vld [vmem:[#allocation2 + $0x84] sm:$0xf] }
 0x1a7   :  { %1526 = vrot.lane.b32.xlu1 %v1434_v3, %s8380_s21  ;;  %2816 = vmatprep.mubr.bf16.mxu0 %v8039_v6  ;;  %760 = vst.msk [vmem:[#allocation3 + $0x104] sm:$0xf] %vm746_vm3, %v668_v11  ;;  %v8067_v11 = vld [vmem:[%s10201_s4 + $0x40] sm:$0xff]  }
 0x1a8   :  { %2817 = vmatmul.mubr.bf16.gmra.mrb[60].mxu0 %v8041_v7  ;;  %7264 = vmatprep.subr.bf16.mxu1 %v8042_v62  ;;  %1401 = vst.msk [vmem:[#allocation3 + $0x1ec] sm:$0xf] %vm361_vm0, %v1366_v57  ;;  %v600_v62 = vld [vmem:[#allocation2 + $0x78] sm:$0xf]  ;;  %1122 = vst.msk [vmem:[#allocation3 + $0x1fc] sm:$0xf] %vm361_vm0, %v1087_v60 }
 0x1a9   :  { %v1227_v16 = vpop.permute.xlu1 %1226  ;;  %1248 = vrot.lane.b32.xlu0 %v1155_v9, %s8380_s21  ;;  %v8062_v7 = vld [vmem:[#allocation3 + $0x9c] ss:$20 sps:$4 sm:$0xff]   ;;  %v1160_v60 = vld [vmem:[#allocation2 + $0x94] sm:$0xf] }
 0x1aa   :  { %1319 = vst.msk [vmem:[#allocation3 + $0xf8] sm:$0xf] %vm746_vm3, %v1227_v16  ;;  %7265 = vmatpush3.bf16.msra.mxu1 %v8043_v4  ;;  %v1221_v21 = vpop.permute.xlu0 %1220  ;;  %v1088_v9 = vld [vmem:[#allocation2 + $0x88] sm:$0xf]  ;;  %v601_v16 = vld [vmem:[#allocation2 + $0x7c] sm:$0xf] }
 0x1ab   :  { %1250 = vrot.lane.b32.xlu1 %v1156_v14, %s8380_s21  ;;  %7266 = vmatprep.subr.bf16.mxu1 %v8045_v8  ;;  %1316 = vst.msk [vmem:[#allocation3 + $0xbc] sm:$0xf] %vm746_vm3, %v1221_v21  ;;  %v881_v8 = vld [vmem:[#allocation2 + $0x90] sm:$0xf]  ;;  %v8063_v14 = vld [vmem:[#allocation3 + $0x94] ss:$20 sps:$4 sm:$0xff]  }
 0x1ac   :  { %1123 = vst.msk [vmem:[#allocation3 + $0x210] sm:$0xf] %vm361_vm0, %v1088_v9  ;;  %v602_v21 = vld [vmem:[#allocation2 + $0x80] sm:$0xf] }
 0x1ad   :  { %v1509_v24 = vpop.permute.xlu1 %1508  ;;  %7787 = vmatmul.mubr.msk.bf16.gmra.mrb[36].mxu1 %vm2100_vm4, %v8044_v17  ;;  %1528 = vrot.lane.b32.xlu0 %v1435_v20, %s8380_s21  ;;  %v8068_v17 = vld [vmem:[%s10201_s4] sm:$0xff]  }
 0x1ae   :  { %1600 = vst.msk [vmem:[#allocation3 + $0x110] sm:$0xf] %vm746_vm3, %v1509_v24  ;;  %7267 = vmatpush3.bf16.msra.mxu1 %v8046_v15  ;;  %v1229_v30 = vpop.permute.xlu0 %1228  ;;  %v1368_v20 = vld [vmem:[#allocation2 + $0xa0] sm:$0xf]  ;;  %v8072_v24 = vld [vmem:[%s10201_s4 + $0x8] sm:$0xff]  }
 0x1af   :  { %1530 = vrot.lane.b32.xlu1 %v1436_v22, %s8380_s21  ;;  %7268 = vmatprep.subr.bf16.mxu1 %v8048_v18  ;;  %1320 = vst.msk [vmem:[#allocation3 + $0x10c] sm:$0xf] %vm746_vm3, %v1229_v30  ;;  %v8077_v30 = vld [vmem:[%s10201_s4 + $0x10] sm:$0xff]  }
 0x1b0   :  { %1403 = vst.msk [vmem:[#allocation3 + $0x214] sm:$0xf] %vm361_vm0, %v1368_v20 }
 0x1b1   :  { %v672_v35 = vpop.permute.xlu1 %671  ;;  %1252 = vrot.lane.b32.xlu0 %v1157_v31, %s8380_s21  ;;  %v8081_v31 = vld [vmem:[%s10201_s4 + $0x80] sm:$0xff]  }
 0x1b2   :  { %762 = vst.msk [vmem:[#allocation3 + $0x12c] sm:$0xf] %vm746_vm3, %v672_v35  ;;  %7269 = vmatpush3.bf16.msra.mxu1 %v8049_v25  ;;  %v670_v40 = vpop.permute.xlu0 %669  ;;  %v882_v25 = vld [vmem:[#allocation2 + $0x94] sm:$0xf]  ;;  %v8075_v34 = vld [vmem:[#allocation3 + $0xbc] ss:$20 sps:$4 sm:$0xff]  }
 0x1b3   :  { %1254 = vrot.lane.b32.xlu1 %v1158_v28, %s8380_s21  ;;  %7270 = vmatprep.subr.bf16.mxu1 %v8050_v61  ;;  %761 = vst.msk [vmem:[#allocation3 + $0x118] sm:$0xf] %vm746_vm3, %v670_v40  ;;  %v8071_v61 = vld [vmem:[#allocation3 + $0xec] ss:$20 sps:$4 sm:$0xff]  }
 0x1b4   :  { %v8078_v35 = vld [vmem:[%s10201_s4 + $0x58] sm:$0xff]   ;;  %v8090_v40 = vld [vmem:[%s10201_s4 + $0x88] sm:$0xff]  }
 0x1b5   :  { %v949_v43 = vpop.permute.xlu1 %948  ;;  %1532 = vrot.lane.b32.xlu0 %v1437_v33, %s8380_s21 }
 0x1b6   :  { %1040 = vst.msk [vmem:[#allocation3 + $0x108] sm:$0xf] %vm746_vm3, %v949_v43  ;;  %7271 = vmatpush3.bf16.msra.mxu1 %v8051_v37  ;;  %v951_v50 = vpop.permute.xlu0 %950  ;;  %v8086_v37 = vld [vmem:[%s10201_s4 + $0xc8] sm:$0xff]  }
 0x1b7   :  { %1534 = vrot.lane.b32.xlu1 %v1438_v45, %s8380_s21  ;;  %7272 = vmatprep.subr.bf16.mxu1 %v8053_v41  ;;  %1041 = vst.msk [vmem:[#allocation3 + $0x11c] sm:$0xf] %vm746_vm3, %v951_v50  ;;  %v604_v41 = vld [vmem:[#allocation2 + $0x88] sm:$0xf]  ;;  %v8092_v45 = vld [vmem:[%s10201_s4 + $0xd0] sm:$0xff]  }
 0x1b8   :  { %v8094_v50 = vld [vmem:[%s10201_s4 + $0x90] sm:$0xff]  }
 0x1b9   :  { %v1499_v54 = vpop.permute.xlu1 %1498  ;;  %1256 = vrot.lane.b32.xlu0 %v1159_v46, %s8380_s21  ;;  %v529_v46 = vld [vmem:[#allocation2 + $0x70] sm:$0xf] }
 0x1ba   :  { %1595 = vst.msk [vmem:[#allocation3 + $0xac] sm:$0xf] %vm746_vm3, %v1499_v54  ;;  %7273 = vmatpush3.bf16.msra.mxu1 %v8054_v48  ;;  %v1225_v58 = vpop.permute.xlu0 %1224  ;;  %v884_v48 = vld [vmem:[#allocation2 + $0x9c] sm:$0xf]  ;;  %v885_v54 = vld [vmem:[#allocation2 + $0xa0] sm:$0xf] }
 0x1bb   :  { %1536 = vrot.lane.b32.xlu1 %v1439_v51, %s8380_s21  ;;  %7274 = vmatprep.subr.bf16.mxu1 %v8055_v52  ;;  %1318 = vst.msk [vmem:[#allocation3 + $0xe4] sm:$0xf] %vm746_vm3, %v1225_v58  ;;  %v530_v51 = vld [vmem:[#allocation2 + $0x74] sm:$0xf]  ;;  %v1648_v52 = vld [vmem:[#allocation2 + $0xa8] sm:$0xf] }
 0x1bc   :  { %564 = vst.msk [vmem:[#allocation3 + $0x230] sm:$0xf] %vm361_vm0, %v529_v46  ;;  %565 = vst.msk [vmem:[#allocation3 + $0x244] sm:$0xf] %vm361_vm0, %v530_v51  ;;  %v1165_v51 = vld [vmem:[#allocation2 + $0xa8] sm:$0xf] }
 0x1bd   :  { %v953_v3 = vpop.permute.xlu1 %952  ;;  %697 = vrot.lane.b32.xlu0 %v599_v55, %s8380_s21  ;;  %v2366_v4 = vld [vmem:[#allocation3 + $0x104] sm:$0xff]  ;;  %1683 = vst.msk [vmem:[#allocation3 + $0x218] sm:$0xf] %vm361_vm0, %v1648_v52  ;;  %v9236_v55 = vld [vmem:[#allocation3 + $0x10c] sm:$0xff] }
 0x1be   :  { %1042 = vst.msk [vmem:[#allocation3 + $0x130] sm:$0xf] %vm746_vm3, %v953_v3  ;;  %7275 = vmatpush3.bf16.msra.mxu1 %v8056_v56  ;;  %v6671_v5 = vcombine.high %v2366_v4, %v2366_v4  ;;  %v6670_v6 = vcombine.low %v2366_v4, %v2366_v4  ;;  %v1501_v10 = vpop.permute.xlu0 %1500  ;;  %v810_v56 = vld [vmem:[#allocation2 + $0x78] sm:$0xf]  ;;  %v811_v3 = vld [vmem:[#allocation2 + $0x7c] sm:$0xf]  ;;  %v6673_v4 = vcombine.high %v9236_v55, %v9236_v55 }
 0x1bf   :  { %699 = vrot.lane.b32.xlu1 %v600_v62, %s8380_s21  ;;  %7276 = vmatprep.subr.bf16.mxu1 %v8060_v59  ;;  %1596 = vst.msk [vmem:[#allocation3 + $0xc0] sm:$0xf] %vm746_vm3, %v1501_v10  ;;  %v8089_v62 = vld [vmem:[%s10201_s4 + $0x20] sm:$0xff]   ;;  %v8093_v10 = vld [vmem:[%s10201_s4 + $0x28] sm:$0xff]   ;;  %v8115_v52 = vld [vmem:[%s10201_s4 + $0xb8] sm:$0xff]  }
 0x1c0   :  { %2824 = vmatprep.mubr.bf16.mxu0 %v6671_v5  ;;  %845 = vst.msk [vmem:[#allocation3 + $0x234] sm:$0xf] %vm361_vm0, %v810_v56  ;;  %v1161_v5 = vld [vmem:[#allocation2 + $0x98] sm:$0xf]  ;;  %846 = vst.msk [vmem:[#allocation3 + $0x248] sm:$0xf] %vm361_vm0, %v811_v3 }
 0x1c1   :  { %2825 = vmatmul.mubr.bf16.gmra.mrb[64].mxu0 %v6670_v6  ;;  %v1503_v13 = vpop.permute.xlu1 %1502  ;;  %978 = vrot.lane.b32.xlu0 %v880_v63, %s8380_s21  ;;  %v8065_v15 = vld [vmem:[#allocation3 + $0x98] ss:$20 sps:$4 sm:$0xff]   ;;  %v1440_v6 = vld [vmem:[#allocation2 + $0xac] sm:$0xf]  ;;  %v1091_v3 = vld [vmem:[#allocation2 + $0x94] sm:$0xf] }
 0x1c2   :  { %1597 = vst.msk [vmem:[#allocation3 + $0xd4] sm:$0xf] %vm746_vm3, %v1503_v13  ;;  %7277 = vmatpush3.bf16.msra.mxu1 %v8061_v1  ;;  %7798 = vmatprep.mubr.msk.bf16.mxu0 %vm2100_vm4, %v8062_v7  ;;  %v674_v18 = vpop.permute.xlu0 %673  ;;  %v8084_v59 = vld [vmem:[#allocation3 + $0xe4] ss:$20 sps:$4 sm:$0xff]   ;;  %v8091_v1 = vld [vmem:[%s10201_s4 + $0x68] sm:$0xff]   ;;  %v8096_v7 = vld [vmem:[%s10201_s4 + $0xd8] sm:$0xff]  }
 0x1c3   :  { %980 = vrot.lane.b32.xlu1 %v881_v8, %s8380_s21  ;;  %2864 = vmatprep.mubr.bf16.mxu1 %v8065_v15  ;;  %763 = vst.msk [vmem:[#allocation3 + $0x140] sm:$0xf] %vm746_vm3, %v674_v18  ;;  %v531_v8 = vld [vmem:[#allocation2 + $0x78] sm:$0xf]  ;;  %v1441_v13 = vld [vmem:[#allocation2 + $0xb0] sm:$0xf] }
 0x1c4   :  { %7310 = vmatprep.subr.bf16.mxu1 %v8067_v11  ;;  %v8101_v11 = vld [vmem:[%s10201_s4 + $0x98] sm:$0xff]   ;;  %566 = vst.msk [vmem:[#allocation3 + $0x258] sm:$0xf] %vm361_vm0, %v531_v8  ;;  %v8097_v18 = vld [vmem:[%s10201_s4 + $0x30] sm:$0xff]   ;;  %v815_v56 = vld [vmem:[#allocation2 + $0x8c] sm:$0xf] }
 0x1c5   :  { %2865 = vmatmul.mubr.bf16.vlgmr.msra.gmra.mrb[40].mxu1 %v8063_v14  ;;  %v676_v22 = vpop.permute.xlu1 %675  ;;  %701 = vrot.lane.b32.xlu0 %v601_v16, %s8380_s21  ;;  %v8103_v14 = vld [vmem:[%s10201_s4 + $0xe0] sm:$0xff]   ;;  %v8095_v16 = vld [vmem:[%s10201_s4 + $0x70] sm:$0xff]   ;;  %850 = vst.msk [vmem:[#allocation3 + $0x298] sm:$0xf] %vm361_vm0, %v815_v56  ;;  %v8138_v8 = vld [vmem:[%s10201_s4 + $0x118] sm:$0xff]  }
 0x1c6   :  { %764 = vst.msk [vmem:[#allocation3 + $0x154] sm:$0xf] %vm746_vm3, %v676_v22  ;;  %7311 = vmatpush3.bf16.msra.mxu1 %v8068_v17  ;;  %v1505_v28 = vpop.permute.xlu0 %1504  ;;  %v605_v17 = vld [vmem:[#allocation2 + $0x8c] sm:$0xf]  ;;  %v8105_v22 = vld [vmem:[%s10201_s4 + $0xa0] sm:$0xff]  }
 0x1c7   :  { %703 = vrot.lane.b32.xlu1 %v602_v21, %s8380_s21  ;;  %7312 = vmatprep.subr.bf16.mxu1 %v8070_v19  ;;  %1598 = vst.msk [vmem:[#allocation3 + $0xe8] sm:$0xf] %vm746_vm3, %v1505_v28  ;;  %v532_v19 = vld [vmem:[#allocation2 + $0x7c] sm:$0xf]  ;;  %v1651_v56 = vld [vmem:[#allocation2 + $0xb4] sm:$0xf] }
 0x1c8   :  { %v8102_v21 = vld [vmem:[%s10201_s4 + $0x78] sm:$0xff]   ;;  %567 = vst.msk [vmem:[#allocation3 + $0x26c] sm:$0xf] %vm361_vm0, %v532_v19  ;;  %1126 = vst.msk [vmem:[#allocation3 + $0x24c] sm:$0xf] %vm361_vm0, %v1091_v3  ;;  %v8145_v3 = vld [vmem:[%s10201_s4 + $0x28] sm:$0xff]  }
 0x1c9   :  { %7799 = vmatmul.mubr.msk.bf16.vlgmr.msra.gmra.mrb[68].mxu0 %vm2100_vm4, %v8069_v23  ;;  %v1507_v32 = vpop.permute.xlu1 %1506  ;;  %982 = vrot.lane.b32.xlu0 %v882_v25, %s8380_s21  ;;  %v8073_v33 = vld [vmem:[#allocation3 + $0xc0] ss:$20 sps:$4 sm:$0xff]   ;;  %1686 = vst.msk [vmem:[#allocation3 + $0x254] sm:$0xf] %vm361_vm0, %v1651_v56 }
 0x1ca   :  { %1599 = vst.msk [vmem:[#allocation3 + $0xfc] sm:$0xf] %vm746_vm3, %v1507_v32  ;;  %7802 = vmatprep.mubr.msk.bf16.mxu0 %vm2100_vm4, %v8071_v61  ;;  %7313 = vmatpush3.bf16.msra.mxu1 %v8072_v24  ;;  %v955_v39 = vpop.permute.xlu0 %954  ;;  %v6672_v24 = vcombine.low %v9236_v55, %v9236_v55  ;;  %v812_v25 = vld [vmem:[#allocation2 + $0x80] sm:$0xf]  ;;  %v8106_v61 = vld [vmem:[%s10201_s4 + $0xe8] sm:$0xff]   ;;  %v8131_v55 = vld [vmem:[%s10201_s4 + $0x110] sm:$0xff]  }
 0x1cb   :  { %984 = vrot.lane.b32.xlu1 %v883_v29, %s8380_s21  ;;  %2872 = vmatprep.mubr.bf16.mxu1 %v8073_v33  ;;  %1043 = vst.msk [vmem:[#allocation3 + $0x144] sm:$0xf] %vm746_vm3, %v955_v39  ;;  %v1162_v29 = vld [vmem:[#allocation2 + $0x9c] sm:$0xf]  ;;  %v8121_v33 = vld [vmem:[%s10201_s4 + $0x100] sm:$0xff]   ;;  %v8110_v39 = vld [vmem:[%s10201_s4 + $0xf0] sm:$0xff]  }
 0x1cc   :  { %7314 = vmatprep.subr.bf16.mxu1 %v8076_v26  ;;  %7351 = vmatpush3.bf16.msra.mxu0 %v8081_v31  ;;  %v8100_v26 = vld [vmem:[#allocation3 + $0x11c] ss:$20 sps:$4 sm:$0xff]   ;;  %847 = vst.msk [vmem:[#allocation3 + $0x25c] sm:$0xf] %vm361_vm0, %v812_v25  ;;  %v813_v31 = vld [vmem:[#allocation2 + $0x84] sm:$0xf] }
 0x1cd   :  { %2873 = vmatmul.mubr.bf16.gmra.mrb[44].mxu1 %v8075_v34  ;;  %v957_v43 = vpop.permute.xlu1 %956  ;;  %705 = vrot.lane.b32.xlu0 %v603_v36, %s8380_s21  ;;  %848 = vst.msk [vmem:[#allocation3 + $0x270] sm:$0xf] %vm361_vm0, %v813_v31  ;;  %v886_v34 = vld [vmem:[#allocation2 + $0xa4] sm:$0xf]  ;;  %v8109_v36 = vld [vmem:[%s10201_s4 + $0xa8] sm:$0xff]  }
 0x1ce   :  { %1044 = vst.msk [vmem:[#allocation3 + $0x158] sm:$0xf] %vm746_vm3, %v957_v43  ;;  %7315 = vmatpush3.bf16.msra.mxu1 %v8077_v30  ;;  %7352 = vmatprep.subr.bf16.mxu0 %v8086_v37  ;;  %v1231_v53 = vpop.permute.xlu0 %1230  ;;  %v8104_v30 = vld [vmem:[%s10201_s4 + $0x38] sm:$0xff]   ;;  %v533_v37 = vld [vmem:[#allocation2 + $0x80] sm:$0xf]  ;;  %v8128_v43 = vld [vmem:[%s10201_s4 + $0x108] sm:$0xff]  }
 0x1cf   :  { %707 = vrot.lane.b32.xlu1 %v604_v41, %s8380_s21  ;;  %7316 = vmatprep.subr.bf16.mxu1 %v8078_v35  ;;  %1321 = vst.msk [vmem:[#allocation3 + $0x120] sm:$0xf] %vm746_vm3, %v1231_v53  ;;  %v1442_v35 = vld [vmem:[#allocation2 + $0xb4] sm:$0xf]  ;;  %v814_v53 = vld [vmem:[#allocation2 + $0x88] sm:$0xf] }
 0x1d0   :  { %7353 = vmatpush3.bf16.msra.mxu0 %v8090_v40  ;;  %568 = vst.msk [vmem:[#allocation3 + $0x280] sm:$0xf] %vm361_vm0, %v533_v37  ;;  %v1443_v40 = vld [vmem:[#allocation2 + $0xb8] sm:$0xf]  ;;  %v8111_v41 = vld [vmem:[%s10201_s4 + $0xb0] sm:$0xff]  }
 0x1d1   :  { %v1233_v57 = vpop.permute.xlu1 %1232  ;;  %986 = vrot.lane.b32.xlu0 %v884_v48, %s8380_s21  ;;  %v8082_v58 = vld [vmem:[#allocation3 + $0xe8] ss:$20 sps:$4 sm:$0xff]   ;;  %7803 = vmatmul.mubr.msk.bf16.gmra.mrb[72].mxu0 %vm2100_vm4, %v8088_v47  ;;  %v534_v47 = vld [vmem:[#allocation2 + $0x84] sm:$0xf]  ;;  %849 = vst.msk [vmem:[#allocation3 + $0x284] sm:$0xf] %vm361_vm0, %v814_v53 }
 0x1d2   :  { %1322 = vst.msk [vmem:[#allocation3 + $0x134] sm:$0xf] %vm746_vm3, %v1233_v57  ;;  %7317 = vmatpush3.bf16.msra.mxu1 %v8080_v42  ;;  %7354 = vmatprep.subr.bf16.mxu0 %v8092_v45  ;;  %v1511_v63 = vpop.permute.xlu0 %1510  ;;  %v8098_v42 = vld [vmem:[#allocation3 + $0x118] ss:$20 sps:$4 sm:$0xff]   ;;  %v1373_v37 = vld [vmem:[#allocation2 + $0xb4] sm:$0xf] }
 0x1d3   :  { %988 = vrot.lane.b32.xlu1 %v885_v54, %s8380_s21  ;;  %2880 = vmatprep.mubr.bf16.mxu1 %v8082_v58  ;;  %1601 = vst.msk [vmem:[#allocation3 + $0x124] sm:$0xf] %vm746_vm3, %v1511_v63  ;;  %v1444_v58 = vld [vmem:[#allocation2 + $0xbc] sm:$0xf]  ;;  %v3009_v63 = vld [vmem:[#allocation3 + $0x140] sm:$0xff] }
 0x1d4   :  { %7318 = vmatprep.subr.bf16.mxu1 %v8085_v49  ;;  %7355 = vmatpush3.bf16.msra.mxu0 %v8094_v50  ;;  %v8112_v49 = vld [vmem:[%s10201_s4 + $0xf8] sm:$0xff]   ;;  %569 = vst.msk [vmem:[#allocation3 + $0x294] sm:$0xf] %vm361_vm0, %v534_v47  ;;  %v1164_v50 = vld [vmem:[#allocation2 + $0xa4] sm:$0xf] }
 0x1d5   :  { %2881 = vmatmul.mubr.bf16.gmra.mrb[48].mxu1 %v8084_v59  ;;  %v680_v9 = vpop.permute.xlu1 %679  ;;  %1258 = vrot.lane.b32.xlu0 %v1160_v60, %s8380_s21  ;;  %v8107_v46 = vld [vmem:[#allocation3 + $0x144] ss:$20 sps:$4 sm:$0xff]   ;;  %1408 = vst.msk [vmem:[#allocation3 + $0x278] sm:$0xf] %vm361_vm0, %v1373_v37 }
 0x1d6   :  { %766 = vst.msk [vmem:[#allocation3 + $0x17c] sm:$0xf] %vm746_vm3, %v680_v9  ;;  %2888 = vmatprep.mubr.bf16.mxu1 %v6673_v4  ;;  %7319 = vmatpush3.bf16.msra.mxu1 %v8089_v62  ;;  %v678_v15 = vpop.permute.xlu0 %677  ;;  %v3012_v57 = vld [vmem:[#allocation3 + $0x154] sm:$0xff]  ;;  %v1090_v62 = vld [vmem:[#allocation2 + $0x90] sm:$0xf] }
 0x1d7   :  { %1260 = vrot.lane.b32.xlu1 %v1161_v5, %s8380_s21  ;;  %7320 = vmatprep.subr.bf16.mxu1 %v8091_v1  ;;  %765 = vst.msk [vmem:[#allocation3 + $0x168] sm:$0xf] %vm746_vm3, %v678_v15  ;;  %v8119_v59 = vld [vmem:[%s10201_s4 + $0x40] sm:$0xff]   ;;  %v6728_v5 = vcombine.low %v3009_v63, %v3012_v57  ;;  %v1370_v9 = vld [vmem:[#allocation2 + $0xa8] sm:$0xf] }
 0x1d8   :  { %7356 = vmatprep.subr.bf16.mxu0 %v8096_v7  ;;  %v1445_v1 = vld [vmem:[#allocation2 + $0xc0] sm:$0xf]  ;;  %1125 = vst.msk [vmem:[#allocation3 + $0x238] sm:$0xf] %vm361_vm0, %v1090_v62  ;;  %1405 = vst.msk [vmem:[#allocation3 + $0x23c] sm:$0xf] %vm361_vm0, %v1370_v9 }
 0x1d9   :  { %v961_v20 = vpop.permute.xlu1 %960  ;;  %1538 = vrot.lane.b32.xlu0 %v1440_v6, %s8380_s21  ;;  %7357 = vmatpush3.bf16.msra.mxu0 %v8101_v11  ;;  %v8120_v7 = vld [vmem:[%s10201_s4] sm:$0xff]   ;;  %v1652_v57 = vld [vmem:[#allocation2 + $0xb8] sm:$0xf]  ;;  %v1656_v63 = vld [vmem:[#allocation2 + $0xc8] sm:$0xf] }
 0x1da   :  { %1046 = vst.msk [vmem:[#allocation3 + $0x180] sm:$0xf] %vm746_vm3, %v961_v20  ;;  %7321 = vmatpush3.bf16.msra.mxu1 %v8093_v10  ;;  %7358 = vmatprep.subr.bf16.mxu0 %v8103_v14  ;;  %v959_v23 = vpop.permute.xlu0 %958  ;;  %v8116_v11 = vld [vmem:[#allocation3 + $0x120] ss:$20 sps:$4 sm:$0xff]   ;;  %v8129_v20 = vld [vmem:[%s10201_s4 + $0x50] sm:$0xff]  }
 0x1db   :  { %1540 = vrot.lane.b32.xlu1 %v1441_v13, %s8380_s21  ;;  %7322 = vmatprep.subr.bf16.mxu1 %v8095_v16  ;;  %1045 = vst.msk [vmem:[#allocation3 + $0x16c] sm:$0xf] %vm746_vm3, %v959_v23  ;;  %v8122_v13 = vld [vmem:[%s10201_s4 + $0x48] sm:$0xff]   ;;  %v1655_v62 = vld [vmem:[#allocation2 + $0xc4] sm:$0xf] }
 0x1dc   :  { %v1371_v14 = vld [vmem:[#allocation2 + $0xac] sm:$0xf]  ;;  %1687 = vst.msk [vmem:[#allocation3 + $0x268] sm:$0xf] %vm361_vm0, %v1652_v57  ;;  %1690 = vst.msk [vmem:[#allocation3 + $0x2a4] sm:$0xf] %vm361_vm0, %v1655_v62 }
 0x1dd   :  { %v1237_v28 = vpop.permute.xlu1 %1236  ;;  %2889 = vmatmul.mubr.bf16.gmra.mrb[52].mxu1 %v6672_v24  ;;  %709 = vrot.lane.b32.xlu0 %v605_v17, %s8380_s21  ;;  %v8124_v17 = vld [vmem:[%s10201_s4 + $0x8] sm:$0xff]   ;;  %1406 = vst.msk [vmem:[#allocation3 + $0x250] sm:$0xf] %vm361_vm0, %v1371_v14  ;;  %v1092_v24 = vld [vmem:[#allocation2 + $0x98] sm:$0xf] }
 0x1de   :  { %1324 = vst.msk [vmem:[#allocation3 + $0x15c] sm:$0xf] %vm746_vm3, %v1237_v28  ;;  %7323 = vmatpush3.bf16.msra.mxu1 %v8097_v18  ;;  %3455 = vmatprep.mubr.bf16.mxu1 %v8100_v26  ;;  %v1235_v32 = vpop.permute.xlu0 %1234  ;;  %v535_v18 = vld [vmem:[#allocation2 + $0x88] sm:$0xf]  ;;  %v8143_v28 = vld [vmem:[%s10201_s4 + $0xc0] sm:$0xff]   ;;  %v8156_v14 = vld [vmem:[%s10201_s4 + $0x78] sm:$0xff]  }
 0x1df   :  { %1264 = vrot.lane.b32.xlu1 %v1163_v27, %s8380_s21  ;;  %7324 = vmatprep.subr.bf16.mxu1 %v8102_v21  ;;  %1323 = vst.msk [vmem:[#allocation3 + $0x148] sm:$0xf] %vm746_vm3, %v1235_v32  ;;  %v8130_v27 = vld [vmem:[%s10201_s4 + $0x10] sm:$0xff]   ;;  %v8144_v9 = vld [vmem:[#allocation3 + $0x178] ss:$20 sps:$4 sm:$0xff]  }
 0x1e0   :  { %7359 = vmatpush3.bf16.msra.mxu0 %v8105_v22  ;;  %570 = vst.msk [vmem:[#allocation3 + $0x2a8] sm:$0xf] %vm361_vm0, %v535_v18  ;;  %v1093_v22 = vld [vmem:[#allocation2 + $0x9c] sm:$0xf]  ;;  %1127 = vst.msk [vmem:[#allocation3 + $0x260] sm:$0xf] %vm361_vm0, %v1092_v24 }
 0x1e1   :  { %v963_v38 = vpop.permute.xlu1 %962  ;;  %1262 = vrot.lane.b32.xlu0 %v1162_v29, %s8380_s21  ;;  %7360 = vmatprep.subr.bf16.mxu0 %v8106_v61  ;;  %v3018_v23 = vld [vmem:[#allocation3 + $0x17c] sm:$0xff]  ;;  %1128 = vst.msk [vmem:[#allocation3 + $0x274] sm:$0xf] %vm361_vm0, %v1093_v22  ;;  %v816_v29 = vld [vmem:[#allocation2 + $0x90] sm:$0xf]  ;;  %v8173_v22 = vld [vmem:[%s10201_s4 + $0x100] sm:$0xff]  }
 0x1e2   :  { %1047 = vst.msk [vmem:[#allocation3 + $0x194] sm:$0xf] %vm746_vm3, %v963_v38  ;;  %7325 = vmatpush3.bf16.msra.mxu1 %v8104_v30  ;;  %v682_v45 = vpop.permute.xlu0 %681  ;;  %v8113_v6 = vld [vmem:[#allocation3 + $0x16c] ss:$20 sps:$4 sm:$0xff]   ;;  %v1094_v38 = vld [vmem:[#allocation2 + $0xa0] sm:$0xf] }
 0x1e3   :  { %990 = vrot.lane.b32.xlu1 %v886_v34, %s8380_s21  ;;  %7806 = vmatprep.subr.bf16.mxu1 %v8121_v33  ;;  %767 = vst.msk [vmem:[#allocation3 + $0x190] sm:$0xf] %vm746_vm3, %v682_v45  ;;  %v3015_v15 = vld [vmem:[#allocation3 + $0x168] sm:$0xff]  ;;  %v1372_v34 = vld [vmem:[#allocation2 + $0xb0] sm:$0xf] }
 0x1e4   :  { %7361 = vmatpush3.bf16.msra.mxu0 %v8109_v36  ;;  %v6733_v26 = vcombine.low %v3015_v15, %v3018_v23  ;;  %851 = vst.msk [vmem:[#allocation3 + $0x2ac] sm:$0xf] %vm361_vm0, %v816_v29  ;;  %v8134_v36 = vld [vmem:[%s10201_s4 + $0x18] sm:$0xff]   ;;  %1407 = vst.msk [vmem:[#allocation3 + $0x264] sm:$0xf] %vm361_vm0, %v1372_v34  ;;  %v8157_v15 = vld [vmem:[%s10201_s4 + $0xd0] sm:$0xff]  }
 0x1e5   :  { %3456 = vmatmul.mubr.bf16.vlgmr.msra.gmra.mrb[56].mxu1 %v8098_v42  ;;  %v1513_v48 = vpop.permute.xlu1 %1512  ;;  %1542 = vrot.lane.b32.xlu0 %v1442_v35, %s8380_s21  ;;  %1129 = vst.msk [vmem:[#allocation3 + $0x288] sm:$0xf] %vm361_vm0, %v1094_v38  ;;  %v1095_v42 = vld [vmem:[#allocation2 + $0xa4] sm:$0xf]  ;;  %v8133_v45 = vld [vmem:[#allocation3 + $0x128] ss:$20 sps:$4 sm:$0xff]  }
 0x1e6   :  { %1602 = vst.msk [vmem:[#allocation3 + $0x138] sm:$0xf] %vm746_vm3, %v1513_v48  ;;  %3463 = vmatprep.mubr.bf16.mxu1 %v8107_v46  ;;  %7362 = vmatprep.subr.bf16.mxu0 %v8110_v39  ;;  %v1239_v54 = vpop.permute.xlu0 %1238  ;;  %v8127_v32 = vld [vmem:[#allocation3 + $0x148] ss:$20 sps:$4 sm:$0xff]   ;;  %v1374_v46 = vld [vmem:[#allocation2 + $0xb8] sm:$0xf] }
 0x1e7   :  { %1544 = vrot.lane.b32.xlu1 %v1443_v40, %s8380_s21  ;;  %7807 = vmatpush3.bf16.msra.mxu1 %v8121_v33  ;;  %1325 = vst.msk [vmem:[#allocation3 + $0x170] sm:$0xf] %vm746_vm3, %v1239_v54  ;;  %v8132_v33 = vld [vmem:[%s10201_s4 + $0x58] sm:$0xff]   ;;  %v8139_v40 = vld [vmem:[%s10201_s4 + $0x60] sm:$0xff]  }
 0x1e8   :  { %7363 = vmatpush3.bf16.msra.mxu0 %v8111_v41  ;;  %7808 = vmatprep.subr.bf16.mxu1 %v8128_v43  ;;  %1130 = vst.msk [vmem:[#allocation3 + $0x29c] sm:$0xf] %vm361_vm0, %v1095_v42  ;;  %v8140_v48 = vld [vmem:[%s10201_s4 + $0x20] sm:$0xff]   ;;  %1409 = vst.msk [vmem:[#allocation3 + $0x28c] sm:$0xf] %vm361_vm0, %v1374_v46  ;;  %v8160_v24 = vld [vmem:[%s10201_s4 + $0xd8] sm:$0xff]  }
 0x1e9   :  { %v1241_v60 = vpop.permute.xlu1 %1240  ;;  %1266 = vrot.lane.b32.xlu0 %v1164_v50, %s8380_s21  ;;  %7364 = vmatprep.subr.bf16.mxu0 %v8112_v49  ;;  %v1375_v49 = vld [vmem:[#allocation2 + $0xbc] sm:$0xf]  ;;  %v8142_v50 = vld [vmem:[%s10201_s4 + $0x68] sm:$0xff]   ;;  %1691 = vst.msk [vmem:[#allocation3 + $0x2b8] sm:$0xf] %vm361_vm0, %v1656_v63  ;;  %v8170_v46 = vld [vmem:[%s10201_s4 + $0xf0] sm:$0xff]  }
 0x1ea   :  { %1326 = vst.msk [vmem:[#allocation3 + $0x184] sm:$0xf] %vm746_vm3, %v1241_v60  ;;  %v1515_v4 = vpop.permute.xlu0 %1514  ;;  %v3021_v19 = vld [vmem:[#allocation3 + $0x190] sm:$0xff] }
 0x1eb   :  { %1268 = vrot.lane.b32.xlu1 %v1165_v51, %s8380_s21  ;;  %7809 = vmatpush3.bf16.msra.mxu1 %v8128_v43  ;;  %1603 = vst.msk [vmem:[#allocation3 + $0x14c] sm:$0xf] %vm746_vm3, %v1515_v4  ;;  %v6739_v61 = vcombine.high %v3021_v19, %v3021_v19  ;;  %v6738_v47 = vcombine.low %v3021_v19, %v3021_v19  ;;  %v1654_v60 = vld [vmem:[#allocation2 + $0xc0] sm:$0xf]  ;;  %v8141_v4 = vld [vmem:[#allocation3 + $0x150] ss:$20 sps:$4 sm:$0xff]  }
 0x1ec   :  { %7365 = vmatpush3.bf16.msra.mxu0 %v8115_v52  ;;  %7810 = vmatprep.subr.bf16.mxu1 %v8131_v55  ;;  %1410 = vst.msk [vmem:[#allocation3 + $0x2a0] sm:$0xf] %vm361_vm0, %v1375_v49  ;;  %1689 = vst.msk [vmem:[#allocation3 + $0x290] sm:$0xf] %vm361_vm0, %v1654_v60  ;;  %v8155_v19 = vld [vmem:[#allocation3 + $0x1a0] ss:$0 sps:$4 sm:$0xff]  }
 0x1ed   :  { %3464 = vmatmul.mubr.bf16.gmra.mrb[60].mxu1 %v6728_v5  ;;  %v1517_v10 = vpop.permute.xlu1 %1516  ;;  %1546 = vrot.lane.b32.xlu0 %v1444_v58, %s8380_s21  ;;  %v8118_v12 = vld [vmem:[#allocation3 + $0x124] ss:$20 sps:$4 sm:$0xff]  }
 0x1ee   :  { %1604 = vst.msk [vmem:[#allocation3 + $0x160] sm:$0xf] %vm746_vm3, %v1517_v10  ;;  %3471 = vmatprep.mubr.bf16.mxu1 %v8113_v6  ;;  %7398 = vmatprep.subr.bf16.mxu0 %v8119_v59  ;;  %v1243_v16 = vpop.permute.xlu0 %1242  ;;  %v1653_v59 = vld [vmem:[#allocation2 + $0xbc] sm:$0xf]  ;;  %v8146_v5 = vld [vmem:[%s10201_s4 + $0x80] sm:$0xff]  }
 0x1ef   :  { %1548 = vrot.lane.b32.xlu1 %v1445_v1, %s8380_s21  ;;  %3519 = vmatprep.mubr.bf16.mxu0 %v8118_v12  ;;  %1327 = vst.msk [vmem:[#allocation3 + $0x198] sm:$0xf] %vm746_vm3, %v1243_v16 }
 0x1f0   :  { %3520 = vmatmul.mubr.bf16.vlgmr.msra.gmra.mrb[76].mxu0 %v8116_v11  ;;  %7811 = vmatpush3.bf16.msra.mxu1 %v8131_v55  ;;  %v1650_v55 = vld [vmem:[#allocation2 + $0xb0] sm:$0xf]  ;;  %1688 = vst.msk [vmem:[#allocation3 + $0x27c] sm:$0xf] %vm361_vm0, %v1653_v59 }
 0x1f1   :  { %v1523_v21 = vpop.permute.xlu1 %1522  ;;  %7399 = vmatpush3.bf16.msra.mxu0 %v8120_v7  ;;  %7812 = vmatprep.subr.bf16.mxu1 %v8138_v8  ;;  %v8137_v53 = vld [vmem:[#allocation3 + $0x170] ss:$20 sps:$4 sm:$0xff]   ;;  %1685 = vst.msk [vmem:[#allocation3 + $0x240] sm:$0xf] %vm361_vm0, %v1650_v55 }
 0x1f2   :  { %1607 = vst.msk [vmem:[#allocation3 + $0x19c] sm:$0xf] %vm746_vm3, %v1523_v21  ;;  %7400 = vmatprep.subr.bf16.mxu0 %v8122_v13  ;;  %v1519_v25 = vpop.permute.xlu0 %1518  ;;  %v8148_v7 = vld [vmem:[%s10201_s4 + $0x70] sm:$0xff]   ;;  %v8154_v13 = vld [vmem:[%s10201_s4 + $0x88] sm:$0xff]   ;;  %v8175_v55 = vld [vmem:[%s10201_s4 + $0xb8] sm:$0xff]  }
 0x1f3   :  { %1605 = vst.msk [vmem:[#allocation3 + $0x174] sm:$0xf] %vm746_vm3, %v1519_v25  ;;  %v8150_v11 = vld [vmem:[%s10201_s4 + $0x30] sm:$0xff]  }
 0x1f4   :  { %7813 = vmatpush3.bf16.msra.mxu1 %v8138_v8  ;;  %v8149_v8 = vld [vmem:[%s10201_s4 + $0xc8] sm:$0xff]   ;;  %v8159_v21 = vld [vmem:[%s10201_s4 + $0x90] sm:$0xff]  }
 0x1f5   :  { %3472 = vmatmul.mubr.bf16.gmra.mrb[64].mxu1 %v6733_v26  ;;  %v1521_v30 = vpop.permute.xlu1 %1520  ;;  %7401 = vmatpush3.bf16.msra.mxu0 %v8124_v17  ;;  %v8125_v31 = vld [vmem:[#allocation3 + $0x14c] ss:$20 sps:$4 sm:$0xff]  }
 0x1f6   :  { %1606 = vst.msk [vmem:[#allocation3 + $0x188] sm:$0xf] %vm746_vm3, %v1521_v30  ;;  %3479 = vmatprep.mubr.bf16.mxu1 %v6739_v61  ;;  %7402 = vmatprep.subr.bf16.mxu0 %v8129_v20  ;;  %v684_v35 = vpop.permute.xlu0 %683  ;;  %v8158_v20 = vld [vmem:[%s10201_s4 + $0x38] sm:$0xff]   ;;  %v8164_v30 = vld [vmem:[%s10201_s4 + $0xe0] sm:$0xff]  }
 0x1f7   :  { %3527 = vmatprep.mubr.bf16.mxu0 %v8125_v31  ;;  %7438 = vmatprep.subr.bf16.mxu1 %v8143_v28  ;;  %768 = vst.msk [vmem:[#allocation3 + $0x1a4] sm:$0xf] %vm746_vm3, %v684_v35  ;;  %v8179_v28 = vld [vmem:[%s10201_s4 + $0x108] sm:$0xff]  }
 0x1f8   :  { %3528 = vmatmul.mubr.bf16.gmra.mrb[80].mxu0 %v8127_v32  ;;  %v8165_v32 = vld [vmem:[%s10201_s4 + $0xa0] sm:$0xff]  }
 0x1f9   :  { %v686_v39 = vpop.permute.xlu1 %685  ;;  %7403 = vmatpush3.bf16.msra.mxu0 %v8130_v27  ;;  %v9393_v41 = vld [vmem:[#allocation3 + $0x198] sm:$0xff]  ;;  %v8163_v27 = vld [vmem:[%s10201_s4 + $0x98] sm:$0xff]  }
 0x1fa   :  { %769 = vst.msk [vmem:[#allocation3 + $0x1b8] sm:$0xf] %vm746_vm3, %v686_v39  ;;  %7404 = vmatprep.subr.bf16.mxu0 %v8132_v33  ;;  %v965_v43 = vpop.permute.xlu0 %964  ;;  %v6741_v54 = vcombine.high %v9393_v41, %v9393_v41  ;;  %v6740_v10 = vcombine.low %v9393_v41, %v9393_v41  ;;  %v8182_v33 = vld [vmem:[%s10201_s4 + $0x110] sm:$0xff]   ;;  %v8189_v41 = vld [vmem:[%s10201_s4 + $0x118] sm:$0xff]  }
 0x1fb   :  { %1048 = vst.msk [vmem:[#allocation3 + $0x1a8] sm:$0xf] %vm746_vm3, %v965_v43 }
 0x1fd   :  { %3480 = vmatmul.mubr.bf16.gmra.mrb[68].mxu1 %v6738_v47  ;;  %v967_v51 = vpop.permute.xlu1 %966  ;;  %7405 = vmatpush3.bf16.msra.mxu0 %v8134_v36  ;;  %v8135_v52 = vld [vmem:[#allocation3 + $0x174] ss:$20 sps:$4 sm:$0xff]   ;;  %v8166_v36 = vld [vmem:[%s10201_s4 + $0xe8] sm:$0xff]  }
 0x1fe   :  { %1049 = vst.msk [vmem:[#allocation3 + $0x1bc] sm:$0xf] %vm746_vm3, %v967_v51  ;;  %7814 = vmatprep.mubr.msk.bf16.mxu1 %vm2100_vm4, %v8133_v45  ;;  %7406 = vmatprep.subr.bf16.mxu0 %v8139_v40  ;;  %v688_v58 = vpop.permute.xlu0 %687  ;;  %v8169_v40 = vld [vmem:[%s10201_s4 + $0xa8] sm:$0xff]   ;;  %v8171_v47 = vld [vmem:[%s10201_s4 + $0xb0] sm:$0xff]   ;;  %v8172_v51 = vld [vmem:[%s10201_s4 + $0xf8] sm:$0xff]  }
 0x1ff   :  { %3535 = vmatprep.mubr.bf16.mxu0 %v8135_v52  ;;  %770 = vst.msk [vmem:[#allocation3 + $0x1cc] sm:$0xf] %vm746_vm3, %v688_v58  ;;  %v8180_v58 = vld [vmem:[%s10201_s4 + $0x40] sm:$0xff]  }
 0x200   :  { %3536 = vmatmul.mubr.bf16.gmra.mrb[84].mxu0 %v8137_v53 }
 0x201   :  { %v690_v1 = vpop.permute.xlu1 %689  ;;  %7407 = vmatpush3.bf16.msra.mxu0 %v8140_v48  ;;  %3543 = vmatprep.mubr.bf16.mxu0 %v6741_v54  ;;  %v8151_v26 = vld [vmem:[#allocation3 + $0x1a4] ss:$20 sps:$4 sm:$0xff]  }
 0x202   :  { %771 = vst.msk [vmem:[#allocation3 + $0x1e0] sm:$0xf] %vm746_vm3, %v690_v1  ;;  %7408 = vmatprep.subr.bf16.mxu0 %v8142_v50  ;;  %v969_v6 = vpop.permute.xlu0 %968  ;;  %v8203_v48 = vld [vmem:[%s10201_s4 + $0xc0] sm:$0xff]  }
 0x203   :  { %1050 = vst.msk [vmem:[#allocation3 + $0x1d0] sm:$0xf] %vm746_vm3, %v969_v6  ;;  %v8181_v1 = vld [vmem:[%s10201_s4] sm:$0xff]  }
 0x205   :  { %7815 = vmatmul.mubr.msk.bf16.vlgmr.msra.gmra.mrb[72].mxu1 %vm2100_vm4, %v8141_v4  ;;  %v971_v12 = vpop.permute.xlu1 %970  ;;  %7409 = vmatpush3.bf16.msra.mxu0 %v8145_v3  ;;  %v8153_v17 = vld [vmem:[#allocation3 + $0x1a8] ss:$20 sps:$4 sm:$0xff]  }
 0x206   :  { %1051 = vst.msk [vmem:[#allocation3 + $0x1e4] sm:$0xf] %vm746_vm3, %v971_v12  ;;  %7818 = vmatprep.mubr.msk.bf16.mxu1 %vm2100_vm4, %v8144_v9  ;;  %7439 = vmatpush3.bf16.msra.mxu1 %v8146_v5  ;;  %v692_v16 = vpop.permute.xlu0 %691  ;;  %v8183_v4 = vld [vmem:[%s10201_s4 + $0x48] sm:$0xff]   ;;  %v8184_v9 = vld [vmem:[#allocation3 + $0x1b4] ss:$20 sps:$4 sm:$0xff]  }
 0x207   :  { %7410 = vmatprep.subr.bf16.mxu0 %v8148_v7  ;;  %7440 = vmatprep.subr.bf16.mxu1 %v8149_v8  ;;  %772 = vst.msk [vmem:[#allocation3 + $0x1f4] sm:$0xf] %vm746_vm3, %v692_v16  ;;  %v8185_v7 = vld [vmem:[%s10201_s4 + $0x8] sm:$0xff]   ;;  %v8193_v16 = vld [vmem:[%s10201_s4 + $0x58] sm:$0xff]  }
 0x208   :  { %3544 = vmatmul.mubr.bf16.gmra.mrb[88].mxu0 %v6740_v10  ;;  %v8190_v10 = vld [vmem:[%s10201_s4 + $0x50] sm:$0xff]  }
 0x209   :  { %v694_v18 = vpop.permute.xlu1 %693  ;;  %7411 = vmatpush3.bf16.msra.mxu0 %v8150_v11  ;;  %4110 = vmatprep.mubr.bf16.mxu0 %v8153_v17 }
 0x20a   :  { %773 = vst.msk [vmem:[#allocation3 + $0x208] sm:$0xf] %vm746_vm3, %v694_v18  ;;  %7441 = vmatpush3.bf16.msra.mxu1 %v8154_v13  ;;  %7412 = vmatprep.subr.bf16.mxu0 %v8156_v14  ;;  %v973_v23 = vpop.permute.xlu0 %972  ;;  %v3664_v37 = vld [vmem:[#allocation3 + $0x1cc] sm:$0xff]  ;;  %v8191_v14 = vld [vmem:[%s10201_s4 + $0x10] sm:$0xff]   ;;  %v8205_v18 = vld [vmem:[%s10201_s4 + $0x80] sm:$0xff]  }
 0x20b   :  { %7442 = vmatprep.subr.bf16.mxu1 %v8157_v15  ;;  %1052 = vst.msk [vmem:[#allocation3 + $0x1f8] sm:$0xf] %vm746_vm3, %v973_v23  ;;  %v8194_v23 = vld [vmem:[#allocation3 + $0x204] ss:$20 sps:$4 sm:$0xff]  }
 0x20d   :  { %7819 = vmatmul.mubr.msk.bf16.gmra.mrb[76].mxu1 %vm2100_vm4, %v8155_v19  ;;  %v975_v25 = vpop.permute.xlu1 %974  ;;  %7413 = vmatpush3.bf16.msra.mxu0 %v8158_v20  ;;  %v8161_v29 = vld [vmem:[#allocation3 + $0x1d0] ss:$20 sps:$4 sm:$0xff]  }
 0x20e   :  { %1053 = vst.msk [vmem:[#allocation3 + $0x20c] sm:$0xf] %vm746_vm3, %v975_v25  ;;  %7443 = vmatpush3.bf16.msra.mxu1 %v8159_v21  ;;  %7822 = vmatprep.subr.bf16.mxu0 %v8173_v22  ;;  %v1245_v61 = vpop.permute.xlu0 %1244  ;;  %v3667_v34 = vld [vmem:[#allocation3 + $0x1e0] sm:$0xff]  ;;  %v8192_v19 = vld [vmem:[#allocation3 + $0x1dc] ss:$20 sps:$4 sm:$0xff]  }
 0x20f   :  { %7444 = vmatprep.subr.bf16.mxu1 %v8160_v24  ;;  %1328 = vst.msk [vmem:[#allocation3 + $0x1ac] sm:$0xf] %vm746_vm3, %v1245_v61  ;;  %v6796_v39 = vcombine.low %v3664_v37, %v3667_v34  ;;  %v8195_v20 = vld [vmem:[%s10201_s4 + $0x18] sm:$0xff]   ;;  %v8208_v21 = vld [vmem:[%s10201_s4 + $0xc8] sm:$0xff]   ;;  %v8199_v24 = vld [vmem:[%s10201_s4 + $0x60] sm:$0xff]  }
 0x210   :  { %4111 = vmatmul.mubr.bf16.vlgmr.msra.gmra.mrb[92].mxu0 %v8151_v26  ;;  %v8210_v25 = vld [vmem:[%s10201_s4 + $0x88] sm:$0xff]   ;;  %v8200_v61 = vld [vmem:[%s10201_s4 + $0x20] sm:$0xff]  }
 0x211   :  { %v1247_v31 = vpop.permute.xlu1 %1246  ;;  %4118 = vmatprep.mubr.bf16.mxu0 %v8161_v29  ;;  %7823 = vmatpush3.bf16.msra.mxu0 %v8173_v22  ;;  %v8215_v29 = vld [vmem:[%s10201_s4 + $0xd0] sm:$0xff]  }
 0x212   :  { %1329 = vst.msk [vmem:[#allocation3 + $0x1c0] sm:$0xf] %vm746_vm3, %v1247_v31  ;;  %7445 = vmatpush3.bf16.msra.mxu1 %v8163_v27  ;;  %7824 = vmatprep.subr.bf16.mxu0 %v8179_v28  ;;  %v1525_v35 = vpop.permute.xlu0 %1524  ;;  %v3670_v52 = vld [vmem:[#allocation3 + $0x1f4] sm:$0xff]  ;;  %v8202_v31 = vld [vmem:[%s10201_s4 + $0x68] sm:$0xff]  }
 0x213   :  { %7446 = vmatprep.subr.bf16.mxu1 %v8164_v30  ;;  %1608 = vst.msk [vmem:[#allocation3 + $0x1b0] sm:$0xf] %vm746_vm3, %v1525_v35  ;;  %v8217_v35 = vld [vmem:[%s10201_s4 + $0x90] sm:$0xff]  }
 0x215   :  { %v977_v38 = vpop.permute.xlu1 %976  ;;  %7825 = vmatpush3.bf16.msra.mxu0 %v8179_v28  ;;  %v8167_v45 = vld [vmem:[#allocation3 + $0x1f8] ss:$20 sps:$4 sm:$0xff]  }
 0x216   :  { %1054 = vst.msk [vmem:[#allocation3 + $0x220] sm:$0xf] %vm746_vm3, %v977_v38  ;;  %7447 = vmatpush3.bf16.msra.mxu1 %v8165_v32  ;;  %7826 = vmatprep.subr.bf16.mxu0 %v8182_v33  ;;  %v696_v42 = vpop.permute.xlu0 %695  ;;  %v3673_v49 = vld [vmem:[#allocation3 + $0x208] sm:$0xff] }
 0x217   :  { %7448 = vmatprep.subr.bf16.mxu1 %v8166_v36  ;;  %774 = vst.msk [vmem:[#allocation3 + $0x21c] sm:$0xf] %vm746_vm3, %v696_v42  ;;  %v6801_v54 = vcombine.low %v3670_v52, %v3673_v49  ;;  %v8201_v32 = vld [vmem:[#allocation3 + $0x22c] ss:$0 sps:$4 sm:$0xff]   ;;  %v8204_v36 = vld [vmem:[%s10201_s4 + $0x28] sm:$0xff]  }
 0x218   :  { %4119 = vmatmul.mubr.bf16.gmra.mrb[96].mxu0 %v6796_v39  ;;  %v8218_v38 = vld [vmem:[%s10201_s4 + $0xd8] sm:$0xff]  }
 0x219   :  { %v1527_v43 = vpop.permute.xlu1 %1526  ;;  %4126 = vmatprep.mubr.bf16.mxu0 %v8167_v45  ;;  %7827 = vmatpush3.bf16.msra.mxu0 %v8182_v33  ;;  %v8176_v62 = vld [vmem:[#allocation3 + $0x1ac] ss:$20 sps:$4 sm:$0xff]  }
 0x21a   :  { %1609 = vst.msk [vmem:[#allocation3 + $0x1c4] sm:$0xf] %vm746_vm3, %v1527_v43  ;;  %7449 = vmatpush3.bf16.msra.mxu1 %v8169_v40  ;;  %7828 = vmatprep.subr.bf16.mxu0 %v8189_v41  ;;  %v8207_v40 = vld [vmem:[%s10201_s4 + $0x70] sm:$0xff]   ;;  %v8219_v45 = vld [vmem:[%s10201_s4 + $0x98] sm:$0xff]   ;;  %v8222_v43 = vld [vmem:[%s10201_s4 + $0xe0] sm:$0xff]  }
 0x21b   :  { %v1249_v50 = vpop.permute.xlu0 %1248  ;;  %7450 = vmatprep.subr.bf16.mxu1 %v8170_v46  ;;  %v8209_v46 = vld [vmem:[%s10201_s4 + $0x30] sm:$0xff]   ;;  %v8216_v52 = vld [vmem:[%s10201_s4 + $0x38] sm:$0xff]  }
 0x21c   :  { %1330 = vst.msk [vmem:[#allocation3 + $0x1d4] sm:$0xf] %vm746_vm3, %v1249_v50 }
 0x21d   :  { %v1251_v53 = vpop.permute.xlu1 %1250  ;;  %7829 = vmatpush3.bf16.msra.mxu0 %v8189_v41 }
 0x21e   :  { %1331 = vst.msk [vmem:[#allocation3 + $0x1e8] sm:$0xf] %vm746_vm3, %v1251_v53  ;;  %7451 = vmatpush3.bf16.msra.mxu1 %v8171_v47  ;;  %7526 = vmatprep.subr.bf16.mxu0 %v8203_v48  ;;  %v3676_v57 = vld [vmem:[#allocation3 + $0x21c] sm:$0xff]  ;;  %v8214_v48 = vld [vmem:[%s10201_s4 + $0x78] sm:$0xff]  }
 0x21f   :  { %v1529_v56 = vpop.permute.xlu0 %1528  ;;  %7452 = vmatprep.subr.bf16.mxu1 %v8172_v51  ;;  %v6807_v59 = vcombine.high %v3676_v57, %v3676_v57  ;;  %v6806_v6 = vcombine.low %v3676_v57, %v3676_v57  ;;  %v8223_v51 = vld [vmem:[%s10201_s4 + $0xa0] sm:$0xff]   ;;  %v8224_v53 = vld [vmem:[%s10201_s4 + $0xe8] sm:$0xff]  }
 0x220   :  { %1610 = vst.msk [vmem:[#allocation3 + $0x1d8] sm:$0xf] %vm746_vm3, %v1529_v56  ;;  %4127 = vmatmul.mubr.bf16.gmra.mrb[100].mxu0 %v6801_v54  ;;  %v8235_v56 = vld [vmem:[%s10201_s4 + $0x100] sm:$0xff]  }
 0x221   :  { %v1531_v60 = vpop.permute.xlu1 %1530  ;;  %v8178_v63 = vld [vmem:[#allocation3 + $0x1b0] ss:$20 sps:$4 sm:$0xff]   ;;  %4134 = vmatprep.mubr.bf16.mxu0 %v6807_v59 }
 0x222   :  { %1611 = vst.msk [vmem:[#allocation3 + $0x1ec] sm:$0xf] %vm746_vm3, %v1531_v60  ;;  %7453 = vmatpush3.bf16.msra.mxu1 %v8175_v55  ;;  %4174 = vmatprep.mubr.bf16.mxu1 %v8178_v63 }
 0x223   :  { %v1253_v3 = vpop.permute.xlu0 %1252  ;;  %7486 = vmatprep.subr.bf16.mxu1 %v8180_v58 }
 0x224   :  { %1332 = vst.msk [vmem:[#allocation3 + $0x1fc] sm:$0xf] %vm746_vm3, %v1253_v3 }
 0x225   :  { %4175 = vmatmul.mubr.bf16.vlgmr.msra.gmra.mrb[80].mxu1 %v8176_v62  ;;  %v1255_v5 = vpop.permute.xlu1 %1254  ;;  %v8188_v13 = vld [vmem:[#allocation3 + $0x1d4] ss:$20 sps:$4 sm:$0xff]   ;;  %v8225_v62 = vld [vmem:[%s10201_s4 + $0xa8] sm:$0xff]  }
 0x226   :  { %1333 = vst.msk [vmem:[#allocation3 + $0x210] sm:$0xf] %vm746_vm3, %v1255_v5  ;;  %7487 = vmatpush3.bf16.msra.mxu1 %v8181_v1  ;;  %v8228_v1 = vld [vmem:[%s10201_s4 + $0xf0] sm:$0xff]  }
 0x227   :  { %v1533_v8 = vpop.permute.xlu0 %1532  ;;  %7488 = vmatprep.subr.bf16.mxu1 %v8183_v4 }
 0x228   :  { %1612 = vst.msk [vmem:[#allocation3 + $0x200] sm:$0xf] %vm746_vm3, %v1533_v8  ;;  %4135 = vmatmul.mubr.bf16.gmra.mrb[104].mxu0 %v6806_v6  ;;  %v8236_v6 = vld [vmem:[%s10201_s4 + $0x108] sm:$0xff]  }
 0x229   :  { %v1535_v11 = vpop.permute.xlu1 %1534  ;;  %7830 = vmatprep.mubr.msk.bf16.mxu0 %vm2100_vm4, %v8184_v9  ;;  %v8186_v12 = vld [vmem:[#allocation3 + $0x1d8] ss:$20 sps:$4 sm:$0xff]   ;;  %v8229_v9 = vld [vmem:[%s10201_s4 + $0xb0] sm:$0xff]  }
 0x22a   :  { %1613 = vst.msk [vmem:[#allocation3 + $0x214] sm:$0xf] %vm746_vm3, %v1535_v11  ;;  %7489 = vmatpush3.bf16.msra.mxu1 %v8185_v7  ;;  %4182 = vmatprep.mubr.bf16.mxu1 %v8186_v12 }
 0x22b   :  { %v1257_v15 = vpop.permute.xlu0 %1256  ;;  %7490 = vmatprep.subr.bf16.mxu1 %v8190_v10  ;;  %v8230_v10 = vld [vmem:[%s10201_s4 + $0xf8] sm:$0xff]  }
 0x22c   :  { %1334 = vst.msk [vmem:[#allocation3 + $0x224] sm:$0xf] %vm746_vm3, %v1257_v15 }
 0x22d   :  { %4183 = vmatmul.mubr.bf16.gmra.mrb[84].mxu1 %v8188_v13  ;;  %v1537_v17 = vpop.permute.xlu1 %1536  ;;  %v8198_v28 = vld [vmem:[#allocation3 + $0x1fc] ss:$20 sps:$4 sm:$0xff]   ;;  %v8239_v13 = vld [vmem:[%s10201_s4 + $0x110] sm:$0xff]  }
 0x22e   :  { %1614 = vst.msk [vmem:[#allocation3 + $0x228] sm:$0xf] %vm746_vm3, %v1537_v17  ;;  %7491 = vmatpush3.bf16.msra.mxu1 %v8191_v14 }
 0x22f   :  { %v698_v22 = vpop.permute.xlu0 %697  ;;  %7492 = vmatprep.subr.bf16.mxu1 %v8193_v16 }
 0x230   :  { %775 = vst.msk [vmem:[#allocation3 + $0x230] sm:$0xf] %vm746_vm3, %v698_v22  ;;  %7831 = vmatmul.mubr.msk.bf16.vlgmr.msra.gmra.mrb[108].mxu0 %vm2100_vm4, %v8192_v19  ;;  %v8231_v19 = vld [vmem:[%s10201_s4 + $0xb8] sm:$0xff]  }
 0x231   :  { %v700_v26 = vpop.permute.xlu1 %699  ;;  %7834 = vmatprep.mubr.msk.bf16.mxu0 %vm2100_vm4, %v8194_v23  ;;  %v8196_v27 = vld [vmem:[#allocation3 + $0x200] ss:$20 sps:$4 sm:$0xff]   ;;  %7527 = vmatpush3.bf16.msra.mxu0 %v8205_v18 }
 0x232   :  { %776 = vst.msk [vmem:[#allocation3 + $0x244] sm:$0xf] %vm746_vm3, %v700_v26  ;;  %7493 = vmatpush3.bf16.msra.mxu1 %v8195_v20  ;;  %7528 = vmatprep.subr.bf16.mxu0 %v8208_v21 }
 0x233   :  { %v979_v30 = vpop.permute.xlu0 %978  ;;  %4190 = vmatprep.mubr.bf16.mxu1 %v8196_v27  ;;  %7494 = vmatprep.subr.bf16.mxu1 %v8199_v24 }
 0x234   :  { %1055 = vst.msk [vmem:[#allocation3 + $0x234] sm:$0xf] %vm746_vm3, %v979_v30 }
 0x235   :  { %4191 = vmatmul.mubr.bf16.gmra.mrb[88].mxu1 %v8198_v28  ;;  %v981_v33 = vpop.permute.xlu1 %980  ;;  %v3677_v34 = vld [vmem:[#allocation3 + $0x224] sm:$0xff]  ;;  %7529 = vmatpush3.bf16.msra.mxu0 %v8210_v25  ;;  %v8243_v25 = vld [vmem:[%s10201_s4 + $0x118] sm:$0xff]  }
 0x236   :  { %1056 = vst.msk [vmem:[#allocation3 + $0x248] sm:$0xf] %vm746_vm3, %v981_v33  ;;  %7495 = vmatpush3.bf16.msra.mxu1 %v8200_v61  ;;  %v6809_v37 = vcombine.high %v3677_v34, %v3677_v34  ;;  %7530 = vmatprep.subr.bf16.mxu0 %v8215_v29  ;;  %v6808_v42 = vcombine.low %v3677_v34, %v3677_v34 }
 0x237   :  { %v702_v39 = vpop.permute.xlu0 %701  ;;  %7496 = vmatprep.subr.bf16.mxu1 %v8202_v31 }
 0x238   :  { %777 = vst.msk [vmem:[#allocation3 + $0x258] sm:$0xf] %vm746_vm3, %v702_v39  ;;  %7835 = vmatmul.mubr.msk.bf16.gmra.mrb[112].mxu0 %vm2100_vm4, %v8201_v32  ;;  %4198 = vmatprep.mubr.bf16.mxu1 %v6809_v37 }
 0x239   :  { %v704_v41 = vpop.permute.xlu1 %703  ;;  %7531 = vmatpush3.bf16.msra.mxu0 %v8217_v35  ;;  %v8211_v3 = vld [vmem:[#allocation3 + $0x230] ss:$20 sps:$4 sm:$0xff]  }
 0x23a   :  { %778 = vst.msk [vmem:[#allocation3 + $0x26c] sm:$0xf] %vm746_vm3, %v704_v41  ;;  %7497 = vmatpush3.bf16.msra.mxu1 %v8204_v36  ;;  %7532 = vmatprep.subr.bf16.mxu0 %v8218_v38 }
 0x23b   :  { %v983_v47 = vpop.permute.xlu0 %982  ;;  %7498 = vmatprep.subr.bf16.mxu1 %v8207_v40  ;;  %v9663_v40 = vld [vmem:[%s10203_s5] ss:$0 sm:$0xff] }
 0x23c   :  { %1057 = vst.msk [vmem:[#allocation3 + $0x25c] sm:$0xf] %vm746_vm3, %v983_v47 }
 0x23d   :  { %v985_v49 = vpop.permute.xlu1 %984  ;;  %4199 = vmatmul.mubr.bf16.gmra.mrb[92].mxu1 %v6808_v42  ;;  %v8213_v50 = vld [vmem:[#allocation3 + $0x234] ss:$20 sps:$4 sm:$0xff]   ;;  %7533 = vmatpush3.bf16.msra.mxu0 %v8219_v45  ;;  %v7156_v55 = vpop.f32.mrb[4].mxu1 }
 0x23e   :  { %1058 = vst.msk [vmem:[#allocation3 + $0x270] sm:$0xf] %vm746_vm3, %v985_v49  ;;  %7499 = vmatpush3.bf16.msra.mxu1 %v8209_v46  ;;  %7534 = vmatprep.subr.bf16.mxu0 %v8222_v43  ;;  %v7157_v57 = vpop.f32.mrb[5].mxu1  ;;  %v2151_v49 = vadd.f32 %v9131_v44, %v9663_v40 }
 0x23f   :  { %v706_v54 = vpop.permute.xlu0 %705  ;;  %4765 = vmatprep.mubr.bf16.mxu1 %v8213_v50  ;;  %7500 = vmatprep.subr.bf16.mxu1 %v8214_v48  ;;  %v9616_v58 = vadd.f32 %v7157_v57, %v7156_v55  ;;  %v7159_v60 = vpop.f32.mrb[6].mxu1  ;;  %v8244_v55 = vld [vmem:[#allocation3 + $0x240] ss:$20 sps:$4 sm:$0xff]  }
 0x240   :  { %779 = vst.msk [vmem:[#allocation3 + $0x280] sm:$0xf] %vm746_vm3, %v706_v54  ;;  %v7160_v63 = vpop.f32.mrb[7].mxu1 }
 0x241   :  { %v708_v59 = vpop.permute.xlu1 %707  ;;  %7535 = vmatpush3.bf16.msra.mxu0 %v8223_v51  ;;  %v9625_v4 = vadd.f32 %v7160_v63, %v7159_v60 }
 0x242   :  { %780 = vst.msk [vmem:[#allocation3 + $0x294] sm:$0xf] %vm746_vm3, %v708_v59  ;;  %7501 = vmatpush3.bf16.msra.mxu1 %v8216_v52  ;;  %7536 = vmatprep.subr.bf16.mxu0 %v8224_v53 }
 0x243   :  { %v987_v5 = vpop.permute.xlu0 %986  ;;  %7838 = vmatprep.subr.bf16.mxu1 %v8235_v56  ;;  %v4319_v20 = vld [vmem:[#allocation3 + $0x258] sm:$0xff] }
 0x244   :  { %1059 = vst.msk [vmem:[#allocation3 + $0x284] sm:$0xf] %vm746_vm3, %v987_v5 }
 0x245   :  { %v989_v7 = vpop.permute.xlu1 %988  ;;  %4766 = vmatmul.mubr.bf16.vlgmr.msra.gmra.mrb[96].mxu1 %v8211_v3  ;;  %v8220_v8 = vld [vmem:[#allocation3 + $0x25c] ss:$20 sps:$4 sm:$0xff]   ;;  %7537 = vmatpush3.bf16.msra.mxu0 %v8225_v62 }
 0x246   :  { %1060 = vst.msk [vmem:[#allocation3 + $0x298] sm:$0xf] %vm746_vm3, %v989_v7  ;;  %7538 = vmatprep.subr.bf16.mxu0 %v8228_v1  ;;  %7839 = vmatpush3.bf16.msra.mxu1 %v8235_v56  ;;  %v7162_v12 = vpop.f32.mrb[8].mxu1  ;;  %v4322_v14 = vld [vmem:[#allocation3 + $0x26c] sm:$0xff]  ;;  %v2156_v1 = vadd.f32 %v9616_v58, %v9663_v40  ;;  %v2159_v7 = vadd.f32 %v9625_v4, %v9663_v40 }
 0x247   :  { %v1259_v11 = vpop.permute.xlu0 %1258  ;;  %4773 = vmatprep.mubr.bf16.mxu1 %v8220_v8  ;;  %7840 = vmatprep.subr.bf16.mxu1 %v8236_v6  ;;  %v7163_v15 = vpop.f32.mrb[9].mxu1  ;;  %v6864_v24 = vcombine.low %v4319_v20, %v4322_v14 }
 0x248   :  { %1335 = vst.msk [vmem:[#allocation3 + $0x238] sm:$0xf] %vm746_vm3, %v1259_v11  ;;  %v9642_v16 = vadd.f32 %v7163_v15, %v7162_v12  ;;  %v7165_v18 = vpop.f32.mrb[10].mxu1  ;;  %v8249_v11 = vld [vmem:[#allocation3 + $0x290] ss:$20 sps:$4 sm:$0xff]  }
 0x249   :  { %v1261_v17 = vpop.permute.xlu1 %1260  ;;  %7539 = vmatpush3.bf16.msra.mxu0 %v8229_v9  ;;  %v7166_v21 = vpop.f32.mrb[11].mxu1 }
 0x24a   :  { %1336 = vst.msk [vmem:[#allocation3 + $0x24c] sm:$0xf] %vm746_vm3, %v1261_v17  ;;  %7540 = vmatprep.subr.bf16.mxu0 %v8230_v10  ;;  %7841 = vmatpush3.bf16.msra.mxu1 %v8236_v6  ;;  %v9648_v22 = vadd.f32 %v7166_v21, %v7165_v18  ;;  %v8245_v10 = vld [vmem:[#allocation3 + $0x268] ss:$20 sps:$4 sm:$0xff]   ;;  %v2164_v17 = vadd.f32 %v9642_v16, %v9663_v40 }
 0x24b   :  { %v1539_v23 = vpop.permute.xlu0 %1538  ;;  %7842 = vmatprep.subr.bf16.mxu1 %v8239_v13  ;;  %v4325_v32 = vld [vmem:[#allocation3 + $0x280] sm:$0xff] }
 0x24c   :  { %1615 = vst.msk [vmem:[#allocation3 + $0x23c] sm:$0xf] %vm746_vm3, %v1539_v23  ;;  %v2167_v21 = vadd.f32 %v9648_v22, %v9663_v40 }
 0x24d   :  { %v1541_v26 = vpop.permute.xlu1 %1540  ;;  %4774 = vmatmul.mubr.bf16.gmra.mrb[100].mxu1 %v6864_v24  ;;  %v8226_v27 = vld [vmem:[#allocation3 + $0x284] ss:$20 sps:$4 sm:$0xff]   ;;  %7541 = vmatpush3.bf16.msra.mxu0 %v8231_v19 }
 0x24e   :  { %1616 = vst.msk [vmem:[#allocation3 + $0x250] sm:$0xf] %vm746_vm3, %v1541_v26  ;;  %7843 = vmatpush3.bf16.msra.mxu1 %v8239_v13  ;;  %4781 = vmatprep.mubr.bf16.mxu1 %v8226_v27  ;;  %v4328_v29 = vld [vmem:[#allocation3 + $0x294] sm:$0xff] }
 0x24f   :  { %v710_v28 = vpop.permute.xlu0 %709  ;;  %7844 = vmatprep.subr.bf16.mxu1 %v8243_v25  ;;  %v6869_v36 = vcombine.low %v4325_v32, %v4328_v29  ;;  %v8250_v27 = vld [vmem:[#allocation3 + $0x2b8] ss:$0 sps:$4 sm:$0xff]  }
 0x250   :  { %781 = vst.msk [vmem:[#allocation3 + $0x2a8] sm:$0xf] %vm746_vm3, %v710_v28  ;;  %v7168_v61 = vpop.f32.mrb[12].mxu1 }
 0x251   :  { %v7169_v30 = vpop.f32.mrb[13].mxu1  ;;  %v1265_v31 = vpop.permute.xlu1 %1264  ;;  %v8232_v38 = vld [vmem:[#allocation3 + $0x238] ss:$20 sps:$4 sm:$0xff]  }
 0x252   :  { %1338 = vst.msk [vmem:[#allocation3 + $0x274] sm:$0xf] %vm746_vm3, %v1265_v31  ;;  %v7171_v33 = vpop.f32.mrb[14].mxu1  ;;  %7845 = vmatpush3.bf16.msra.mxu1 %v8243_v25 }
 0x253   :  { %v7172_v34 = vpop.f32.mrb[15].mxu1  ;;  %v1263_v35 = vpop.permute.xlu0 %1262  ;;  %7854 = vmatprep.subr.bf16.mxu1 %v8377_v0 }
 0x254   :  { %1337 = vst.msk [vmem:[#allocation3 + $0x260] sm:$0xf] %vm746_vm3, %v1263_v35 }
 0x255   :  { %4782 = vmatmul.mubr.bf16.gmra.mrb[104].mxu1 %v6869_v36  ;;  %v991_v37 = vpop.permute.xlu1 %990  ;;  %v8234_v39 = vld [vmem:[#allocation3 + $0x23c] ss:$20 sps:$4 sm:$0xff]  }
 0x256   :  { %1061 = vst.msk [vmem:[#allocation3 + $0x2ac] sm:$0xf] %vm746_vm3, %v991_v37  ;;  %4829 = vmatprep.mubr.bf16.mxu0 %v8234_v39 }
 0x257   :  { %v1543_v41 = vpop.permute.xlu0 %1542  ;;  %4830 = vmatmul.mubr.bf16.vlgmr.msra.gmra.mrb[116].mxu0 %v8232_v38 }
 0x258   :  { %1617 = vst.msk [vmem:[#allocation3 + $0x264] sm:$0xf] %vm746_vm3, %v1543_v41  ;;  %v7190_v42 = vpop.f32.mrb[16].mxu1 }
 0x259   :  { %v7191_v45 = vpop.f32.mrb[17].mxu1  ;;  %v1545_v46 = vpop.permute.xlu1 %1544 }
 0x25a   :  { %1618 = vst.msk [vmem:[#allocation3 + $0x278] sm:$0xf] %vm746_vm3, %v1545_v46  ;;  %v7193_v43 = vpop.f32.mrb[18].mxu1 }
 0x25b   :  { %v7194_v47 = vpop.f32.mrb[19].mxu1  ;;  %v1267_v48 = vpop.permute.xlu0 %1266  ;;  %v8242_v63 = vld [vmem:[#allocation3 + $0x260] ss:$20 sps:$4 sm:$0xff]  }
 0x25c   :  { %v7195_v50 = vadd.f32 %v7194_v47, %v7193_v43  ;;  %1339 = vst.msk [vmem:[#allocation3 + $0x288] sm:$0xf] %vm746_vm3, %v1267_v48 }
 0x25d   :  { %v1269_v51 = vpop.permute.xlu1 %1268  ;;  %v4331_v52 = vld [vmem:[#allocation3 + $0x2a8] sm:$0xff] }
 0x25e   :  { %1340 = vst.msk [vmem:[#allocation3 + $0x29c] sm:$0xf] %vm746_vm3, %v1269_v51  ;;  %v6875_v53 = vcombine.high %v4331_v52, %v4331_v52  ;;  %v6874_v54 = vcombine.low %v4331_v52, %v4331_v52  ;;  %v9671_v56 = vadd.f32 %v7195_v50, %v2151_v49 }
 0x25f   :  { %v1547_v57 = vpop.permute.xlu0 %1546 }
 0x260   :  { %1619 = vst.msk [vmem:[#allocation3 + $0x28c] sm:$0xf] %vm746_vm3, %v1547_v57  ;;  %v7196_v59 = vpop.f32.mrb[20].mxu1  ;;  %4789 = vmatprep.mubr.bf16.mxu1 %v6875_v53 }
 0x261   :  { %v7197_v60 = vpop.f32.mrb[21].mxu1  ;;  %4790 = vmatmul.mubr.bf16.gmra.mrb[108].mxu1 %v6874_v54  ;;  %v1549_v44 = vpop.permute.xlu1 %1548  ;;  %v8240_v62 = vld [vmem:[#allocation3 + $0x264] ss:$20 sps:$4 sm:$0xff]  }
 0x262   :  { %v7198_v3 = vadd.f32 %v7197_v60, %v7196_v59  ;;  %1620 = vst.msk [vmem:[#allocation3 + $0x2a0] sm:$0xf] %vm746_vm3, %v1549_v44  ;;  %v7199_v5 = vpop.f32.mrb[22].mxu1  ;;  %7846 = vmatprep.mubr.msk.bf16.mxu1 %vm2100_vm4, %v8244_v55  ;;  %4837 = vmatprep.mubr.bf16.mxu0 %v8240_v62 }
 0x263   :  { %v7200_v6 = vpop.f32.mrb[23].mxu1  ;;  %4838 = vmatmul.mubr.bf16.gmra.mrb[120].mxu0 %v8242_v63 }
 0x264   :  { %v7201_v8 = vadd.f32 %v7200_v6, %v7199_v5  ;;  %v2220_v9 = vadd.f32 %v7198_v3, %v2156_v1 }
 0x265   :  { %v8248_v15 = vld [vmem:[#allocation3 + $0x288] ss:$20 sps:$4 sm:$0xff]  }
 0x266   :  { %v2223_v12 = vadd.f32 %v7201_v8, %v2159_v7 }
 0x268   :  { %v7202_v13 = vpop.f32.mrb[24].mxu1 }
 0x269   :  { %v7203_v14 = vpop.f32.mrb[25].mxu1  ;;  %7847 = vmatmul.mubr.msk.bf16.vlgmr.msra.gmra.mrb[112].mxu1 %vm2100_vm4, %v8245_v10  ;;  %v8246_v58 = vld [vmem:[#allocation3 + $0x28c] ss:$20 sps:$4 sm:$0xff]  }
 0x26a   :  { %v7204_v18 = vadd.f32 %v7203_v14, %v7202_v13  ;;  %v7205_v19 = vpop.f32.mrb[26].mxu1  ;;  %7850 = vmatprep.mubr.msk.bf16.mxu1 %vm2100_vm4, %v8249_v11  ;;  %v7238_v20 = vpop.f32.mrb[52].mxu0  ;;  %4845 = vmatprep.mubr.bf16.mxu0 %v8246_v58 }
 0x26b   :  { %v7206_v4 = vpop.f32.mrb[27].mxu1  ;;  %v7239_v24 = vpop.f32.mrb[53].mxu0  ;;  %4846 = vmatmul.mubr.bf16.gmra.mrb[124].mxu0 %v8248_v15 }
 0x26c   :  { %v7207_v23 = vadd.f32 %v7206_v4, %v7205_v19  ;;  %v2228_v25 = vadd.f32 %v7204_v18, %v2164_v17  ;;  %v7241_v26 = vpop.f32.mrb[54].mxu0 }
 0x26d   :  { %v7242_v28 = vpop.f32.mrb[55].mxu0 }
 0x26e   :  { %v2231_v61 = vadd.f32 %v7207_v23, %v2167_v21  ;;  %v7243_v29 = vadd.f32 %v7242_v28, %v7241_v26 }
 0x270   :  { %v7208_v16 = vpop.f32.mrb[28].mxu1  ;;  %v2806_v4 = vadd.f32 %v7243_v29, %v9663_v40 }
 0x271   :  { %v7209_v30 = vpop.f32.mrb[29].mxu1  ;;  %7851 = vmatmul.mubr.msk.bf16.gmra.mrb[116].mxu1 %vm2100_vm4, %v8250_v27 }
 0x272   :  { %v7211_v31 = vpop.f32.mrb[30].mxu1  ;;  %7862 = vmatprep.mubr.msk.bf16.mxu1 %vm8378_vm1, %v8377_v0  ;;  %v7244_v33 = vpop.f32.mrb[56].mxu0 }
 0x273   :  { %v7212_v32 = vpop.f32.mrb[31].mxu1  ;;  %v7245_v22 = vpop.f32.mrb[57].mxu0 }
 0x274   :  { %v7246_v34 = vadd.f32 %v7245_v22, %v7244_v33  ;;  %v7247_v35 = vpop.f32.mrb[58].mxu0 }
 0x275   :  { %v7248_v36 = vpop.f32.mrb[59].mxu0 }
 0x276   :  { %v9689_v37 = vadd.f32 %v7248_v36, %v7247_v35  ;;  %v2811_v16 = vadd.f32 %v7246_v34, %v9663_v40 }
 0x278   :  { %v7784_v38 = vpop.f32.mrb[32].mxu1  ;;  %v2814_v22 = vadd.f32 %v9689_v37, %v9663_v40 }
 0x279   :  { %v2284_v39 = vadd.f32 %v7784_v38, %v2220_v9  ;;  %v2275_v41 = vpop.f32.mrb[33].mxu1 }
 0x27a   :  { %v7785_v42 = vpop.f32.mrb[34].mxu1 }
 0x27b   :  { %v2307_v45 = vmax.f32 %v2284_v39, 0.0  ;;  %v2287_v46 = vadd.f32 %v7785_v42, %v2223_v12  ;;  %v2278_v43 = vpop.f32.mrb[35].mxu1  ;;  %v7250_v47 = vpop.f32.mrb[60].mxu0 }
 0x27c   :  { %v2279_v48 = vadd.f32 %v2278_v43, %v9671_v56  ;;  %v7251_v49 = vpop.f32.mrb[61].mxu0 }
 0x27d   :  { %v7086_v50 = vpack.c.bf16 %v2307_v45, %v2307_v45  ;;  %v2308_v51 = vmax.f32 %v2287_v46, 0.0  ;;  %v9692_v52 = vadd.f32 %v7251_v49, %v7250_v47  ;;  %v7253_v53 = vpop.f32.mrb[62].mxu0 }
 0x27e   :  { %v2306_v54 = vmax.f32 %v2279_v48, 0.0  ;;  %v7254_v55 = vpop.f32.mrb[63].mxu0 }
 0x27f   :  { %2343 = vst.msk [vmem:[#allocation4 + $0x8] sm:$0xf] %vm361_vm0, %v7086_v50  ;;  %v7087_v57 = vpack.c.bf16 %v2308_v51, %v2308_v51  ;;  %v9695_v59 = vadd.f32 %v7254_v55, %v7253_v53  ;;  %v2819_v49 = vadd.f32 %v9692_v52, %v9663_v40 }
 0x280   :  { %v7085_v60 = vpack.c.bf16 %v2306_v54, %v2306_v54  ;;  %v7788_v44 = vpop.f32.mrb[36].mxu1 }
 0x281   :  { %2344 = vst.msk [vmem:[#allocation4 + $0xc] sm:$0xf] %vm361_vm0, %v7087_v57  ;;  %v2291_v62 = vpop.f32.mrb[37].mxu1  ;;  %v2822_v55 = vadd.f32 %v9695_v59, %v9663_v40 }
 0x282   :  { %2342 = vst.msk [vmem:[#allocation4 + $0x4] sm:$0xf] %vm361_vm0, %v7085_v60  ;;  %v2292_v56 = vadd.f32 %v2291_v62, %v2228_v25  ;;  %v7789_v63 = vpop.f32.mrb[38].mxu1 }
 0x283   :  { %v2294_v1 = vpop.f32.mrb[39].mxu1 }
 0x284   :  { %v2309_v3 = vmax.f32 %v2292_v56, 0.0  ;;  %v2295_v5 = vadd.f32 %v2294_v1, %v2231_v61 }
 0x286   :  { %v7088_v6 = vpack.c.bf16 %v2309_v3, %v2309_v3  ;;  %v2310_v7 = vmax.f32 %v2295_v5, 0.0 }
 0x288   :  { %2345 = vst.msk [vmem:[#allocation4 + $0x10] sm:$0xf] %vm361_vm0, %v7088_v6  ;;  %v7089_v8 = vpack.c.bf16 %v2310_v7, %v2310_v7  ;;  %v4976_v9 = vld [vmem:[#allocation4 + $0xc] sm:$0xf] }
 0x289   :  { %4977 = vst.msk [vmem:[#allocation5 + $0x4] sm:$0xf] %vm361_vm0, %v4976_v9  ;;  %v4968_v10 = vld [vmem:[#allocation4 + $0x4] sm:$0xf] }
 0x28a   :  { %2346 = vst.msk [vmem:[#allocation4 + $0x14] sm:$0xf] %vm361_vm0, %v7089_v8  ;;  %4969 = vst.msk [vmem:[#allocation5] sm:$0xf] %vm361_vm0, %v4968_v10 }
 0x291   :  { %v4984_v11 = vld [vmem:[#allocation4 + $0x14] sm:$0xf] }
 0x292   :  { %4985 = vst.msk [vmem:[#allocation5 + $0x8] sm:$0xf] %vm361_vm0, %v4984_v11 }
 0x294   :  { %v7256_v12 = vpop.f32.mrb[64].mxu0 }
 0x295   :  { %v7257_v13 = vpop.f32.mrb[65].mxu0 }
 0x296   :  { %v7259_v14 = vpop.f32.mrb[66].mxu0 }
 0x297   :  { %v7260_v58 = vpop.f32.mrb[67].mxu0 }
 0x298   :  { %v7278_v15 = vpop.f32.mrb[40].mxu1 }
 0x299   :  { %v7279_v17 = vpop.f32.mrb[41].mxu1 }
 0x29a   :  { %v7281_v18 = vpop.f32.mrb[42].mxu1 }
 0x29b   :  { %v7282_v19 = vpop.f32.mrb[43].mxu1 }
 0x29c   :  { %v7283_v20 = vadd.f32 %v7282_v19, %v7281_v18  ;;  %v7800_v21 = vpop.f32.mrb[68].mxu0 }
 0x29d   :  { %v2930_v23 = vpop.f32.mrb[69].mxu0 }
 0x29e   :  { %v7801_v24 = vpop.f32.mrb[70].mxu0  ;;  %v2870_v25 = vadd.f32 %v7283_v20, %v2806_v4  ;;  %v9724_v4 = vld [vmem:[%s10203_s5] ss:$0 sm:$0xff] }
 0x29f   :  { %v2933_v26 = vpop.f32.mrb[71].mxu0 }
 0x2a0   :  { %v2934_v27 = vadd.f32 %v2933_v26, %v2870_v25  ;;  %v7284_v28 = vpop.f32.mrb[44].mxu1 }
 0x2a1   :  { %v7285_v61 = vpop.f32.mrb[45].mxu1 }
 0x2a2   :  { %v2961_v30 = vmax.f32 %v2934_v27, 0.0  ;;  %v7286_v31 = vadd.f32 %v7285_v61, %v7284_v28  ;;  %v7287_v32 = vpop.f32.mrb[46].mxu1 }
 0x2a3   :  { %v7288_v33 = vpop.f32.mrb[47].mxu1 }
 0x2a4   :  { %v7092_v35 = vpack.c.bf16 %v2961_v30, %v2961_v30  ;;  %v2875_v29 = vadd.f32 %v7286_v31, %v2811_v16  ;;  %v7289_v36 = vadd.f32 %v7288_v33, %v7287_v32  ;;  %v7804_v38 = vpop.f32.mrb[72].mxu0 }
 0x2a5   :  { %v2946_v39 = vpop.f32.mrb[73].mxu0 }
 0x2a6   :  { %2997 = vst.msk [vmem:[#allocation4 + $0x20] sm:$0xf] %vm361_vm0, %v7092_v35  ;;  %v2939_v41 = vadd.f32 %v7800_v21, %v2875_v29  ;;  %v2878_v42 = vadd.f32 %v7289_v36, %v2814_v22  ;;  %v7805_v45 = vpop.f32.mrb[74].mxu0 }
 0x2a7   :  { %v2949_v46 = vpop.f32.mrb[75].mxu0 }
 0x2a8   :  { %v2962_v43 = vmax.f32 %v2939_v41, 0.0  ;;  %v2942_v34 = vadd.f32 %v7801_v24, %v2878_v42  ;;  %v7290_v47 = vpop.f32.mrb[48].mxu1 }
 0x2a9   :  { %v7291_v48 = vpop.f32.mrb[49].mxu1 }
 0x2aa   :  { %v7093_v50 = vpack.c.bf16 %v2962_v43, %v2962_v43  ;;  %v2963_v37 = vmax.f32 %v2942_v34, 0.0  ;;  %v7292_v51 = vadd.f32 %v7291_v48, %v7290_v47  ;;  %v7293_v53 = vpop.f32.mrb[50].mxu1 }
 0x2ab   :  { %v7294_v54 = vpop.f32.mrb[51].mxu1 }
 0x2ac   :  { %2998 = vst.msk [vmem:[#allocation4 + $0x24] sm:$0xf] %vm361_vm0, %v7093_v50  ;;  %v7094_v57 = vpack.c.bf16 %v2963_v37, %v2963_v37  ;;  %v2883_v60 = vadd.f32 %v7292_v51, %v2819_v49  ;;  %v7295_v44 = vadd.f32 %v7294_v54, %v7293_v53 }
 0x2ad   :  { %v4986_v62 = vld [vmem:[#allocation4 + $0x20] sm:$0xf] }
 0x2ae   :  { %2999 = vst.msk [vmem:[#allocation4 + $0x28] sm:$0xf] %vm361_vm0, %v7094_v57  ;;  %v2947_v56 = vadd.f32 %v2946_v39, %v2883_v60  ;;  %v2886_v63 = vadd.f32 %v7295_v44, %v2822_v55  ;;  %4988 = vrot.lane.b32.xlu1 %v4986_v62, %s8380_s21 }
 0x2b0   :  { %v2964_v52 = vmax.f32 %v2947_v56, 0.0  ;;  %v2950_v1 = vadd.f32 %v2949_v46, %v2886_v63  ;;  %v7296_v3 = vpop.f32.mrb[52].mxu1 }
 0x2b1   :  { %v7297_v5 = vpop.f32.mrb[53].mxu1 }
 0x2b2   :  { %v7095_v6 = vpack.c.bf16 %v2964_v52, %v2964_v52  ;;  %v2965_v7 = vmax.f32 %v2950_v1, 0.0  ;;  %v7299_v8 = vpop.f32.mrb[54].mxu1 }
 0x2b3   :  { %v7300_v40 = vpop.f32.mrb[55].mxu1  ;;  %v4992_v59 = vld [vmem:[#allocation4 + $0x24] sm:$0xf] }
 0x2b4   :  { %3000 = vst.msk [vmem:[#allocation4 + $0x2c] sm:$0xf] %vm361_vm0, %v7095_v6  ;;  %v7096_v9 = vpack.c.bf16 %v2965_v7, %v2965_v7  ;;  %4993 = vst.msk [vmem:[#allocation5 + $0xc] sm:$0xf] %vm361_vm0, %v4992_v59 }
 0x2b5   :  { %v4994_v19 = vld [vmem:[#allocation4 + $0x28] sm:$0xf] }
 0x2b6   :  { %3001 = vst.msk [vmem:[#allocation4 + $0x30] sm:$0xf] %vm361_vm0, %v7096_v9 }
 0x2b8   :  { %v7326_v10 = vpop.f32.mrb[56].mxu1 }
 0x2b9   :  { %v7327_v11 = vpop.f32.mrb[57].mxu1 }
 0x2ba   :  { %v7329_v12 = vpop.f32.mrb[58].mxu1 }
 0x2bb   :  { %v7330_v13 = vpop.f32.mrb[59].mxu1  ;;  %v5000_v14 = vld [vmem:[#allocation4 + $0x2c] sm:$0xf] }
 0x2bc   :  { %v7331_v58 = vadd.f32 %v7330_v13, %v7329_v12  ;;  %5001 = vst.msk [vmem:[#allocation5 + $0x10] sm:$0xf] %vm361_vm0, %v5000_v14 }
 0x2bd   :  { %v5002_v15 = vld [vmem:[#allocation4 + $0x30] sm:$0xf] }
 0x2be   :  { %5004 = vrot.lane.b32.xlu0 %v5002_v15, %s8380_s21  ;;  %v3461_v61 = vadd.f32 %v7331_v58, %v9724_v4 }
 0x2c0   :  { %v7332_v17 = vpop.f32.mrb[60].mxu1 }
 0x2c1   :  { %v7333_v18 = vpop.f32.mrb[61].mxu1 }
 0x2c2   :  { %v7334_v20 = vadd.f32 %v7333_v18, %v7332_v17  ;;  %v7335_v21 = vpop.f32.mrb[62].mxu1  ;;  %4996 = vrot.lane.b32.xlu0 %v4994_v19, %s8380_s21 }
 0x2c3   :  { %v7336_v23 = vpop.f32.mrb[63].mxu1  ;;  %v7366_v24 = vpop.f32.mrb[76].mxu0 }
 0x2c4   :  { %v7337_v25 = vadd.f32 %v7336_v23, %v7335_v21  ;;  %v7367_v26 = vpop.f32.mrb[77].mxu0  ;;  %v3466_v39 = vadd.f32 %v7334_v20, %v9724_v4 }
 0x2c5   :  { %v7369_v27 = vpop.f32.mrb[78].mxu0 }
 0x2c6   :  { %v7370_v28 = vpop.f32.mrb[79].mxu0  ;;  %v3469_v46 = vadd.f32 %v7337_v25, %v9724_v4 }
 0x2c7   :  { %v7371_v16 = vadd.f32 %v7370_v28, %v7369_v27 }
 0x2c8   :  { %v7338_v30 = vpop.f32.mrb[64].mxu1 }
 0x2c9   :  { %v7339_v31 = vpop.f32.mrb[65].mxu1  ;;  %v3525_v32 = vadd.f32 %v7371_v16, %v3461_v61 }
 0x2ca   :  { %v7340_v33 = vadd.f32 %v7339_v31, %v7338_v30  ;;  %v7341_v22 = vpop.f32.mrb[66].mxu1 }
 0x2cb   :  { %v7342_v35 = vpop.f32.mrb[67].mxu1  ;;  %v7372_v29 = vpop.f32.mrb[80].mxu0 }
 0x2cc   :  { %v7343_v36 = vadd.f32 %v7342_v35, %v7341_v22  ;;  %v7373_v38 = vpop.f32.mrb[81].mxu0  ;;  %v3474_v54 = vadd.f32 %v7340_v33, %v9724_v4 }
 0x2cd   :  { %v7374_v41 = vadd.f32 %v7373_v38, %v7372_v29  ;;  %v7375_v42 = vpop.f32.mrb[82].mxu0 }
 0x2ce   :  { %v7376_v45 = vpop.f32.mrb[83].mxu0  ;;  %v3477_v44 = vadd.f32 %v7343_v36, %v9724_v4 }
 0x2cf   :  { %v7377_v43 = vadd.f32 %v7376_v45, %v7375_v42  ;;  %v3530_v34 = vadd.f32 %v7374_v41, %v3466_v39 }
 0x2d0   :  { %v7344_v47 = vpop.f32.mrb[68].mxu1 }
 0x2d1   :  { %v7345_v48 = vpop.f32.mrb[69].mxu1  ;;  %v3533_v49 = vadd.f32 %v7377_v43, %v3469_v46 }
 0x2d2   :  { %v7347_v50 = vpop.f32.mrb[70].mxu1 }
 0x2d3   :  { %v7348_v37 = vpop.f32.mrb[71].mxu1  ;;  %v7378_v51 = vpop.f32.mrb[84].mxu0 }
 0x2d4   :  { %v7379_v53 = vpop.f32.mrb[85].mxu0 }
 0x2d5   :  { %v7380_v55 = vadd.f32 %v7379_v53, %v7378_v51  ;;  %v7381_v57 = vpop.f32.mrb[86].mxu0 }
 0x2d6   :  { %v7382_v60 = vpop.f32.mrb[87].mxu0 }
 0x2d7   :  { %v7383_v62 = vadd.f32 %v7382_v60, %v7381_v57  ;;  %v3538_v56 = vadd.f32 %v7380_v55, %v3474_v54 }
 0x2d8   :  { %v7816_v63 = vpop.f32.mrb[72].mxu1 }
 0x2d9   :  { %v3594_v52 = vadd.f32 %v7816_v63, %v3530_v34  ;;  %v3585_v1 = vpop.f32.mrb[73].mxu1  ;;  %v3541_v3 = vadd.f32 %v7383_v62, %v3477_v44 }
 0x2da   :  { %v7817_v5 = vpop.f32.mrb[74].mxu1 }
 0x2db   :  { %v3617_v6 = vmax.f32 %v3594_v52, 0.0  ;;  %v3597_v7 = vadd.f32 %v7817_v5, %v3533_v49  ;;  %v3588_v8 = vpop.f32.mrb[75].mxu1  ;;  %v7384_v40 = vpop.f32.mrb[88].mxu0 }
 0x2dc   :  { %v3589_v59 = vadd.f32 %v3588_v8, %v3525_v32  ;;  %v7385_v9 = vpop.f32.mrb[89].mxu0 }
 0x2dd   :  { %v7100_v10 = vpack.c.bf16 %v3617_v6, %v3617_v6  ;;  %v3618_v11 = vmax.f32 %v3597_v7, 0.0  ;;  %v7387_v12 = vpop.f32.mrb[90].mxu0 }
 0x2de   :  { %v3616_v13 = vmax.f32 %v3589_v59, 0.0  ;;  %v7388_v14 = vpop.f32.mrb[91].mxu0 }
 0x2df   :  { %3653 = vst.msk [vmem:[#allocation4 + $0x40] sm:$0xf] %vm361_vm0, %v7100_v10  ;;  %v7101_v58 = vpack.c.bf16 %v3618_v11, %v3618_v11 }
 0x2e0   :  { %v7099_v15 = vpack.c.bf16 %v3616_v13, %v3616_v13  ;;  %v7820_v17 = vpop.f32.mrb[76].mxu1 }
 0x2e1   :  { %3654 = vst.msk [vmem:[#allocation4 + $0x44] sm:$0xf] %vm361_vm0, %v7101_v58  ;;  %v3601_v18 = vpop.f32.mrb[77].mxu1 }
 0x2e2   :  { %3652 = vst.msk [vmem:[#allocation4 + $0x3c] sm:$0xf] %vm361_vm0, %v7099_v15  ;;  %v3602_v19 = vadd.f32 %v3601_v18, %v3538_v56  ;;  %v7821_v20 = vpop.f32.mrb[78].mxu1 }
 0x2e3   :  { %v3604_v21 = vpop.f32.mrb[79].mxu1  ;;  %v7414_v23 = vpop.f32.mrb[92].mxu0 }
 0x2e4   :  { %v3619_v24 = vmax.f32 %v3602_v19, 0.0  ;;  %v3605_v25 = vadd.f32 %v3604_v21, %v3541_v3  ;;  %v7415_v26 = vpop.f32.mrb[93].mxu0 }
 0x2e5   :  { %v7417_v27 = vpop.f32.mrb[94].mxu0 }
 0x2e6   :  { %v7102_v28 = vpack.c.bf16 %v3619_v24, %v3619_v24  ;;  %v3620_v61 = vmax.f32 %v3605_v25, 0.0  ;;  %v7418_v16 = vpop.f32.mrb[95].mxu0 }
 0x2e7   :  { %v7419_v30 = vadd.f32 %v7418_v16, %v7417_v27 }
 0x2e8   :  { %3655 = vst.msk [vmem:[#allocation4 + $0x48] sm:$0xf] %vm361_vm0, %v7102_v28  ;;  %v7103_v31 = vpack.c.bf16 %v3620_v61, %v3620_v61  ;;  %v5016_v32 = vld [vmem:[#allocation4 + $0x44] sm:$0xf] }
 0x2e9   :  { %5017 = vst.msk [vmem:[#allocation5 + $0x18] sm:$0xf] %vm361_vm0, %v5016_v32  ;;  %v5008_v33 = vld [vmem:[#allocation4 + $0x3c] sm:$0xf]  ;;  %v4116_v53 = vadd.f32 %v7419_v30, %v9724_v4 }
 0x2ea   :  { %3656 = vst.msk [vmem:[#allocation4 + $0x4c] sm:$0xf] %vm361_vm0, %v7103_v31  ;;  %5009 = vst.msk [vmem:[#allocation5 + $0x14] sm:$0xf] %vm361_vm0, %v5008_v33 }
 0x2eb   :  { %v7420_v22 = vpop.f32.mrb[96].mxu0 }
 0x2ec   :  { %v7421_v35 = vpop.f32.mrb[97].mxu0 }
 0x2ed   :  { %v7422_v29 = vadd.f32 %v7421_v35, %v7420_v22  ;;  %v7423_v36 = vpop.f32.mrb[98].mxu0 }
 0x2ee   :  { %v7424_v38 = vpop.f32.mrb[99].mxu0 }
 0x2ef   :  { %v7425_v39 = vadd.f32 %v7424_v38, %v7423_v36  ;;  %v4121_v63 = vadd.f32 %v7422_v29, %v9724_v4 }
 0x2f1   :  { %v5024_v41 = vld [vmem:[#allocation4 + $0x4c] sm:$0xf]  ;;  %v4124_v6 = vadd.f32 %v7425_v39, %v9724_v4  ;;  %v1376_v39 = vld [vmem:[#allocation2 + $0xc0] sm:$0xf] }
 0x2f2   :  { %5025 = vst.msk [vmem:[#allocation5 + $0x1c] sm:$0xf] %vm361_vm0, %v5024_v41  ;;  %1411 = vst.msk [vmem:[#allocation3 + $0x2b4] sm:$0xf] %vm361_vm0, %v1376_v39 }
 0x2f3   :  { %v7426_v42 = vpop.f32.mrb[100].mxu0 }
 0x2f4   :  { %v7427_v45 = vpop.f32.mrb[101].mxu0 }
 0x2f5   :  { %v7428_v46 = vadd.f32 %v7427_v45, %v7426_v42  ;;  %v7429_v43 = vpop.f32.mrb[102].mxu0 }
 0x2f6   :  { %v7430_v34 = vpop.f32.mrb[103].mxu0 }
 0x2f7   :  { %v7431_v47 = vadd.f32 %v7430_v34, %v7429_v43  ;;  %v4129_v18 = vadd.f32 %v7428_v46, %v9724_v4 }
 0x2f8   :  { %v7454_v48 = vpop.f32.mrb[80].mxu1 }
 0x2f9   :  { %v7455_v49 = vpop.f32.mrb[81].mxu1  ;;  %v4132_v27 = vadd.f32 %v7431_v47, %v9724_v4 }
 0x2fa   :  { %v7457_v50 = vpop.f32.mrb[82].mxu1 }
 0x2fb   :  { %v7458_v37 = vpop.f32.mrb[83].mxu1  ;;  %v7432_v51 = vpop.f32.mrb[104].mxu0 }
 0x2fc   :  { %v7459_v54 = vadd.f32 %v7458_v37, %v7457_v50  ;;  %v7433_v55 = vpop.f32.mrb[105].mxu0  ;;  %v8254_v51 = vld [vmem:[%s10204_s6 + $0x120] sm:$0xff]  }
 0x2fd   :  { %v7435_v57 = vpop.f32.mrb[106].mxu0  ;;  %v1446_v55 = vld [vmem:[#allocation2 + $0xc4] sm:$0xf]  ;;  %7855 = vmatpush3.bf16.msra.mxu1 %v8254_v51  ;;  %v8277_v51 = vld [vmem:[%s10204_s6 + $0xd0] sm:$0xff]  }
 0x2fe   :  { %v7436_v60 = vpop.f32.mrb[107].mxu0  ;;  %v4180_v44 = vadd.f32 %v7459_v54, %v4116_v53  ;;  %v8255_v57 = vld [vmem:[%s10204_s6 + $0x128] sm:$0xff]   ;;  %7856 = vmatprep.subr.bf16.mxu1 %v8377_v0 }
 0x2ff   :  { %v8256_v60 = vld [vmem:[%s10204_s6 + $0xe0] sm:$0xff]  }
 0x300   :  { %v7460_v62 = vpop.f32.mrb[84].mxu1  ;;  %7574 = vmatprep.subr.bf16.mxu0 %v8256_v60 }
 0x301   :  { %v7461_v56 = vpop.f32.mrb[85].mxu1  ;;  %7857 = vmatpush3.bf16.msra.mxu1 %v8255_v57 }
 0x302   :  { %v7462_v52 = vadd.f32 %v7461_v56, %v7460_v62  ;;  %v7463_v1 = vpop.f32.mrb[86].mxu1  ;;  %7858 = vmatprep.subr.bf16.mxu1 %v8377_v0 }
 0x303   :  { %v7464_v3 = vpop.f32.mrb[87].mxu1  ;;  %v7832_v5 = vpop.f32.mrb[108].mxu0 }
 0x304   :  { %v7465_v7 = vadd.f32 %v7464_v3, %v7463_v1  ;;  %v4185_v8 = vadd.f32 %v7462_v52, %v4121_v63  ;;  %v4240_v40 = vpop.f32.mrb[109].mxu0  ;;  %v8258_v63 = vld [vmem:[%s10204_s6 + $0x130] sm:$0xff]   ;;  %v8259_v1 = vld [vmem:[%s10204_s6 + $0xe8] sm:$0xff]  }
 0x305   :  { %v7833_v59 = vpop.f32.mrb[110].mxu0  ;;  %v8261_v40 = vld [vmem:[%s10204_s6 + $0x138] sm:$0xff]   ;;  %7859 = vmatpush3.bf16.msra.mxu1 %v8258_v63 }
 0x306   :  { %v4249_v9 = vadd.f32 %v7832_v5, %v4185_v8  ;;  %v4188_v10 = vadd.f32 %v7465_v7, %v4124_v6  ;;  %v4243_v11 = vpop.f32.mrb[111].mxu0  ;;  %v8260_v6 = vld [vmem:[%s10204_s6 + $0xa8] sm:$0xff]   ;;  %7860 = vmatprep.subr.bf16.mxu1 %v8377_v0 }
 0x307   :  { %v4244_v12 = vadd.f32 %v4243_v11, %v4180_v44  ;;  %v8257_v44 = vld [vmem:[%s10204_s6 + $0xa0] sm:$0xff]  }
 0x308   :  { %v4272_v13 = vmax.f32 %v4249_v9, 0.0  ;;  %v4252_v14 = vadd.f32 %v7833_v59, %v4188_v10  ;;  %v7466_v58 = vpop.f32.mrb[88].mxu1  ;;  %7575 = vmatpush3.bf16.msra.mxu0 %v8257_v44  ;;  %v8262_v9 = vld [vmem:[%s10204_s6 + $0xf0] sm:$0xff]   ;;  %v8281_v44 = vld [vmem:[%s10204_s6 + $0x118] sm:$0xff]  }
 0x309   :  { %v4271_v15 = vmax.f32 %v4244_v12, 0.0  ;;  %v7467_v17 = vpop.f32.mrb[89].mxu1  ;;  %7576 = vmatprep.subr.bf16.mxu0 %v8259_v1  ;;  %v8263_v10 = vld [vmem:[%s10204_s6 + $0xb0] sm:$0xff]   ;;  %7861 = vmatpush3.bf16.msra.mxu1 %v8261_v40  ;;  %v8284_v1 = vld [vmem:[%s10204_s6 + $0xd8] sm:$0xff]  }
 0x30a   :  { %v7107_v19 = vpack.c.bf16 %v4272_v13, %v4272_v13  ;;  %v4273_v20 = vmax.f32 %v4252_v14, 0.0  ;;  %v7468_v21 = vadd.f32 %v7467_v17, %v7466_v58  ;;  %v7469_v23 = vpop.f32.mrb[90].mxu1  ;;  %7866 = vmatprep.subr.bf16.mxu1 %v8377_v0 }
 0x30b   :  { %v7106_v24 = vpack.c.bf16 %v4271_v15, %v4271_v15  ;;  %v7470_v25 = vpop.f32.mrb[91].mxu1  ;;  %v7836_v26 = vpop.f32.mrb[112].mxu0 }
 0x30c   :  { %4308 = vst.msk [vmem:[#allocation4 + $0x5c] sm:$0xf] %vm361_vm0, %v7107_v19  ;;  %v7108_v28 = vpack.c.bf16 %v4273_v20, %v4273_v20  ;;  %v7471_v61 = vadd.f32 %v7470_v25, %v7469_v23  ;;  %v4193_v16 = vadd.f32 %v7468_v21, %v4129_v18  ;;  %v4256_v30 = vpop.f32.mrb[113].mxu0  ;;  %7577 = vmatpush3.bf16.msra.mxu0 %v8260_v6  ;;  %v8265_v21 = vld [vmem:[%s10204_s6 + $0xf8] sm:$0xff]   ;;  %v5018_v6 = vld [vmem:[#allocation4 + $0x48] sm:$0xf] }
 0x30d   :  { %4307 = vst.msk [vmem:[#allocation4 + $0x58] sm:$0xf] %vm361_vm0, %v7106_v24  ;;  %v7837_v31 = vpop.f32.mrb[114].mxu0  ;;  %7578 = vmatprep.subr.bf16.mxu0 %v8262_v9  ;;  %v8266_v23 = vld [vmem:[%s10204_s6 + $0xb8] sm:$0xff]  }
 0x30e   :  { %4309 = vst.msk [vmem:[#allocation4 + $0x60] sm:$0xf] %vm361_vm0, %v7108_v28  ;;  %v4257_v32 = vadd.f32 %v4256_v30, %v4193_v16  ;;  %v4196_v33 = vadd.f32 %v7471_v61, %v4132_v27  ;;  %v4259_v22 = vpop.f32.mrb[115].mxu0  ;;  %v1096_v28 = vld [vmem:[#allocation2 + $0xa8] sm:$0xf]  ;;  %v8268_v61 = vld [vmem:[%s10204_s6 + $0x100] sm:$0xff]  }
 0x30f   :  { %1131 = vst.msk [vmem:[#allocation3 + $0x2b0] sm:$0xf] %vm361_vm0, %v1096_v28  ;;  %v8269_v16 = vld [vmem:[%s10204_s6 + $0xc0] sm:$0xff]  }
 0x310   :  { %v4274_v35 = vmax.f32 %v4257_v32, 0.0  ;;  %v4260_v29 = vadd.f32 %v4259_v22, %v4196_v33  ;;  %v7472_v36 = vpop.f32.mrb[92].mxu1  ;;  %7579 = vmatpush3.bf16.msra.mxu0 %v8263_v10  ;;  %v8271_v22 = vld [vmem:[%s10204_s6 + $0x108] sm:$0xff]  }
 0x311   :  { %v7473_v38 = vpop.f32.mrb[93].mxu1  ;;  %7580 = vmatprep.subr.bf16.mxu0 %v8265_v21 }
 0x312   :  { %v7109_v41 = vpack.c.bf16 %v4274_v35, %v4274_v35  ;;  %v4275_v42 = vmax.f32 %v4260_v29, 0.0  ;;  %v7475_v45 = vpop.f32.mrb[94].mxu1  ;;  %v8272_v35 = vld [vmem:[%s10204_s6 + $0xc8] sm:$0xff]  }
 0x313   :  { %v7476_v46 = vpop.f32.mrb[95].mxu1  ;;  %v5032_v43 = vld [vmem:[#allocation4 + $0x5c] sm:$0xf] }
 0x314   :  { %4310 = vst.msk [vmem:[#allocation4 + $0x64] sm:$0xf] %vm361_vm0, %v7109_v41  ;;  %v7110_v34 = vpack.c.bf16 %v4275_v42, %v4275_v42  ;;  %5033 = vst.msk [vmem:[#allocation5 + $0x20] sm:$0xf] %vm361_vm0, %v5032_v43  ;;  %7581 = vmatpush3.bf16.msra.mxu0 %v8266_v23  ;;  %v1166_v46 = vld [vmem:[#allocation2 + $0xac] sm:$0xf] }
 0x315   :  { %v5034_v8 = vld [vmem:[#allocation4 + $0x60] sm:$0xf]  ;;  %7582 = vmatprep.subr.bf16.mxu0 %v8268_v61  ;;  %v5026_v10 = vld [vmem:[#allocation4 + $0x58] sm:$0xf] }
 0x316   :  { %4311 = vst.msk [vmem:[#allocation4 + $0x68] sm:$0xf] %vm361_vm0, %v7110_v34  ;;  %v5010_v61 = vld [vmem:[#allocation4 + $0x40] sm:$0xf] }
 0x318   :  { %v7502_v47 = vpop.f32.mrb[96].mxu1  ;;  %7583 = vmatpush3.bf16.msra.mxu0 %v8269_v16 }
 0x319   :  { %v7503_v48 = vpop.f32.mrb[97].mxu1  ;;  %7584 = vmatprep.subr.bf16.mxu0 %v8271_v22 }
 0x31a   :  { %v7505_v49 = vpop.f32.mrb[98].mxu1 }
 0x31b   :  { %v7506_v50 = vpop.f32.mrb[99].mxu1  ;;  %v5040_v37 = vld [vmem:[#allocation4 + $0x64] sm:$0xf] }
 0x31c   :  { %v7507_v53 = vadd.f32 %v7506_v50, %v7505_v49  ;;  %5041 = vst.msk [vmem:[#allocation5 + $0x24] sm:$0xf] %vm361_vm0, %v5040_v37  ;;  %7585 = vmatpush3.bf16.msra.mxu0 %v8272_v35  ;;  %v8275_v49 = vld [vmem:[%s10204_s6 + $0x110] sm:$0xff]  }
 0x31d   :  { %v5042_v54 = vld [vmem:[#allocation4 + $0x68] sm:$0xf]  ;;  %7586 = vmatprep.subr.bf16.mxu0 %v8275_v49  ;;  %v8273_v49 = vld [vmem:[%s10204_s6 + $0x98] sm:$0xff]  }
 0x31e   :  { %5044 = vrot.lane.b32.xlu0 %v5042_v54, %s8380_s21  ;;  %v4771_v24 = vadd.f32 %v7507_v53, %v9724_v4 }
 0x320   :  { %v7508_v62 = vpop.f32.mrb[100].mxu1  ;;  %v4989_v56 = vpop.permute.xlu1 %4988  ;;  %7587 = vmatpush3.bf16.msra.mxu0 %v8277_v51 }
 0x321   :  { %4991 = vst.msk [vmem:[#allocation5 + $0x8] sm:$0xf] %vm746_vm3, %v4989_v56  ;;  %v7509_v52 = vpop.f32.mrb[101].mxu1  ;;  %7588 = vmatprep.subr.bf16.mxu0 %v8281_v44 }
 0x322   :  { %v7510_v3 = vadd.f32 %v7509_v52, %v7508_v62  ;;  %v7511_v5 = vpop.f32.mrb[102].mxu1  ;;  %1550 = vrot.lane.b32.xlu0 %v1446_v55, %s8380_s21 }
 0x323   :  { %v7512_v7 = vpop.f32.mrb[103].mxu1 }
 0x324   :  { %v7513_v59 = vadd.f32 %v7512_v7, %v7511_v5  ;;  %v4776_v41 = vadd.f32 %v7510_v3, %v9724_v4  ;;  %7589 = vmatpush3.bf16.msra.mxu0 %v8284_v1 }
 0x326   :  { %5036 = vrot.lane.b32.xlu0 %v5034_v8, %s8380_s21  ;;  %v4779_v34 = vadd.f32 %v7513_v59, %v9724_v4 }
 0x328   :  { %v7514_v11 = vpop.f32.mrb[104].mxu1 }
 0x329   :  { %v7515_v12 = vpop.f32.mrb[105].mxu1 }
 0x32a   :  { %v9790_v13 = vadd.f32 %v7515_v12, %v7514_v11  ;;  %v7517_v14 = vpop.f32.mrb[106].mxu1  ;;  %v7542_v15 = vpop.f32.mrb[116].mxu0 }
 0x32b   :  { %v7518_v58 = vpop.f32.mrb[107].mxu1  ;;  %v7543_v18 = vpop.f32.mrb[117].mxu0 }
 0x32c   :  { %v9793_v17 = vadd.f32 %v7518_v58, %v7517_v14  ;;  %v7545_v19 = vpop.f32.mrb[118].mxu0  ;;  %v4784_v7 = vadd.f32 %v9790_v13, %v9724_v4  ;;  %v8287_v14 = vld [vmem:[%s10204_s6 + $0x40] sm:$0xff]  }
 0x32d   :  { %v7546_v20 = vpop.f32.mrb[119].mxu0  ;;  %7601 = vmatprep.subr.bf16.mxu0 %v8287_v14 }
 0x32e   :  { %v7547_v25 = vadd.f32 %v7546_v20, %v7545_v19  ;;  %v4787_v58 = vadd.f32 %v9793_v17, %v9724_v4 }
 0x330   :  { %v5005_v26 = vpop.permute.xlu0 %5004  ;;  %v4835_v27 = vadd.f32 %v7547_v25, %v4771_v24  ;;  %v4978_v25 = vld [vmem:[#allocation4 + $0x10] sm:$0xf] }
 0x331   :  { %5007 = vst.msk [vmem:[#allocation5 + $0x10] sm:$0xf] %vm746_vm3, %v5005_v26 }
 0x334   :  { %v7520_v30 = vpop.f32.mrb[108].mxu1  ;;  %v4997_v31 = vpop.permute.xlu0 %4996 }
 0x335   :  { %4999 = vst.msk [vmem:[#allocation5 + $0xc] sm:$0xf] %vm746_vm3, %v4997_v31  ;;  %v7521_v32 = vpop.f32.mrb[109].mxu1 }
 0x336   :  { %v7523_v33 = vpop.f32.mrb[110].mxu1  ;;  %v7548_v36 = vpop.f32.mrb[120].mxu0  ;;  %v4970_v32 = vld [vmem:[#allocation4 + $0x8] sm:$0xf] }
 0x337   :  { %v7524_v29 = vpop.f32.mrb[111].mxu1  ;;  %v7549_v38 = vpop.f32.mrb[121].mxu0 }
 0x338   :  { %v8251_v39 = vld [vmem:[#allocation5 + $0x10] ss:$0 sps:$4 sm:$0xff]   ;;  %v7550_v42 = vadd.f32 %v7549_v38, %v7548_v36  ;;  %v7551_v45 = vpop.f32.mrb[122].mxu0 }
 0x339   :  { %v7552_v43 = vpop.f32.mrb[123].mxu0  ;;  %5162 = vrot.lane.b32.xlu1 %v8251_v39, %s8380_s21 }
 0x33a   :  { %v7553_v47 = vadd.f32 %v7552_v43, %v7551_v45  ;;  %v4840_v48 = vadd.f32 %v7550_v42, %v4776_v41  ;;  %v8264_v41 = vld [vmem:[%s10204_s6 + $0x80] sm:$0xff]   ;;  %v8267_v45 = vld [vmem:[%s10204_s6 + $0x88] sm:$0xff]  }
 0x33c   :  { %v7848_v50 = vpop.f32.mrb[112].mxu1  ;;  %v5108_v37 = vld [vmem:[#allocation5 + $0x8] sm:$0xff]  ;;  %v4843_v55 = vadd.f32 %v7553_v47, %v4779_v34  ;;  %v8270_v34 = vld [vmem:[%s10204_s6 + $0x90] sm:$0xff]  }
 0x33d   :  { %v4904_v53 = vadd.f32 %v7848_v50, %v4840_v48  ;;  %v4895_v54 = vpop.f32.mrb[113].mxu1  ;;  %v6926_v57 = vcombine.low %v5108_v37, %v5108_v37  ;;  %1270 = vrot.lane.b32.xlu1 %v1166_v46, %s8380_s21  ;;  %v6927_v21 = vcombine.high %v5108_v37, %v5108_v37  ;;  %v8279_v50 = vld [vmem:[%s10204_s6 + $0x180] sm:$0xff]  }
 0x33e   :  { %v7849_v60 = vpop.f32.mrb[114].mxu1  ;;  %v7554_v52 = vpop.f32.mrb[124].mxu0 }
 0x33f   :  { %v4927_v62 = vmax.f32 %v4904_v53, 0.0  ;;  %v4907_v56 = vadd.f32 %v7849_v60, %v4843_v55  ;;  %v4898_v63 = vpop.f32.mrb[115].mxu1  ;;  %5158 = vrot.lane.b32.xlu0 %v6926_v57, %s8380_s21  ;;  %v7555_v5 = vpop.f32.mrb[125].mxu0  ;;  %v8280_v57 = vld [vmem:[%s10204_s6 + $0x140] sm:$0xff]   ;;  %v8278_v60 = vld [vmem:[#allocation5 + $0x8] ss:$0 sps:$4 sm:$0xff]  }
 0x340   :  { %v4899_v3 = vadd.f32 %v4898_v63, %v4835_v27  ;;  %v7556_v59 = vadd.f32 %v7555_v5, %v7554_v52  ;;  %v7557_v9 = vpop.f32.mrb[126].mxu0  ;;  %v8285_v63 = vld [vmem:[%s10204_s6 + $0x188] sm:$0xff]  }
 0x341   :  { %v7114_v8 = vpack.c.bf16 %v4927_v62, %v4927_v62  ;;  %v4928_v40 = vmax.f32 %v4907_v56, 0.0  ;;  %v7558_v12 = vpop.f32.mrb[127].mxu0  ;;  %5028 = vrot.lane.b32.xlu1 %v5026_v10, %s8380_s21 }
 0x342   :  { %v4926_v11 = vmax.f32 %v4899_v3, 0.0  ;;  %v7559_v15 = vadd.f32 %v7558_v12, %v7557_v9  ;;  %v4848_v18 = vadd.f32 %v7556_v59, %v4784_v7  ;;  %v8286_v3 = vld [vmem:[%s10204_s6 + $0x148] sm:$0xff]   ;;  %v8288_v7 = vld [vmem:[%s10204_s6] sm:$0xff]  }
 0x343   :  { %4963 = vst.msk [vmem:[#allocation4 + $0x78] sm:$0xf] %vm361_vm0, %v7114_v8  ;;  %v7115_v13 = vpack.c.bf16 %v4928_v40, %v4928_v40  ;;  %5020 = vrot.lane.b32.xlu0 %v5018_v6, %s8380_s21  ;;  %v8289_v6 = vld [vmem:[%s10204_s6 + $0x190] sm:$0xff]   ;;  %v8291_v9 = vld [vmem:[%s10204_s6 + $0x48] sm:$0xff]  }
 0x344   :  { %v7113_v19 = vpack.c.bf16 %v4926_v11, %v4926_v11  ;;  %v7852_v20 = vpop.f32.mrb[116].mxu1  ;;  %v4851_v24 = vadd.f32 %v7559_v15, %v4787_v58  ;;  %v8290_v8 = vld [vmem:[%s10204_s6 + $0x150] sm:$0xff]   ;;  %v8295_v11 = vld [vmem:[%s10204_s6 + $0x198] sm:$0xff]   ;;  %v8294_v58 = vld [vmem:[%s10204_s6 + $0x8] sm:$0xff]  }
 0x345   :  { %4964 = vst.msk [vmem:[#allocation4 + $0x7c] sm:$0xf] %vm361_vm0, %v7115_v13  ;;  %v4911_v23 = vpop.f32.mrb[117].mxu1  ;;  %5160 = vrot.lane.b32.xlu1 %v6927_v21, %s8380_s21  ;;  %v8296_v13 = vld [vmem:[%s10204_s6 + $0x158] sm:$0xff]   ;;  %v8297_v15 = vld [vmem:[%s10204_s6 + $0x50] sm:$0xff]  }
 0x346   :  { %4962 = vst.msk [vmem:[#allocation4 + $0x74] sm:$0xf] %vm361_vm0, %v7113_v19  ;;  %v4912_v26 = vadd.f32 %v4911_v23, %v4848_v18  ;;  %v7853_v4 = vpop.f32.mrb[118].mxu1  ;;  %v8301_v18 = vld [vmem:[%s10204_s6 + $0x1a0] sm:$0xff]   ;;  %v8300_v21 = vld [vmem:[%s10204_s6 + $0x10] sm:$0xff]  }
 0x347   :  { %v4914_v17 = vpop.f32.mrb[119].mxu1  ;;  %4980 = vrot.lane.b32.xlu0 %v4978_v25, %s8380_s21  ;;  %v8302_v23 = vld [vmem:[%s10204_s6 + $0x160] sm:$0xff]   ;;  %v8305_v25 = vld [vmem:[%s10204_s6 + $0x1a8] sm:$0xff]  }
 0x348   :  { %v4929_v27 = vmax.f32 %v4912_v26, 0.0  ;;  %v4915_v28 = vadd.f32 %v4914_v17, %v4851_v24  ;;  %v8303_v24 = vld [vmem:[%s10204_s6 + $0x58] sm:$0xff]   ;;  %v8306_v4 = vld [vmem:[%s10204_s6 + $0x168] sm:$0xff]   ;;  %v8307_v17 = vld [vmem:[%s10204_s6 + $0x60] sm:$0xff]  }
 0x349   :  { %5012 = vrot.lane.b32.xlu1 %v5010_v61, %s8380_s21  ;;  %v8304_v26 = vld [vmem:[%s10204_s6 + $0x18] sm:$0xff]   ;;  %v8310_v61 = vld [vmem:[%s10204_s6 + $0x170] sm:$0xff]  }
 0x34a   :  { %v7116_v16 = vpack.c.bf16 %v4929_v27, %v4929_v27  ;;  %v4930_v30 = vmax.f32 %v4915_v28, 0.0  ;;  %v5050_v40 = vld [vmem:[#allocation4 + $0x78] sm:$0xf]  ;;  %v8309_v27 = vld [vmem:[%s10204_s6 + $0x1b0] sm:$0xff]  }
 0x34b   :  { %v8308_v28 = vld [vmem:[%s10204_s6 + $0x20] sm:$0xff]  }
 0x34c   :  { %4965 = vst.msk [vmem:[#allocation4 + $0x80] sm:$0xf] %vm361_vm0, %v7116_v16  ;;  %v7117_v31 = vpack.c.bf16 %v4930_v30, %v4930_v30  ;;  %v5056_v35 = vld [vmem:[#allocation4 + $0x7c] sm:$0xf]  ;;  %v8311_v16 = vld [vmem:[%s10204_s6 + $0x68] sm:$0xff]   ;;  %v8313_v30 = vld [vmem:[%s10204_s6 + $0x1b8] sm:$0xff]  }
 0x34d   :  { %4972 = vrot.lane.b32.xlu1 %v4970_v32, %s8380_s21  ;;  %v5048_v22 = vld [vmem:[#allocation4 + $0x74] sm:$0xf]  ;;  %5057 = vst.msk [vmem:[#allocation5 + $0x2c] sm:$0xf] %vm361_vm0, %v5056_v35  ;;  %v8317_v35 = vld [vmem:[%s10204_s6 + $0x1c0] sm:$0xff]  }
 0x34e   :  { %4966 = vst.msk [vmem:[#allocation4 + $0x84] sm:$0xf] %vm361_vm0, %v7117_v31  ;;  %5049 = vst.msk [vmem:[#allocation5 + $0x28] sm:$0xf] %vm361_vm0, %v5048_v22  ;;  %v8312_v31 = vld [vmem:[%s10204_s6 + $0x28] sm:$0xff]   ;;  %v8314_v32 = vld [vmem:[%s10204_s6 + $0x178] sm:$0xff]  }
 0x34f   :  { %v8316_v22 = vld [vmem:[%s10204_s6 + $0x30] sm:$0xff]  }
 0x353   :  { %v5058_v59 = vld [vmem:[#allocation4 + $0x80] sm:$0xf] }
 0x355   :  { %v5064_v33 = vld [vmem:[#allocation4 + $0x84] sm:$0xf] }
 0x356   :  { %5065 = vst.msk [vmem:[#allocation5 + $0x30] sm:$0xf] %vm361_vm0, %v5064_v33  ;;  %v8315_v33 = vld [vmem:[%s10204_s6 + $0x70] sm:$0xff]  }
 0x390   :  { %v5045_v29 = vpop.permute.xlu0 %5044 }
 0x391   :  { %5047 = vst.msk [vmem:[#allocation5 + $0x24] sm:$0xf] %vm746_vm3, %v5045_v29  ;;  %v8318_v29 = vld [vmem:[%s10204_s6 + $0x78] sm:$0xff]  }
 0x394   :  { %v1551_v36 = vpop.permute.xlu0 %1550 }
 0x395   :  { %1621 = vst.msk [vmem:[#allocation3 + $0x2b4] sm:$0xf] %vm746_vm3, %v1551_v36 }
 0x398   :  { %v5037_v38 = vpop.permute.xlu0 %5036  ;;  %v8253_v39 = vld [vmem:[#allocation5 + $0x24] ss:$0 sps:$4 sm:$0xff]  }
 0x399   :  { %5039 = vst.msk [vmem:[#allocation5 + $0x20] sm:$0xf] %vm746_vm3, %v5037_v38  ;;  %5895 = vrot.lane.b32.xlu1 %v8253_v39, %s8380_s21  ;;  %v8319_v38 = vld [vmem:[%s10204_s6 + $0x38] sm:$0xff]   ;;  %v8320_v39 = vld [vmem:[%s10204_s6 + $0x1c8] sm:$0xff]  }
 0x3ab   :  { %v5163_v42 = vpop.permute.xlu1 %5162 }
 0x3ac   :  { %7863 = vmatmul.mubr.msk.bf16.vlgmr.msra.gmra.mrb[120].mxu1 %vm2100_vm4, %v5163_v42 }
 0x3ad   :  { %7867 = vmatpush3.bf16.msra.mxu1 %v8264_v41  ;;  %7874 = vmatprep.mubr.msk.bf16.mxu1 %vm8378_vm1, %v8377_v0  ;;  %v8328_v41 = vld [vmem:[%s10204_s6 + $0x220] sm:$0xff]  }
 0x3ae   :  { %7868 = vmatprep.subr.bf16.mxu1 %v8377_v0 }
 0x3af   :  { %v1271_v46 = vpop.permute.xlu1 %1270 }
 0x3b0   :  { %1341 = vst.msk [vmem:[#allocation3 + $0x2b0] sm:$0xf] %vm746_vm3, %v1271_v46  ;;  %v8321_v46 = vld [vmem:[%s10204_s6 + $0x1d0] sm:$0xff]  }
 0x3b1   :  { %v5159_v43 = vpop.permute.xlu0 %5158  ;;  %7869 = vmatpush3.bf16.msra.mxu1 %v8267_v45 }
 0x3b2   :  { %7870 = vmatprep.subr.bf16.mxu1 %v8377_v0 }
 0x3b3   :  { %v5029_v47 = vpop.permute.xlu1 %5028 }
 0x3b4   :  { %5031 = vst.msk [vmem:[#allocation5 + $0x1c] sm:$0xf] %vm746_vm3, %v5029_v47  ;;  %v8322_v47 = vld [vmem:[%s10204_s6 + $0x1d8] sm:$0xff]  }
 0x3b5   :  { %v5021_v48 = vpop.permute.xlu0 %5020  ;;  %7871 = vmatpush3.bf16.msra.mxu1 %v8270_v34  ;;  %v8331_v34 = vld [vmem:[%s10204_s6 + $0x1e8] sm:$0xff]  }
 0x3b6   :  { %5023 = vst.msk [vmem:[#allocation5 + $0x18] sm:$0xf] %vm746_vm3, %v5021_v48  ;;  %7872 = vmatprep.subr.bf16.mxu1 %v8377_v0  ;;  %v8332_v48 = vld [vmem:[%s10204_s6 + $0x230] sm:$0xff]  }
 0x3b7   :  { %v5161_v37 = vpop.permute.xlu1 %5160  ;;  %v4332_v51 = vld [vmem:[#allocation3 + $0x2b0] sm:$0xff] }
 0x3b8   :  { %v6877_v54 = vcombine.high %v4332_v51, %v4332_v51  ;;  %v6876_v55 = vcombine.low %v4332_v51, %v4332_v51  ;;  %v5166_v62 = vsel %vm2100_vm4, %v5161_v37, %v5163_v42  ;;  %v5165_v10 = vsel %vm2100_vm4, %v5159_v43, %v5161_v37  ;;  %v8329_v42 = vld [vmem:[%s10204_s6 + $0x1e0] sm:$0xff]   ;;  %v8330_v43 = vld [vmem:[%s10204_s6 + $0x228] sm:$0xff]   ;;  %v8334_v51 = vld [vmem:[%s10204_s6 + $0x238] sm:$0xff]  }
 0x3b9   :  { %v4981_v53 = vpop.permute.xlu0 %4980  ;;  %7873 = vmatpush3.bf16.msra.mxu1 %v8273_v49  ;;  %v8333_v49 = vld [vmem:[%s10204_s6 + $0x1f0] sm:$0xff]  }
 0x3ba   :  { %4983 = vst.msk [vmem:[#allocation5 + $0x4] sm:$0xf] %vm746_vm3, %v4981_v53  ;;  %4853 = vmatprep.mubr.bf16.mxu0 %v6877_v54  ;;  %7628 = vmatprep.subr.bf16.mxu1 %v8279_v50  ;;  %v8324_v50 = vld [vmem:[%s10204_s6 + $0x260] sm:$0xff]   ;;  %v8335_v53 = vld [vmem:[%s10204_s6 + $0x1f8] sm:$0xff]   ;;  %v8325_v54 = vld [vmem:[%s10204_s6 + $0x268] sm:$0xff]  }
 0x3bb   :  { %4854 = vmatmul.mubr.bf16.gmra.mrb[128].mxu0 %v6876_v55  ;;  %v5013_v44 = vpop.permute.xlu1 %5012  ;;  %v5841_v56 = vld [vmem:[#allocation5 + $0x1c] sm:$0xff]  ;;  %v8338_v55 = vld [vmem:[%s10204_s6 + $0x240] sm:$0xff]  }
 0x3bc   :  { %7875 = vmatmul.mubr.msk.bf16.vlgmr.msra.gmra.mrb[124].mxu1 %vm2100_vm4, %v8278_v60  ;;  %5015 = vst.msk [vmem:[#allocation5 + $0x14] sm:$0xf] %vm746_vm3, %v5013_v44  ;;  %5324 = vmatprep.mubr.bf16.mxu0 %v5166_v62  ;;  %v6999_v52 = vcombine.high %v5841_v56, %v5841_v56  ;;  %v6998_v1 = vcombine.low %v5841_v56, %v5841_v56  ;;  %v8323_v37 = vld [vmem:[#allocation5 + $0x1c] ss:$0 sps:$4 sm:$0xff]   ;;  %v8342_v44 = vld [vmem:[%s10204_s6 + $0x248] sm:$0xff]   ;;  %v8327_v56 = vld [vmem:[%s10204_s6 + $0x278] sm:$0xff]  }
 0x3bd   :  { %7629 = vmatpush3.bf16.msra.mxu1 %v8280_v57  ;;  %v8339_v57 = vld [vmem:[%s10204_s6 + $0x200] sm:$0xff]   ;;  %v8326_v60 = vld [vmem:[%s10204_s6 + $0x270] sm:$0xff]   ;;  %v8343_v62 = vld [vmem:[%s10204_s6 + $0x208] sm:$0xff]  }
 0x3be   :  { %5893 = vrot.lane.b32.xlu0 %v6999_v52, %s8380_s21  ;;  %5891 = vrot.lane.b32.xlu1 %v6998_v1, %s8380_s21  ;;  %v8336_v52 = vld [vmem:[%s10204_s6 + $0x2c0] sm:$0xff]   ;;  %v8347_v1 = vld [vmem:[%s10204_s6 + $0x210] sm:$0xff]  }
 0x3bf   :  { %7630 = vmatprep.subr.bf16.mxu1 %v8285_v63  ;;  %v4973_v5 = vpop.permute.xlu1 %4972  ;;  %v8346_v63 = vld [vmem:[%s10204_s6 + $0x250] sm:$0xff]  }
 0x3c0   :  { %4975 = vst.msk [vmem:[#allocation5] sm:$0xf] %vm746_vm3, %v4973_v5  ;;  %v8351_v5 = vld [vmem:[%s10204_s6 + $0x218] sm:$0xff]  }
 0x3c1   :  { %7631 = vmatpush3.bf16.msra.mxu1 %v8286_v3  ;;  %v8350_v3 = vld [vmem:[%s10204_s6 + $0x258] sm:$0xff]  }
 0x3c2   :  { %5052 = vrot.lane.b32.xlu0 %v5050_v40, %s8380_s21  ;;  %5060 = vrot.lane.b32.xlu1 %v5058_v59, %s8380_s21  ;;  %v8341_v40 = vld [vmem:[%s10204_s6 + $0x288] sm:$0xff]   ;;  %v8344_v59 = vld [vmem:[%s10204_s6 + $0x2d0] sm:$0xff]  }
 0x3c3   :  { %5325 = vmatmul.mubr.bf16.vlgmr.msra.gmra.mrb[132].mxu0 %v5165_v10  ;;  %7632 = vmatprep.subr.bf16.mxu1 %v8289_v6  ;;  %v5585_v12 = vld [vmem:[#allocation5 + $0x14] sm:$0xff]  ;;  %v8337_v6 = vld [vmem:[%s10204_s6 + $0x280] sm:$0xff]   ;;  %v8348_v10 = vld [vmem:[%s10204_s6 + $0x2d8] sm:$0xff]  }
 0x3c4   :  { %7602 = vmatpush3.bf16.msra.mxu0 %v8288_v7  ;;  %v6975_v14 = vcombine.high %v5585_v12, %v5585_v12  ;;  %v6974_v36 = vcombine.low %v5585_v12, %v5585_v12  ;;  %v8340_v7 = vld [vmem:[%s10204_s6 + $0x2c8] sm:$0xff]   ;;  %v8352_v12 = vld [vmem:[%s10204_s6 + $0x2e0] sm:$0xff]  }
 0x3c5   :  { %7633 = vmatpush3.bf16.msra.mxu1 %v8290_v8  ;;  %7603 = vmatprep.subr.bf16.mxu0 %v8291_v9  ;;  %v8345_v9 = vld [vmem:[%s10204_s6 + $0x290] sm:$0xff]  }
 0x3c6   :  { %5792 = vmatprep.mubr.bf16.mxu1 %v6975_v14  ;;  %7634 = vmatprep.subr.bf16.mxu1 %v8295_v11  ;;  %v8349_v11 = vld [vmem:[%s10204_s6 + $0x298] sm:$0xff]   ;;  %v8353_v14 = vld [vmem:[%s10204_s6 + $0x2a0] sm:$0xff]  }
 0x3c7   :  { %v5066_v19 = vld [vmem:[#allocation5] sm:$0xff] }
 0x3c8   :  { %7604 = vmatpush3.bf16.msra.mxu0 %v8294_v58  ;;  %v6951_v20 = vcombine.high %v5066_v19, %v5066_v19  ;;  %v6950_v45 = vcombine.low %v5066_v19, %v5066_v19  ;;  %v8355_v58 = vld [vmem:[%s10204_s6 + $0x2e8] sm:$0xff]   ;;  %v8361_v19 = vld [vmem:[%s10204_s6 + $0x2f8] sm:$0xff]  }
 0x3c9   :  { %7635 = vmatpush3.bf16.msra.mxu1 %v8296_v13  ;;  %7605 = vmatprep.subr.bf16.mxu0 %v8297_v15  ;;  %v8356_v13 = vld [vmem:[%s10204_s6 + $0x2a8] sm:$0xff]   ;;  %v8358_v15 = vld [vmem:[%s10204_s6 + $0x2f0] sm:$0xff]  }
 0x3ca   :  { %5537 = vmatprep.mubr.bf16.mxu0 %v6951_v20  ;;  %7636 = vmatprep.subr.bf16.mxu1 %v8301_v18  ;;  %v8359_v18 = vld [vmem:[%s10204_s6 + $0x2b0] sm:$0xff]   ;;  %v8362_v20 = vld [vmem:[%s10204_s6 + $0x2b8] sm:$0xff]  }
 0x3cc   :  { %7606 = vmatpush3.bf16.msra.mxu0 %v8300_v21 }
 0x3cd   :  { %7637 = vmatpush3.bf16.msra.mxu1 %v8302_v23  ;;  %7607 = vmatprep.subr.bf16.mxu0 %v8303_v24  ;;  %v8354_v24 = vld [vmem:[%s10204_s6 + $0x300] sm:$0xff]  }
 0x3ce   :  { %7638 = vmatprep.subr.bf16.mxu1 %v8305_v25 }
 0x3d0   :  { %7608 = vmatpush3.bf16.msra.mxu0 %v8304_v26 }
 0x3d1   :  { %7639 = vmatpush3.bf16.msra.mxu1 %v8306_v4  ;;  %7609 = vmatprep.subr.bf16.mxu0 %v8307_v17 }
 0x3d2   :  { %7640 = vmatprep.subr.bf16.mxu1 %v8309_v27  ;;  %v8357_v27 = vld [vmem:[%s10204_s6 + $0x308] sm:$0xff]  }
 0x3d4   :  { %7610 = vmatpush3.bf16.msra.mxu0 %v8308_v28  ;;  %v8360_v28 = vld [vmem:[%s10204_s6 + $0x310] sm:$0xff]  }
 0x3d5   :  { %7641 = vmatpush3.bf16.msra.mxu1 %v8310_v61  ;;  %7611 = vmatprep.subr.bf16.mxu0 %v8311_v16  ;;  %v8365_v16 = vld [vmem:[%s10204_s6 + $0x318] sm:$0xff]  }
 0x3d6   :  { %7642 = vmatprep.subr.bf16.mxu1 %v8313_v30 }
 0x3d8   :  { %7612 = vmatpush3.bf16.msra.mxu0 %v8312_v31 }
 0x3d9   :  { %7643 = vmatpush3.bf16.msra.mxu1 %v8314_v32  ;;  %7613 = vmatprep.subr.bf16.mxu0 %v8315_v33  ;;  %v8366_v32 = vld [vmem:[#allocation5 + $0x30] ss:$0 sps:$4 sm:$0xff]  }
 0x3da   :  { %7878 = vmatprep.subr.bf16.mxu1 %v8377_v0  ;;  %v8367_v33 = vld [vmem:[%s10205_s8] sm:$0xff]  }
 0x3dc   :  { %7614 = vmatpush3.bf16.msra.mxu0 %v8316_v22  ;;  %5793 = vmatmul.mubr.bf16.vlgmr.msra.gmra.mrb[128].mxu1 %v6974_v36 }
 0x3dd   :  { %7879 = vmatpush3.bf16.msra.mxu1 %v8317_v35  ;;  %7615 = vmatprep.subr.bf16.mxu0 %v8318_v29 }
 0x3de   :  { %7880 = vmatprep.subr.bf16.mxu1 %v8377_v0  ;;  %7886 = vmatprep.mubr.msk.bf16.mxu1 %vm8378_vm1, %v8377_v0 }
 0x3e0   :  { %7616 = vmatpush3.bf16.msra.mxu0 %v8319_v38  ;;  %v8368_v38 = vld [vmem:[%s10205_s8 + $0x8] sm:$0xff]  }
 0x3e1   :  { %7881 = vmatpush3.bf16.msra.mxu1 %v8320_v39  ;;  %7655 = vmatprep.subr.bf16.mxu0 %v8328_v41  ;;  %v8369_v39 = vld [vmem:[%s10205_s8 + $0x10] sm:$0xff]   ;;  %v8370_v41 = vld [vmem:[%s10205_s8 + $0x18] sm:$0xff]  }
 0x3e2   :  { %7882 = vmatprep.subr.bf16.mxu1 %v8377_v0 }
 0x3e3   :  { %5538 = vmatmul.mubr.bf16.vlgmr.msra.gmra.mrb[136].mxu0 %v6950_v45 }
 0x3e4   :  { %7656 = vmatpush3.bf16.msra.mxu0 %v8329_v42 }
 0x3e5   :  { %7883 = vmatpush3.bf16.msra.mxu1 %v8321_v46  ;;  %7657 = vmatprep.subr.bf16.mxu0 %v8330_v43 }
 0x3e6   :  { %7884 = vmatprep.subr.bf16.mxu1 %v8377_v0 }
 0x3e8   :  { %7658 = vmatpush3.bf16.msra.mxu0 %v8331_v34 }
 0x3e9   :  { %7885 = vmatpush3.bf16.msra.mxu1 %v8322_v47  ;;  %7659 = vmatprep.subr.bf16.mxu0 %v8332_v48  ;;  %v8371_v47 = vld [vmem:[%s10205_s8 + $0x20] sm:$0xff]  }
 0x3ea   :  { %7890 = vmatprep.subr.bf16.mxu1 %v8377_v0 }
 0x3ec   :  { %7887 = vmatmul.mubr.msk.bf16.vlgmr.msra.gmra.mrb[132].mxu1 %vm2100_vm4, %v8323_v37  ;;  %7660 = vmatpush3.bf16.msra.mxu0 %v8333_v49 }
 0x3ed   :  { %7891 = vmatpush3.bf16.msra.mxu1 %v8324_v50  ;;  %7898 = vmatprep.mubr.msk.bf16.mxu1 %vm8378_vm1, %v8377_v0 }
 0x3ee   :  { %7892 = vmatprep.subr.bf16.mxu1 %v8377_v0  ;;  %7661 = vmatprep.subr.bf16.mxu0 %v8334_v51 }
 0x3f0   :  { %7662 = vmatpush3.bf16.msra.mxu0 %v8335_v53 }
 0x3f1   :  { %7893 = vmatpush3.bf16.msra.mxu1 %v8325_v54  ;;  %7663 = vmatprep.subr.bf16.mxu0 %v8338_v55 }
 0x3f2   :  { %7894 = vmatprep.subr.bf16.mxu1 %v8377_v0 }
 0x3f4   :  { %7664 = vmatpush3.bf16.msra.mxu0 %v8339_v57 }
 0x3f5   :  { %7895 = vmatpush3.bf16.msra.mxu1 %v8326_v60  ;;  %7665 = vmatprep.subr.bf16.mxu0 %v8342_v44  ;;  %v8372_v60 = vld [vmem:[%s10205_s8 + $0x28] sm:$0xff]   ;;  %v8373_v44 = vld [vmem:[%s10205_s8 + $0x30] sm:$0xff]  }
 0x3f6   :  { %7896 = vmatprep.subr.bf16.mxu1 %v8377_v0 }
 0x3f8   :  { %7666 = vmatpush3.bf16.msra.mxu0 %v8343_v62  ;;  %v6387_v62 = vld [vmem:[%s10206_s1] sm:$0xff] }
 0x3f9   :  { %7897 = vmatpush3.bf16.msra.mxu1 %v8327_v56  ;;  %7667 = vmatprep.subr.bf16.mxu0 %v8346_v63  ;;  %vm6400_vm5 = vcmp.eq.s32.totalorder %v6387_v62, 1  ;;  %vm6388_vm6 = vcmp.eq.s32.totalorder %v6387_v62, 0  ;;  %vm6413_vm7 = vcmp.eq.s32.totalorder %v6387_v62, 2  ;;  %vm6426_vm8 = vcmp.eq.s32.totalorder %v6387_v62, 3 }
 0x3fa   :  { %7682 = vmatprep.subr.bf16.mxu1 %v8336_v52  ;;  %v6402_v56 = vsel %vm6400_vm5, 1, %v8379_v2  ;;  %v6390_v63 = vsel %vm6388_vm6, 1, %v8379_v2  ;;  %v8374_v52 = vld [vmem:[%s10205_s8 + $0x38] sm:$0xff]  }
 0x3fb   :  { %6404 = vperm.xlu1 %7939, %v6402_v56   ;;  %6392 = vperm.xlu0 %7938, %v6390_v63  }
 0x3fc   :  { %7668 = vmatpush3.bf16.msra.mxu0 %v8347_v1  ;;  %v6415_v1 = vsel %vm6413_vm7, 1, %v8379_v2 }
 0x3fd   :  { %7669 = vmatprep.subr.bf16.mxu0 %v8350_v3  ;;  %v6428_v3 = vsel %vm6426_vm8, 1, %v8379_v2 }
 0x3ff   :  { %6417 = vperm.xlu1 %7939, %v6415_v1   ;;  %6430 = vperm.xlu0 %7938, %v6428_v3  }
 0x400   :  { %7670 = vmatpush3.bf16.msra.mxu0 %v8351_v5 }
 0x401   :  { %7902 = vmatprep.subr.bf16.mxu0 %v8377_v0 }
 0x40b   :  { %v5896_v8 = vpop.permute.xlu1 %5895 }
 0x40c   :  { %7899 = vmatmul.mubr.msk.bf16.vlgmr.msra.gmra.mrb[136].mxu1 %vm2100_vm4, %v5896_v8 }
 0x40d   :  { %7683 = vmatpush3.bf16.msra.mxu1 %v8337_v6 }
 0x40e   :  { %7684 = vmatprep.subr.bf16.mxu1 %v8340_v7 }
 0x411   :  { %7685 = vmatpush3.bf16.msra.mxu1 %v8341_v40 }
 0x412   :  { %7686 = vmatprep.subr.bf16.mxu1 %v8344_v59 }
 0x415   :  { %7687 = vmatpush3.bf16.msra.mxu1 %v8345_v9 }
 0x416   :  { %7688 = vmatprep.subr.bf16.mxu1 %v8348_v10 }
 0x419   :  { %7689 = vmatpush3.bf16.msra.mxu1 %v8349_v11 }
 0x41a   :  { %7690 = vmatprep.subr.bf16.mxu1 %v8352_v12 }
 0x41d   :  { %7691 = vmatpush3.bf16.msra.mxu1 %v8353_v14 }
 0x41e   :  { %7692 = vmatprep.subr.bf16.mxu1 %v8355_v58 }
 0x421   :  { %7693 = vmatpush3.bf16.msra.mxu1 %v8356_v13 }
 0x422   :  { %7694 = vmatprep.subr.bf16.mxu1 %v8358_v15 }
 0x425   :  { %7695 = vmatpush3.bf16.msra.mxu1 %v8359_v18 }
 0x426   :  { %7696 = vmatprep.subr.bf16.mxu1 %v8361_v19 }
 0x429   :  { %7697 = vmatpush3.bf16.msra.mxu1 %v8362_v20 }
 0x430   :  { %v5894_v21 = vpop.permute.xlu0 %5893  ;;  %v5892_v23 = vpop.permute.xlu1 %5891 }
 0x431   :  { %v5897_v25 = vsel %vm2100_vm4, %v5892_v23, %v5894_v21  ;;  %v5898_v26 = vsel %vm2100_vm4, %v5894_v21, %v5896_v8 }
 0x432   :  { %6056 = vmatprep.mubr.bf16.mxu0 %v5898_v26 }
 0x433   :  { %6057 = vmatmul.mubr.bf16.vlgmr.msra.gmra.mrb[140].mxu0 %v5897_v25 }
 0x434   :  { %7903 = vmatpush3.bf16.msra.mxu0 %v8354_v24  ;;  %v5053_v4 = vpop.permute.xlu0 %5052  ;;  %v5061_v17 = vpop.permute.xlu1 %5060  ;;  %7910 = vmatprep.mubr.msk.bf16.mxu0 %vm8378_vm1, %v8377_v0 }
 0x435   :  { %5055 = vst.msk [vmem:[#allocation5 + $0x28] sm:$0xf] %vm746_vm3, %v5053_v4  ;;  %5063 = vst.msk [vmem:[#allocation5 + $0x2c] sm:$0xf] %vm746_vm3, %v5061_v17  ;;  %7904 = vmatprep.subr.bf16.mxu0 %v8377_v0 }
 0x438   :  { %7905 = vmatpush3.bf16.msra.mxu0 %v8357_v27 }
 0x439   :  { %7906 = vmatprep.subr.bf16.mxu0 %v8377_v0 }
 0x43c   :  { %7907 = vmatpush3.bf16.msra.mxu0 %v8360_v28  ;;  %v6105_v61 = vld [vmem:[#allocation5 + $0x28] sm:$0xff] }
 0x43d   :  { %7908 = vmatprep.subr.bf16.mxu0 %v8377_v0  ;;  %v7022_v30 = vcombine.low %v6105_v61, %v6105_v61  ;;  %v7023_v31 = vcombine.high %v6105_v61, %v6105_v61 }
 0x43f   :  { %6312 = vmatprep.mubr.bf16.mxu1 %v7023_v31 }
 0x440   :  { %7909 = vmatpush3.bf16.msra.mxu0 %v8365_v16  ;;  %6313 = vmatmul.mubr.bf16.vlgmr.msra.gmra.mrb[140].mxu1 %v7022_v30 }
 0x441   :  { %7914 = vmatprep.subr.bf16.mxu0 %v8377_v0 }
 0x443   :  { %7911 = vmatmul.mubr.msk.bf16.vlgmr.msra.gmra.mrb[144].mxu0 %vm2100_vm4, %v8366_v32 }
 0x444   :  { %7930 = vmatprep.mubr.msk.bf16.mxu0 %vm8378_vm1, %v8377_v0  ;;  %7915 = vmatpush3.bf16.msra.mxu0 %v8367_v33 }
 0x445   :  { %7916 = vmatprep.subr.bf16.mxu0 %v8377_v0 }
 0x448   :  { %7917 = vmatpush3.bf16.msra.mxu0 %v8368_v38 }
 0x449   :  { %7918 = vmatprep.subr.bf16.mxu0 %v8377_v0 }
 0x44c   :  { %7919 = vmatpush3.bf16.msra.mxu0 %v8369_v39 }
 0x44d   :  { %7920 = vmatprep.subr.bf16.mxu0 %v8377_v0 }
 0x450   :  { %7921 = vmatpush3.bf16.msra.mxu0 %v8370_v41 }
 0x451   :  { %7922 = vmatprep.subr.bf16.mxu0 %v8377_v0 }
 0x454   :  { %7923 = vmatpush3.bf16.msra.mxu0 %v8371_v47  ;;  %v7048_v47 = vld [vmem:[%s10208_s9 + $0x1] ss:$0 sm:$0xff] }
 0x455   :  { %7924 = vmatprep.subr.bf16.mxu0 %v8377_v0 }
 0x458   :  { %7925 = vmatpush3.bf16.msra.mxu0 %v8372_v60 }
 0x459   :  { %7926 = vmatprep.subr.bf16.mxu0 %v8377_v0 }
 0x45c   :  { %7927 = vmatpush3.bf16.msra.mxu0 %v8373_v44 }
 0x45d   :  { %7928 = vmatprep.subr.bf16.mxu0 %v8377_v0 }
 0x460   :  { %7929 = vmatpush3.bf16.msra.mxu0 %v8374_v52 }
 0x47f   :  { %v5366_v22 = vpop.f32.mrb[120].mxu1 }
 0x480   :  { %v7864_v35 = vpop.f32.mrb[121].mxu1 }
 0x481   :  { %v5369_v29 = vpop.f32.mrb[122].mxu1 }
 0x482   :  { %v7865_v36 = vpop.f32.mrb[123].mxu1 }
 0x483   :  { %v7046_v36 = vld [vmem:[%s10207_s7] ss:$0 sm:$0xff] }
 0x48e   :  { %v7560_v42 = vpop.f32.mrb[128].mxu0 }
 0x48f   :  { %v5579_v45 = vpop.f32.mrb[124].mxu1  ;;  %v7561_v46 = vpop.f32.mrb[129].mxu0 }
 0x490   :  { %v7876_v43 = vpop.f32.mrb[125].mxu1  ;;  %v7563_v34 = vpop.f32.mrb[130].mxu0 }
 0x491   :  { %v5582_v48 = vpop.f32.mrb[126].mxu1  ;;  %v7564_v49 = vpop.f32.mrb[131].mxu0 }
 0x492   :  { %v7877_v50 = vpop.f32.mrb[127].mxu1  ;;  %v6405_v43 = vpop.permute.xlu1 %6404  ;;  %v7047_v48 = vld [vmem:[%s10208_s9] ss:$0 sm:$0xff] }
 0x493   :  { %v6393_v34 = vpop.permute.xlu0 %6392  ;;  %vm6406_vm9 = vcmp.eq.s32.totalorder %v6405_v43, 1 }
 0x494   :  { %vm6394_vm10 = vcmp.eq.s32.totalorder %v6393_v34, 1  ;;  %v6411_v50 = vsel %vm6406_vm9, %v7048_v47, 0.0 }
 0x496   :  { %v7590_v37 = vpop.f32.mrb[132].mxu0  ;;  %v6418_v49 = vpop.permute.xlu1 %6417 }
 0x497   :  { %v7591_v51 = vpop.f32.mrb[133].mxu0  ;;  %vm6419_vm11 = vcmp.eq.s32.totalorder %v6418_v49, 1 }
 0x498   :  { %v7592_v53 = vadd.f32 %v7591_v51, %v7590_v37  ;;  %v7593_v54 = vpop.f32.mrb[134].mxu0  ;;  %v6399_v37 = vsel %vm6394_vm10, %v7047_v48, 0.0  ;;  %v7049_v51 = vld [vmem:[%s10208_s9 + $0x2] ss:$0 sm:$0xff] }
 0x499   :  { %v7594_v55 = vpop.f32.mrb[135].mxu0  ;;  %v6412_v54 = vadd.f32 %v6411_v50, %v6399_v37 }
 0x49a   :  { %v5367_v57 = vadd.f32 %v7592_v53, %v5366_v22  ;;  %v6431_v53 = vpop.permute.xlu0 %6430  ;;  %v6424_v55 = vsel %vm6419_vm11, %v7049_v51, 0.0 }
 0x49b   :  { %vm6432_vm12 = vcmp.eq.s32.totalorder %v6431_v53, 1  ;;  %v6425_v60 = vadd.f32 %v6424_v55, %v6412_v54 }
 0x4af   :  { %v7644_v5 = vpop.f32.mrb[128].mxu1 }
 0x4b0   :  { %v7645_v6 = vpop.f32.mrb[129].mxu1 }
 0x4b1   :  { %v7646_v7 = vadd.f32 %v7645_v6, %v7644_v5  ;;  %v7647_v8 = vpop.f32.mrb[130].mxu1 }
 0x4b2   :  { %v7648_v40 = vpop.f32.mrb[131].mxu1 }
 0x4b6   :  { %v7617_v59 = vpop.f32.mrb[136].mxu0 }
 0x4b7   :  { %v7618_v9 = vpop.f32.mrb[137].mxu0 }
 0x4b8   :  { %v7619_v10 = vadd.f32 %v7618_v9, %v7617_v59  ;;  %v7620_v11 = vpop.f32.mrb[138].mxu0 }
 0x4b9   :  { %v7621_v12 = vpop.f32.mrb[139].mxu0 }
 0x4ba   :  { %v5540_v14 = vadd.f32 %v7619_v10, %v5367_v57  ;;  %v7050_v57 = vld [vmem:[%s10208_s9 + $0x3] ss:$0 sm:$0xff] }
 0x4bb   :  { %v6437_v44 = vsel %vm6432_vm12, %v7050_v57, 0.0 }
 0x4bc   :  { %v5580_v0 = vadd.f32 %v5579_v45, %v5540_v14  ;;  %v6438_v62 = vadd.f32 %v6437_v44, %v6425_v60 }
 0x4bf   :  { %v5834_v58 = vpop.f32.mrb[132].mxu1 }
 0x4c0   :  { %v5835_v13 = vadd.f32 %v7646_v7, %v5834_v58  ;;  %v7888_v15 = vpop.f32.mrb[133].mxu1 }
 0x4c1   :  { %v5837_v18 = vpop.f32.mrb[134].mxu1 }
 0x4c2   :  { %v5840_v2 = vadd.f32 %v5835_v13, %v5580_v0  ;;  %v7889_v19 = vpop.f32.mrb[135].mxu1 }
 0x4df   :  { %v6098_v20 = vpop.f32.mrb[136].mxu1 }
 0x4e0   :  { %v7900_v21 = vpop.f32.mrb[137].mxu1 }
 0x4e1   :  { %v6101_v23 = vpop.f32.mrb[138].mxu1 }
 0x4e2   :  { %v7901_v24 = vpop.f32.mrb[139].mxu1 }
 0x506   :  { %v7671_v25 = vpop.f32.mrb[140].mxu0 }
 0x507   :  { %v7672_v26 = vpop.f32.mrb[141].mxu0 }
 0x508   :  { %v7673_v4 = vadd.f32 %v7672_v26, %v7671_v25  ;;  %v7674_v17 = vpop.f32.mrb[142].mxu0 }
 0x509   :  { %v7675_v27 = vpop.f32.mrb[143].mxu0 }
 0x50a   :  { %v6099_v28 = vadd.f32 %v7673_v4, %v6098_v20 }
 0x50c   :  { %v6104_v61 = vadd.f32 %v6099_v28, %v5840_v2 }
 0x513   :  { %v7698_v16 = vpop.f32.mrb[140].mxu1 }
 0x514   :  { %v7699_v30 = vpop.f32.mrb[141].mxu1 }
 0x515   :  { %v7700_v31 = vadd.f32 %v7699_v30, %v7698_v16  ;;  %v7701_v32 = vpop.f32.mrb[142].mxu1 }
 0x516   :  { %v6354_v33 = vpop.f32.mrb[144].mxu0  ;;  %v7702_v22 = vpop.f32.mrb[143].mxu1 }
 0x517   :  { %v6355_v35 = vadd.f32 %v7700_v31, %v6354_v33  ;;  %v7912_v29 = vpop.f32.mrb[145].mxu0 }
 0x518   :  { %v6357_v38 = vpop.f32.mrb[146].mxu0 }
 0x519   :  { %v6360_v39 = vadd.f32 %v6355_v35, %v6104_v61  ;;  %v7913_v41 = vpop.f32.mrb[147].mxu0 }
 0x51b   :  { %v6368_v42 = vadd.f32 %v7046_v36, %v6360_v39 }
 0x51d   :  { %v6369_v45 = vmax.f32 %v6368_v42, 0.0 }
 0x51f   :  { %v6370_v46 = vpack.c.bf16 %v6369_v45, %v6369_v45 }
 0x521   :  { %7931 = vmatmul.mubr.bf16.vlgmr.msra.gmra.mrb[148].mxu0 %v6370_v46 }
 0x5f4   :  { %v6521_v56 = vpop.f32.mrb[148].mxu0 }
 0x5f5   :  { %v6522_v63 = vadd.f32 %v6521_v56, %v6438_v62  ;;  %v7932_v52 = vpop.f32.mrb[149].mxu0 }
 0x5f6   :  { %v6524_v1 = vpop.f32.mrb[150].mxu0 }
 0x5f7   :  { %6527 = vst [vmem:[%s10209_s10] sm:$0xff] %v6522_v63  ;;  %v7933_v3 = vpop.f32.mrb[151].mxu0 }

</bundles_post_ra>
